<compile_context>
chip_gen: v7x
topology: tpu7x:2x2x1
jax: 0.10.0
libtpu: 0.0.40
codegen_flags: <defaults>
</compile_context>

<pallas_src>
import jax
import jax.numpy as jnp
from jax.experimental import pallas as pl
from jax.experimental.pallas import tpu as pltpu

_LN_EPS = 1e-5  # torch.nn.LayerNorm default
_N_ENC = 4
_N_DEC = 4


def _round_up(x, m):
    return (x + m - 1) // m * m


# ----------------------------- fused kernel ---------------------------------


def _ln_block(h, w_ref, vec_ref):
    """Linear -> LayerNorm -> ReLU (Dropout = identity at inference).

    vec_ref is the packed (3, N) f32 array [linear bias; LN gamma; LN beta].
    """
    # Linear: bf16 MXU inputs, f32 accumulate.
    y = jnp.dot(h.astype(jnp.bfloat16), w_ref[...],
                preferred_element_type=jnp.float32)
    y = y + vec_ref[0:1, :]                            # linear bias

    # One-pass moments: the two lane reductions are independent (overlap on
    # XLU); biased variance like torch.nn.LayerNorm, eps inside rsqrt (EUP).
    mean = jnp.mean(y, axis=-1, keepdims=True)
    mean_sq = jnp.mean(y * y, axis=-1, keepdims=True)
    var = jnp.maximum(mean_sq - mean * mean, 0.0)      # guard tiny negatives
    rs = jax.lax.rsqrt(var + _LN_EPS)                  # per-row scale

    y = (y - mean) * rs
    y = y * vec_ref[1:2, :] + vec_ref[2:3, :]          # gamma, beta (per-lane)
    return jnp.maximum(y, 0.0)                         # ReLU


def _fused_ae_kernel(*refs):
    # refs = [x, (w, vec3)*4 enc, lat_w, lat_b, (w, vec3)*4 dec, out]
    x_ref = refs[0]
    o_ref = refs[-1]
    p = refs[1:-1]

    h = x_ref[...]
    i = 0
    for _ in range(_N_ENC):                            # encoder
        h = _ln_block(h, p[i], p[i + 1])
        i += 2
    # latent: Linear -> ReLU (output zero-padded to 128 lanes)
    y = jnp.dot(h.astype(jnp.bfloat16), p[i][...],
                preferred_element_type=jnp.float32) + p[i + 1][...]
    h = jnp.maximum(y, 0.0)
    i += 2
    for _ in range(_N_DEC):                            # decoder
        h = _ln_block(h, p[i], p[i + 1])
        i += 2
    o_ref[...] = h


def _zero_map(i):
    return (0, 0)


def _param_spec(shape):
    """Whole-array VMEM-resident parameter block, single-buffered if possible.

    Constant index_map -> block is never re-fetched across grid steps, so a
    second pipeline buffer is pure VMEM waste.  Fall back gracefully if this
    JAX version's BlockSpec does not take pipeline_mode.
    """
    buffered = getattr(pl, "Buffered", None)
    if buffered is not None:
        try:
            return pl.BlockSpec(shape, _zero_map, pipeline_mode=buffered(1))
        except TypeError:
            pass
    return pl.BlockSpec(shape, _zero_map)


def _fused_call(x2d, flat_params, tm):
    M, in_dims = x2d.shape
    grid = (M // tm,)

    in_specs = [pl.BlockSpec((tm, in_dims), lambda i: (i, 0))]
    for prm in flat_params:
        in_specs.append(_param_spec(prm.shape))

    return pl.pallas_call(
        _fused_ae_kernel,
        out_shape=jax.ShapeDtypeStruct((M, 1024), jnp.float32),
        grid=grid,
        in_specs=in_specs,
        out_specs=pl.BlockSpec((tm, 1024), lambda i: (i, 0)),
        compiler_params=pltpu.CompilerParams(
            dimension_semantics=("parallel",),
            # Working set at tm=512: ~3.4 MiB single-buffered params
            # + x/out double-buffers (~5 MiB) + live f32 slabs (<8 MiB);
            # 48 MiB is comfortable on v5e/v6e (128 MiB) and v7x (64 MiB).
            vmem_limit_bytes=48 * 1024 * 1024,
        ),
    )(x2d, *flat_params)


# ----------------------------- parameters -----------------------------------


def _xavier_normal(key, fan_in, fan_out):
    # nn.init.xavier_normal_: std = sqrt(2 / (fan_in + fan_out))
    std = (2.0 / (fan_in + fan_out)) ** 0.5
    # stored as (in, out) so the kernel computes x @ W (== x @ torch_W.T)
    return std * jax.random.normal(key, (fan_in, fan_out), jnp.float32)


def init_params(key, in_dims, h_dims):
    enc_dims = [(in_dims, 1024), (1024, 512), (512, 256), (256, 128)]
    dec_dims = [(h_dims, 128), (128, 256), (256, 512), (512, 1024)]
    h_pad = _round_up(h_dims, 128)  # lane-dense latent

    keys = jax.random.split(key, len(enc_dims) + 1 + len(dec_dims))
    flat = []

    def add_block(k, d_in, d_out, pad_in_to=None):
        w = _xavier_normal(k, d_in, d_out)
        if pad_in_to is not None and pad_in_to > d_in:
            w = jnp.pad(w, ((0, pad_in_to - d_in), (0, 0)))  # zero rows
        flat.append(w.astype(jnp.bfloat16))                   # weight (bf16)
        # packed per-layer vectors: [Linear bias=0; LN gamma=1; LN beta=0]
        vec = jnp.stack([jnp.zeros((d_out,), jnp.float32),
                         jnp.ones((d_out,), jnp.float32),
                         jnp.zeros((d_out,), jnp.float32)], axis=0)
        flat.append(vec)

    for i, (di, do) in enumerate(enc_dims):
        add_block(keys[i], di, do)

    # latent Linear(128, h_dims); output columns zero-padded h_dims -> h_pad
    lw = _xavier_normal(keys[len(enc_dims)], 128, h_dims)
    lw = jnp.pad(lw, ((0, 0), (0, h_pad - h_dims)))
    flat.append(lw.astype(jnp.bfloat16))
    flat.append(jnp.zeros((1, h_pad), jnp.float32))            # latent bias = 0

    # decoder; first block's input rows zero-padded h_dims -> h_pad
    for i, (di, do) in enumerate(dec_dims):
        k = keys[len(enc_dims) + 1 + i]
        add_block(k, di, do, pad_in_to=(h_pad if i == 0 else None))

    return tuple(flat)


# ----------------------------- forward --------------------------------------


def _choose_tm(M):
    """Row tile: cap at 512 (v7x 64 MiB VMEM safe), >= 2 grid steps when
    possible so both v7x TensorCores get work on the 'parallel' axis."""
    tm = min(512, _round_up(M, 8))
    if _round_up(M, 8) > 8:
        tm = min(tm, _round_up((M + 1) // 2, 8))
    return tm


@jax.jit
def autoencoder_forward(flat_params, x):
    # x: (B, C, H, W)  ->  'B C H W -> B C (H W)'  ->  rows (B*C, H*W)
    B, C, H, W = x.shape
    M = B * C
    h = x.reshape(M, H * W).astype(jnp.float32)

    tm = _choose_tm(M)
    M_pad = _round_up(M, tm)
    if M_pad != M:
        h = jnp.pad(h, ((0, M_pad - M), (0, 0)))

    out = _fused_call(h, flat_params, tm)
    return out[:M].reshape(B, C, 1024)


# ----------------------------- main -----------------------------------------


if __name__ == "__main__":
    key = jax.random.PRNGKey(0)
    k_param, k_data = jax.random.split(key)

    # Small shapes consistent with the module: is_image=True so in_dims = H*W.
    B, C, H, W = 2, 4, 16, 16
    in_dims = H * W  # 256
    h_dims = 10

    params = init_params(k_param, in_dims, h_dims)
    x = jax.random.normal(k_data, (B, C, H, W), jnp.float32)

    out = autoencoder_forward(params, x)
    out = jax.block_until_ready(out)

    assert out.shape == (B, C, 1024), out.shape
    assert bool(jnp.all(jnp.isfinite(out)))
    print("KERNEL_OK")
</pallas_src>

<mosaic_0001>
module attributes {stable_mosaic.version = 11 : i64} {
  func.func @_fused_ae_kernel(%arg0: i32, %arg1: memref<8x256xf32, #tpu.memory_space<vmem>>, %arg2: memref<256x1024xbf16, #tpu.memory_space<vmem>>, %arg3: memref<3x1024xf32, #tpu.memory_space<vmem>>, %arg4: memref<1024x512xbf16, #tpu.memory_space<vmem>>, %arg5: memref<3x512xf32, #tpu.memory_space<vmem>>, %arg6: memref<512x256xbf16, #tpu.memory_space<vmem>>, %arg7: memref<3x256xf32, #tpu.memory_space<vmem>>, %arg8: memref<256x128xbf16, #tpu.memory_space<vmem>>, %arg9: memref<3x128xf32, #tpu.memory_space<vmem>>, %arg10: memref<128x128xbf16, #tpu.memory_space<vmem>>, %arg11: memref<1x128xf32, #tpu.memory_space<vmem>>, %arg12: memref<128x128xbf16, #tpu.memory_space<vmem>>, %arg13: memref<3x128xf32, #tpu.memory_space<vmem>>, %arg14: memref<128x256xbf16, #tpu.memory_space<vmem>>, %arg15: memref<3x256xf32, #tpu.memory_space<vmem>>, %arg16: memref<256x512xbf16, #tpu.memory_space<vmem>>, %arg17: memref<3x512xf32, #tpu.memory_space<vmem>>, %arg18: memref<512x1024xbf16, #tpu.memory_space<vmem>>, %arg19: memref<3x1024xf32, #tpu.memory_space<vmem>>, %arg20: memref<8x1024xf32, #tpu.memory_space<vmem>>) attributes {dimension_semantics = [#tpu.dimension_semantics<parallel>], iteration_bounds = array<i64: 1>, scalar_prefetch = 0 : i64, scratch_operands = 0 : i64, tpu.core_type = #tpu.core_type<tc>, window_params = [{transform_indices = @transform_0, window_bounds = array<i64: 8, 256>}, {pipeline_mode = #tpu.pipeline_mode<synchronous>, transform_indices = @transform_1, window_bounds = array<i64: 256, 1024>}, {pipeline_mode = #tpu.pipeline_mode<synchronous>, transform_indices = @transform_2, window_bounds = array<i64: 3, 1024>}, {pipeline_mode = #tpu.pipeline_mode<synchronous>, transform_indices = @transform_3, window_bounds = array<i64: 1024, 512>}, {pipeline_mode = #tpu.pipeline_mode<synchronous>, transform_indices = @transform_4, window_bounds = array<i64: 3, 512>}, {pipeline_mode = #tpu.pipeline_mode<synchronous>, transform_indices = @transform_5, window_bounds = array<i64: 512, 256>}, {pipeline_mode = #tpu.pipeline_mode<synchronous>, transform_indices = @transform_6, window_bounds = array<i64: 3, 256>}, {pipeline_mode = #tpu.pipeline_mode<synchronous>, transform_indices = @transform_7, window_bounds = array<i64: 256, 128>}, {pipeline_mode = #tpu.pipeline_mode<synchronous>, transform_indices = @transform_8, window_bounds = array<i64: 3, 128>}, {pipeline_mode = #tpu.pipeline_mode<synchronous>, transform_indices = @transform_9, window_bounds = array<i64: 128, 128>}, {pipeline_mode = #tpu.pipeline_mode<synchronous>, transform_indices = @transform_10, window_bounds = array<i64: 1, 128>}, {pipeline_mode = #tpu.pipeline_mode<synchronous>, transform_indices = @transform_11, window_bounds = array<i64: 128, 128>}, {pipeline_mode = #tpu.pipeline_mode<synchronous>, transform_indices = @transform_12, window_bounds = array<i64: 3, 128>}, {pipeline_mode = #tpu.pipeline_mode<synchronous>, transform_indices = @transform_13, window_bounds = array<i64: 128, 256>}, {pipeline_mode = #tpu.pipeline_mode<synchronous>, transform_indices = @transform_14, window_bounds = array<i64: 3, 256>}, {pipeline_mode = #tpu.pipeline_mode<synchronous>, transform_indices = @transform_15, window_bounds = array<i64: 256, 512>}, {pipeline_mode = #tpu.pipeline_mode<synchronous>, transform_indices = @transform_16, window_bounds = array<i64: 3, 512>}, {pipeline_mode = #tpu.pipeline_mode<synchronous>, transform_indices = @transform_17, window_bounds = array<i64: 512, 1024>}, {pipeline_mode = #tpu.pipeline_mode<synchronous>, transform_indices = @transform_18, window_bounds = array<i64: 3, 1024>}, {transform_indices = @transform_19, window_bounds = array<i64: 8, 1024>}]} {
    %c0 = arith.constant 0 : index
    %c0_0 = arith.constant 0 : index
    %0 = vector.load %arg1[%c0, %c0_0] : memref<8x256xf32, #tpu.memory_space<vmem>>, vector<8x256xf32>
    %1 = arith.truncf %0 : vector<8x256xf32> to vector<8x256xbf16>
    %c0_1 = arith.constant 0 : index
    %c0_2 = arith.constant 0 : index
    %2 = vector.load %arg2[%c0_1, %c0_2] : memref<256x1024xbf16, #tpu.memory_space<vmem>>, vector<256x1024xbf16>
    %cst = arith.constant dense<0.000000e+00> : vector<8x1024xf32>
    %3 = tpu.matmul %1, %2, %cst {dimension_numbers = #tpu.dot_dimension_numbers<[1], [0], [0], [1], [0, 0, 1, 1], [], []>} : vector<8x256xbf16>, vector<256x1024xbf16>, vector<8x1024xf32> -> vector<8x1024xf32>
    %c0_3 = arith.constant 0 : index
    %c0_4 = arith.constant 0 : index
    %4 = vector.load %arg3[%c0_3, %c0_4] : memref<3x1024xf32, #tpu.memory_space<vmem>>, vector<1x1024xf32>
    %5 = vector.broadcast %4 : vector<1x1024xf32> to vector<8x1024xf32>
    %6 = arith.addf %3, %5 : vector<8x1024xf32>
    %cst_5 = arith.constant dense<0.000000e+00> : vector<8xf32>
    %7 = vector.multi_reduction <add>, %6, %cst_5 [1] : vector<8x1024xf32> to vector<8xf32>
    %8 = vector.shape_cast %7 : vector<8xf32> to vector<8x1xf32>
    %cst_6 = arith.constant 1.024000e+03 : f32
    %9 = vector.broadcast %cst_6 : f32 to vector<8x1xf32>
    %10 = arith.divf %8, %9 : vector<8x1xf32>
    %11 = arith.mulf %6, %6 : vector<8x1024xf32>
    %cst_7 = arith.constant dense<0.000000e+00> : vector<8xf32>
    %12 = vector.multi_reduction <add>, %11, %cst_7 [1] : vector<8x1024xf32> to vector<8xf32>
    %13 = vector.shape_cast %12 : vector<8xf32> to vector<8x1xf32>
    %cst_8 = arith.constant 1.024000e+03 : f32
    %14 = vector.broadcast %cst_8 : f32 to vector<8x1xf32>
    %15 = arith.divf %13, %14 : vector<8x1xf32>
    %16 = arith.mulf %10, %10 : vector<8x1xf32>
    %17 = arith.subf %15, %16 : vector<8x1xf32>
    %cst_9 = arith.constant 0.000000e+00 : f32
    %18 = vector.broadcast %cst_9 : f32 to vector<8x1xf32>
    %19 = arith.maximumf %17, %18 : vector<8x1xf32>
    %cst_10 = arith.constant 9.99999974E-6 : f32
    %20 = vector.broadcast %cst_10 : f32 to vector<8x1xf32>
    %21 = arith.addf %19, %20 : vector<8x1xf32>
    %22 = math.rsqrt %21 : vector<8x1xf32>
    %23 = vector.broadcast %10 : vector<8x1xf32> to vector<8x1024xf32>
    %24 = arith.subf %6, %23 : vector<8x1024xf32>
    %25 = vector.broadcast %22 : vector<8x1xf32> to vector<8x1024xf32>
    %26 = arith.mulf %24, %25 : vector<8x1024xf32>
    %c1 = arith.constant 1 : index
    %c0_11 = arith.constant 0 : index
    %27 = vector.load %arg3[%c1, %c0_11] : memref<3x1024xf32, #tpu.memory_space<vmem>>, vector<1x1024xf32>
    %28 = vector.broadcast %27 : vector<1x1024xf32> to vector<8x1024xf32>
    %29 = arith.mulf %26, %28 : vector<8x1024xf32>
    %c2 = arith.constant 2 : index
    %c0_12 = arith.constant 0 : index
    %30 = vector.load %arg3[%c2, %c0_12] : memref<3x1024xf32, #tpu.memory_space<vmem>>, vector<1x1024xf32>
    %31 = vector.broadcast %30 : vector<1x1024xf32> to vector<8x1024xf32>
    %32 = arith.addf %29, %31 : vector<8x1024xf32>
    %cst_13 = arith.constant 0.000000e+00 : f32
    %33 = vector.broadcast %cst_13 : f32 to vector<8x1024xf32>
    %34 = arith.maximumf %32, %33 : vector<8x1024xf32>
    %35 = arith.truncf %34 : vector<8x1024xf32> to vector<8x1024xbf16>
    %c0_14 = arith.constant 0 : index
    %c0_15 = arith.constant 0 : index
    %36 = vector.load %arg4[%c0_14, %c0_15] : memref<1024x512xbf16, #tpu.memory_space<vmem>>, vector<1024x512xbf16>
    %cst_16 = arith.constant dense<0.000000e+00> : vector<8x512xf32>
    %37 = tpu.matmul %35, %36, %cst_16 {dimension_numbers = #tpu.dot_dimension_numbers<[1], [0], [0], [1], [0, 0, 1, 1], [], []>} : vector<8x1024xbf16>, vector<1024x512xbf16>, vector<8x512xf32> -> vector<8x512xf32>
    %c0_17 = arith.constant 0 : index
    %c0_18 = arith.constant 0 : index
    %38 = vector.load %arg5[%c0_17, %c0_18] : memref<3x512xf32, #tpu.memory_space<vmem>>, vector<1x512xf32>
    %39 = vector.broadcast %38 : vector<1x512xf32> to vector<8x512xf32>
    %40 = arith.addf %37, %39 : vector<8x512xf32>
    %cst_19 = arith.constant dense<0.000000e+00> : vector<8xf32>
    %41 = vector.multi_reduction <add>, %40, %cst_19 [1] : vector<8x512xf32> to vector<8xf32>
    %42 = vector.shape_cast %41 : vector<8xf32> to vector<8x1xf32>
    %cst_20 = arith.constant 5.120000e+02 : f32
    %43 = vector.broadcast %cst_20 : f32 to vector<8x1xf32>
    %44 = arith.divf %42, %43 : vector<8x1xf32>
    %45 = arith.mulf %40, %40 : vector<8x512xf32>
    %cst_21 = arith.constant dense<0.000000e+00> : vector<8xf32>
    %46 = vector.multi_reduction <add>, %45, %cst_21 [1] : vector<8x512xf32> to vector<8xf32>
    %47 = vector.shape_cast %46 : vector<8xf32> to vector<8x1xf32>
    %cst_22 = arith.constant 5.120000e+02 : f32
    %48 = vector.broadcast %cst_22 : f32 to vector<8x1xf32>
    %49 = arith.divf %47, %48 : vector<8x1xf32>
    %50 = arith.mulf %44, %44 : vector<8x1xf32>
    %51 = arith.subf %49, %50 : vector<8x1xf32>
    %cst_23 = arith.constant 0.000000e+00 : f32
    %52 = vector.broadcast %cst_23 : f32 to vector<8x1xf32>
    %53 = arith.maximumf %51, %52 : vector<8x1xf32>
    %cst_24 = arith.constant 9.99999974E-6 : f32
    %54 = vector.broadcast %cst_24 : f32 to vector<8x1xf32>
    %55 = arith.addf %53, %54 : vector<8x1xf32>
    %56 = math.rsqrt %55 : vector<8x1xf32>
    %57 = vector.broadcast %44 : vector<8x1xf32> to vector<8x512xf32>
    %58 = arith.subf %40, %57 : vector<8x512xf32>
    %59 = vector.broadcast %56 : vector<8x1xf32> to vector<8x512xf32>
    %60 = arith.mulf %58, %59 : vector<8x512xf32>
    %c1_25 = arith.constant 1 : index
    %c0_26 = arith.constant 0 : index
    %61 = vector.load %arg5[%c1_25, %c0_26] : memref<3x512xf32, #tpu.memory_space<vmem>>, vector<1x512xf32>
    %62 = vector.broadcast %61 : vector<1x512xf32> to vector<8x512xf32>
    %63 = arith.mulf %60, %62 : vector<8x512xf32>
    %c2_27 = arith.constant 2 : index
    %c0_28 = arith.constant 0 : index
    %64 = vector.load %arg5[%c2_27, %c0_28] : memref<3x512xf32, #tpu.memory_space<vmem>>, vector<1x512xf32>
    %65 = vector.broadcast %64 : vector<1x512xf32> to vector<8x512xf32>
    %66 = arith.addf %63, %65 : vector<8x512xf32>
    %cst_29 = arith.constant 0.000000e+00 : f32
    %67 = vector.broadcast %cst_29 : f32 to vector<8x512xf32>
    %68 = arith.maximumf %66, %67 : vector<8x512xf32>
    %69 = arith.truncf %68 : vector<8x512xf32> to vector<8x512xbf16>
    %c0_30 = arith.constant 0 : index
    %c0_31 = arith.constant 0 : index
    %70 = vector.load %arg6[%c0_30, %c0_31] : memref<512x256xbf16, #tpu.memory_space<vmem>>, vector<512x256xbf16>
    %cst_32 = arith.constant dense<0.000000e+00> : vector<8x256xf32>
    %71 = tpu.matmul %69, %70, %cst_32 {dimension_numbers = #tpu.dot_dimension_numbers<[1], [0], [0], [1], [0, 0, 1, 1], [], []>} : vector<8x512xbf16>, vector<512x256xbf16>, vector<8x256xf32> -> vector<8x256xf32>
    %c0_33 = arith.constant 0 : index
    %c0_34 = arith.constant 0 : index
    %72 = vector.load %arg7[%c0_33, %c0_34] : memref<3x256xf32, #tpu.memory_space<vmem>>, vector<1x256xf32>
    %73 = vector.broadcast %72 : vector<1x256xf32> to vector<8x256xf32>
    %74 = arith.addf %71, %73 : vector<8x256xf32>
    %cst_35 = arith.constant dense<0.000000e+00> : vector<8xf32>
    %75 = vector.multi_reduction <add>, %74, %cst_35 [1] : vector<8x256xf32> to vector<8xf32>
    %76 = vector.shape_cast %75 : vector<8xf32> to vector<8x1xf32>
    %cst_36 = arith.constant 2.560000e+02 : f32
    %77 = vector.broadcast %cst_36 : f32 to vector<8x1xf32>
    %78 = arith.divf %76, %77 : vector<8x1xf32>
    %79 = arith.mulf %74, %74 : vector<8x256xf32>
    %cst_37 = arith.constant dense<0.000000e+00> : vector<8xf32>
    %80 = vector.multi_reduction <add>, %79, %cst_37 [1] : vector<8x256xf32> to vector<8xf32>
    %81 = vector.shape_cast %80 : vector<8xf32> to vector<8x1xf32>
    %cst_38 = arith.constant 2.560000e+02 : f32
    %82 = vector.broadcast %cst_38 : f32 to vector<8x1xf32>
    %83 = arith.divf %81, %82 : vector<8x1xf32>
    %84 = arith.mulf %78, %78 : vector<8x1xf32>
    %85 = arith.subf %83, %84 : vector<8x1xf32>
    %cst_39 = arith.constant 0.000000e+00 : f32
    %86 = vector.broadcast %cst_39 : f32 to vector<8x1xf32>
    %87 = arith.maximumf %85, %86 : vector<8x1xf32>
    %cst_40 = arith.constant 9.99999974E-6 : f32
    %88 = vector.broadcast %cst_40 : f32 to vector<8x1xf32>
    %89 = arith.addf %87, %88 : vector<8x1xf32>
    %90 = math.rsqrt %89 : vector<8x1xf32>
    %91 = vector.broadcast %78 : vector<8x1xf32> to vector<8x256xf32>
    %92 = arith.subf %74, %91 : vector<8x256xf32>
    %93 = vector.broadcast %90 : vector<8x1xf32> to vector<8x256xf32>
    %94 = arith.mulf %92, %93 : vector<8x256xf32>
    %c1_41 = arith.constant 1 : index
    %c0_42 = arith.constant 0 : index
    %95 = vector.load %arg7[%c1_41, %c0_42] : memref<3x256xf32, #tpu.memory_space<vmem>>, vector<1x256xf32>
    %96 = vector.broadcast %95 : vector<1x256xf32> to vector<8x256xf32>
    %97 = arith.mulf %94, %96 : vector<8x256xf32>
    %c2_43 = arith.constant 2 : index
    %c0_44 = arith.constant 0 : index
    %98 = vector.load %arg7[%c2_43, %c0_44] : memref<3x256xf32, #tpu.memory_space<vmem>>, vector<1x256xf32>
    %99 = vector.broadcast %98 : vector<1x256xf32> to vector<8x256xf32>
    %100 = arith.addf %97, %99 : vector<8x256xf32>
    %cst_45 = arith.constant 0.000000e+00 : f32
    %101 = vector.broadcast %cst_45 : f32 to vector<8x256xf32>
    %102 = arith.maximumf %100, %101 : vector<8x256xf32>
    %103 = arith.truncf %102 : vector<8x256xf32> to vector<8x256xbf16>
    %c0_46 = arith.constant 0 : index
    %c0_47 = arith.constant 0 : index
    %104 = vector.load %arg8[%c0_46, %c0_47] : memref<256x128xbf16, #tpu.memory_space<vmem>>, vector<256x128xbf16>
    %cst_48 = arith.constant dense<0.000000e+00> : vector<8x128xf32>
    %105 = tpu.matmul %103, %104, %cst_48 {dimension_numbers = #tpu.dot_dimension_numbers<[1], [0], [0], [1], [0, 0, 1, 1], [], []>} : vector<8x256xbf16>, vector<256x128xbf16>, vector<8x128xf32> -> vector<8x128xf32>
    %c0_49 = arith.constant 0 : index
    %c0_50 = arith.constant 0 : index
    %106 = vector.load %arg9[%c0_49, %c0_50] : memref<3x128xf32, #tpu.memory_space<vmem>>, vector<1x128xf32>
    %107 = vector.broadcast %106 : vector<1x128xf32> to vector<8x128xf32>
    %108 = arith.addf %105, %107 : vector<8x128xf32>
    %cst_51 = arith.constant dense<0.000000e+00> : vector<8xf32>
    %109 = vector.multi_reduction <add>, %108, %cst_51 [1] : vector<8x128xf32> to vector<8xf32>
    %110 = vector.shape_cast %109 : vector<8xf32> to vector<8x1xf32>
    %cst_52 = arith.constant 1.280000e+02 : f32
    %111 = vector.broadcast %cst_52 : f32 to vector<8x1xf32>
    %112 = arith.divf %110, %111 : vector<8x1xf32>
    %113 = arith.mulf %108, %108 : vector<8x128xf32>
    %cst_53 = arith.constant dense<0.000000e+00> : vector<8xf32>
    %114 = vector.multi_reduction <add>, %113, %cst_53 [1] : vector<8x128xf32> to vector<8xf32>
    %115 = vector.shape_cast %114 : vector<8xf32> to vector<8x1xf32>
    %cst_54 = arith.constant 1.280000e+02 : f32
    %116 = vector.broadcast %cst_54 : f32 to vector<8x1xf32>
    %117 = arith.divf %115, %116 : vector<8x1xf32>
    %118 = arith.mulf %112, %112 : vector<8x1xf32>
    %119 = arith.subf %117, %118 : vector<8x1xf32>
    %cst_55 = arith.constant 0.000000e+00 : f32
    %120 = vector.broadcast %cst_55 : f32 to vector<8x1xf32>
    %121 = arith.maximumf %119, %120 : vector<8x1xf32>
    %cst_56 = arith.constant 9.99999974E-6 : f32
    %122 = vector.broadcast %cst_56 : f32 to vector<8x1xf32>
    %123 = arith.addf %121, %122 : vector<8x1xf32>
    %124 = math.rsqrt %123 : vector<8x1xf32>
    %125 = vector.broadcast %112 : vector<8x1xf32> to vector<8x128xf32>
    %126 = arith.subf %108, %125 : vector<8x128xf32>
    %127 = vector.broadcast %124 : vector<8x1xf32> to vector<8x128xf32>
    %128 = arith.mulf %126, %127 : vector<8x128xf32>
    %c1_57 = arith.constant 1 : index
    %c0_58 = arith.constant 0 : index
    %129 = vector.load %arg9[%c1_57, %c0_58] : memref<3x128xf32, #tpu.memory_space<vmem>>, vector<1x128xf32>
    %130 = vector.broadcast %129 : vector<1x128xf32> to vector<8x128xf32>
    %131 = arith.mulf %128, %130 : vector<8x128xf32>
    %c2_59 = arith.constant 2 : index
    %c0_60 = arith.constant 0 : index
    %132 = vector.load %arg9[%c2_59, %c0_60] : memref<3x128xf32, #tpu.memory_space<vmem>>, vector<1x128xf32>
    %133 = vector.broadcast %132 : vector<1x128xf32> to vector<8x128xf32>
    %134 = arith.addf %131, %133 : vector<8x128xf32>
    %cst_61 = arith.constant 0.000000e+00 : f32
    %135 = vector.broadcast %cst_61 : f32 to vector<8x128xf32>
    %136 = arith.maximumf %134, %135 : vector<8x128xf32>
    %137 = arith.truncf %136 : vector<8x128xf32> to vector<8x128xbf16>
    %c0_62 = arith.constant 0 : index
    %c0_63 = arith.constant 0 : index
    %138 = vector.load %arg10[%c0_62, %c0_63] : memref<128x128xbf16, #tpu.memory_space<vmem>>, vector<128x128xbf16>
    %cst_64 = arith.constant dense<0.000000e+00> : vector<8x128xf32>
    %139 = tpu.matmul %137, %138, %cst_64 {dimension_numbers = #tpu.dot_dimension_numbers<[1], [0], [0], [1], [0, 0, 1, 1], [], []>} : vector<8x128xbf16>, vector<128x128xbf16>, vector<8x128xf32> -> vector<8x128xf32>
    %c0_65 = arith.constant 0 : index
    %c0_66 = arith.constant 0 : index
    %140 = vector.load %arg11[%c0_65, %c0_66] : memref<1x128xf32, #tpu.memory_space<vmem>>, vector<1x128xf32>
    %141 = vector.broadcast %140 : vector<1x128xf32> to vector<8x128xf32>
    %142 = arith.addf %139, %141 : vector<8x128xf32>
    %cst_67 = arith.constant 0.000000e+00 : f32
    %143 = vector.broadcast %cst_67 : f32 to vector<8x128xf32>
    %144 = arith.maximumf %142, %143 : vector<8x128xf32>
    %145 = arith.truncf %144 : vector<8x128xf32> to vector<8x128xbf16>
    %c0_68 = arith.constant 0 : index
    %c0_69 = arith.constant 0 : index
    %146 = vector.load %arg12[%c0_68, %c0_69] : memref<128x128xbf16, #tpu.memory_space<vmem>>, vector<128x128xbf16>
    %cst_70 = arith.constant dense<0.000000e+00> : vector<8x128xf32>
    %147 = tpu.matmul %145, %146, %cst_70 {dimension_numbers = #tpu.dot_dimension_numbers<[1], [0], [0], [1], [0, 0, 1, 1], [], []>} : vector<8x128xbf16>, vector<128x128xbf16>, vector<8x128xf32> -> vector<8x128xf32>
    %c0_71 = arith.constant 0 : index
    %c0_72 = arith.constant 0 : index
    %148 = vector.load %arg13[%c0_71, %c0_72] : memref<3x128xf32, #tpu.memory_space<vmem>>, vector<1x128xf32>
    %149 = vector.broadcast %148 : vector<1x128xf32> to vector<8x128xf32>
    %150 = arith.addf %147, %149 : vector<8x128xf32>
    %cst_73 = arith.constant dense<0.000000e+00> : vector<8xf32>
    %151 = vector.multi_reduction <add>, %150, %cst_73 [1] : vector<8x128xf32> to vector<8xf32>
    %152 = vector.shape_cast %151 : vector<8xf32> to vector<8x1xf32>
    %cst_74 = arith.constant 1.280000e+02 : f32
    %153 = vector.broadcast %cst_74 : f32 to vector<8x1xf32>
    %154 = arith.divf %152, %153 : vector<8x1xf32>
    %155 = arith.mulf %150, %150 : vector<8x128xf32>
    %cst_75 = arith.constant dense<0.000000e+00> : vector<8xf32>
    %156 = vector.multi_reduction <add>, %155, %cst_75 [1] : vector<8x128xf32> to vector<8xf32>
    %157 = vector.shape_cast %156 : vector<8xf32> to vector<8x1xf32>
    %cst_76 = arith.constant 1.280000e+02 : f32
    %158 = vector.broadcast %cst_76 : f32 to vector<8x1xf32>
    %159 = arith.divf %157, %158 : vector<8x1xf32>
    %160 = arith.mulf %154, %154 : vector<8x1xf32>
    %161 = arith.subf %159, %160 : vector<8x1xf32>
    %cst_77 = arith.constant 0.000000e+00 : f32
    %162 = vector.broadcast %cst_77 : f32 to vector<8x1xf32>
    %163 = arith.maximumf %161, %162 : vector<8x1xf32>
    %cst_78 = arith.constant 9.99999974E-6 : f32
    %164 = vector.broadcast %cst_78 : f32 to vector<8x1xf32>
    %165 = arith.addf %163, %164 : vector<8x1xf32>
    %166 = math.rsqrt %165 : vector<8x1xf32>
    %167 = vector.broadcast %154 : vector<8x1xf32> to vector<8x128xf32>
    %168 = arith.subf %150, %167 : vector<8x128xf32>
    %169 = vector.broadcast %166 : vector<8x1xf32> to vector<8x128xf32>
    %170 = arith.mulf %168, %169 : vector<8x128xf32>
    %c1_79 = arith.constant 1 : index
    %c0_80 = arith.constant 0 : index
    %171 = vector.load %arg13[%c1_79, %c0_80] : memref<3x128xf32, #tpu.memory_space<vmem>>, vector<1x128xf32>
    %172 = vector.broadcast %171 : vector<1x128xf32> to vector<8x128xf32>
    %173 = arith.mulf %170, %172 : vector<8x128xf32>
    %c2_81 = arith.constant 2 : index
    %c0_82 = arith.constant 0 : index
    %174 = vector.load %arg13[%c2_81, %c0_82] : memref<3x128xf32, #tpu.memory_space<vmem>>, vector<1x128xf32>
    %175 = vector.broadcast %174 : vector<1x128xf32> to vector<8x128xf32>
    %176 = arith.addf %173, %175 : vector<8x128xf32>
    %cst_83 = arith.constant 0.000000e+00 : f32
    %177 = vector.broadcast %cst_83 : f32 to vector<8x128xf32>
    %178 = arith.maximumf %176, %177 : vector<8x128xf32>
    %179 = arith.truncf %178 : vector<8x128xf32> to vector<8x128xbf16>
    %c0_84 = arith.constant 0 : index
    %c0_85 = arith.constant 0 : index
    %180 = vector.load %arg14[%c0_84, %c0_85] : memref<128x256xbf16, #tpu.memory_space<vmem>>, vector<128x256xbf16>
    %cst_86 = arith.constant dense<0.000000e+00> : vector<8x256xf32>
    %181 = tpu.matmul %179, %180, %cst_86 {dimension_numbers = #tpu.dot_dimension_numbers<[1], [0], [0], [1], [0, 0, 1, 1], [], []>} : vector<8x128xbf16>, vector<128x256xbf16>, vector<8x256xf32> -> vector<8x256xf32>
    %c0_87 = arith.constant 0 : index
    %c0_88 = arith.constant 0 : index
    %182 = vector.load %arg15[%c0_87, %c0_88] : memref<3x256xf32, #tpu.memory_space<vmem>>, vector<1x256xf32>
    %183 = vector.broadcast %182 : vector<1x256xf32> to vector<8x256xf32>
    %184 = arith.addf %181, %183 : vector<8x256xf32>
    %cst_89 = arith.constant dense<0.000000e+00> : vector<8xf32>
    %185 = vector.multi_reduction <add>, %184, %cst_89 [1] : vector<8x256xf32> to vector<8xf32>
    %186 = vector.shape_cast %185 : vector<8xf32> to vector<8x1xf32>
    %cst_90 = arith.constant 2.560000e+02 : f32
    %187 = vector.broadcast %cst_90 : f32 to vector<8x1xf32>
    %188 = arith.divf %186, %187 : vector<8x1xf32>
    %189 = arith.mulf %184, %184 : vector<8x256xf32>
    %cst_91 = arith.constant dense<0.000000e+00> : vector<8xf32>
    %190 = vector.multi_reduction <add>, %189, %cst_91 [1] : vector<8x256xf32> to vector<8xf32>
    %191 = vector.shape_cast %190 : vector<8xf32> to vector<8x1xf32>
    %cst_92 = arith.constant 2.560000e+02 : f32
    %192 = vector.broadcast %cst_92 : f32 to vector<8x1xf32>
    %193 = arith.divf %191, %192 : vector<8x1xf32>
    %194 = arith.mulf %188, %188 : vector<8x1xf32>
    %195 = arith.subf %193, %194 : vector<8x1xf32>
    %cst_93 = arith.constant 0.000000e+00 : f32
    %196 = vector.broadcast %cst_93 : f32 to vector<8x1xf32>
    %197 = arith.maximumf %195, %196 : vector<8x1xf32>
    %cst_94 = arith.constant 9.99999974E-6 : f32
    %198 = vector.broadcast %cst_94 : f32 to vector<8x1xf32>
    %199 = arith.addf %197, %198 : vector<8x1xf32>
    %200 = math.rsqrt %199 : vector<8x1xf32>
    %201 = vector.broadcast %188 : vector<8x1xf32> to vector<8x256xf32>
    %202 = arith.subf %184, %201 : vector<8x256xf32>
    %203 = vector.broadcast %200 : vector<8x1xf32> to vector<8x256xf32>
    %204 = arith.mulf %202, %203 : vector<8x256xf32>
    %c1_95 = arith.constant 1 : index
    %c0_96 = arith.constant 0 : index
    %205 = vector.load %arg15[%c1_95, %c0_96] : memref<3x256xf32, #tpu.memory_space<vmem>>, vector<1x256xf32>
    %206 = vector.broadcast %205 : vector<1x256xf32> to vector<8x256xf32>
    %207 = arith.mulf %204, %206 : vector<8x256xf32>
    %c2_97 = arith.constant 2 : index
    %c0_98 = arith.constant 0 : index
    %208 = vector.load %arg15[%c2_97, %c0_98] : memref<3x256xf32, #tpu.memory_space<vmem>>, vector<1x256xf32>
    %209 = vector.broadcast %208 : vector<1x256xf32> to vector<8x256xf32>
    %210 = arith.addf %207, %209 : vector<8x256xf32>
    %cst_99 = arith.constant 0.000000e+00 : f32
    %211 = vector.broadcast %cst_99 : f32 to vector<8x256xf32>
    %212 = arith.maximumf %210, %211 : vector<8x256xf32>
    %213 = arith.truncf %212 : vector<8x256xf32> to vector<8x256xbf16>
    %c0_100 = arith.constant 0 : index
    %c0_101 = arith.constant 0 : index
    %214 = vector.load %arg16[%c0_100, %c0_101] : memref<256x512xbf16, #tpu.memory_space<vmem>>, vector<256x512xbf16>
    %cst_102 = arith.constant dense<0.000000e+00> : vector<8x512xf32>
    %215 = tpu.matmul %213, %214, %cst_102 {dimension_numbers = #tpu.dot_dimension_numbers<[1], [0], [0], [1], [0, 0, 1, 1], [], []>} : vector<8x256xbf16>, vector<256x512xbf16>, vector<8x512xf32> -> vector<8x512xf32>
    %c0_103 = arith.constant 0 : index
    %c0_104 = arith.constant 0 : index
    %216 = vector.load %arg17[%c0_103, %c0_104] : memref<3x512xf32, #tpu.memory_space<vmem>>, vector<1x512xf32>
    %217 = vector.broadcast %216 : vector<1x512xf32> to vector<8x512xf32>
    %218 = arith.addf %215, %217 : vector<8x512xf32>
    %cst_105 = arith.constant dense<0.000000e+00> : vector<8xf32>
    %219 = vector.multi_reduction <add>, %218, %cst_105 [1] : vector<8x512xf32> to vector<8xf32>
    %220 = vector.shape_cast %219 : vector<8xf32> to vector<8x1xf32>
    %cst_106 = arith.constant 5.120000e+02 : f32
    %221 = vector.broadcast %cst_106 : f32 to vector<8x1xf32>
    %222 = arith.divf %220, %221 : vector<8x1xf32>
    %223 = arith.mulf %218, %218 : vector<8x512xf32>
    %cst_107 = arith.constant dense<0.000000e+00> : vector<8xf32>
    %224 = vector.multi_reduction <add>, %223, %cst_107 [1] : vector<8x512xf32> to vector<8xf32>
    %225 = vector.shape_cast %224 : vector<8xf32> to vector<8x1xf32>
    %cst_108 = arith.constant 5.120000e+02 : f32
    %226 = vector.broadcast %cst_108 : f32 to vector<8x1xf32>
    %227 = arith.divf %225, %226 : vector<8x1xf32>
    %228 = arith.mulf %222, %222 : vector<8x1xf32>
    %229 = arith.subf %227, %228 : vector<8x1xf32>
    %cst_109 = arith.constant 0.000000e+00 : f32
    %230 = vector.broadcast %cst_109 : f32 to vector<8x1xf32>
    %231 = arith.maximumf %229, %230 : vector<8x1xf32>
    %cst_110 = arith.constant 9.99999974E-6 : f32
    %232 = vector.broadcast %cst_110 : f32 to vector<8x1xf32>
    %233 = arith.addf %231, %232 : vector<8x1xf32>
    %234 = math.rsqrt %233 : vector<8x1xf32>
    %235 = vector.broadcast %222 : vector<8x1xf32> to vector<8x512xf32>
    %236 = arith.subf %218, %235 : vector<8x512xf32>
    %237 = vector.broadcast %234 : vector<8x1xf32> to vector<8x512xf32>
    %238 = arith.mulf %236, %237 : vector<8x512xf32>
    %c1_111 = arith.constant 1 : index
    %c0_112 = arith.constant 0 : index
    %239 = vector.load %arg17[%c1_111, %c0_112] : memref<3x512xf32, #tpu.memory_space<vmem>>, vector<1x512xf32>
    %240 = vector.broadcast %239 : vector<1x512xf32> to vector<8x512xf32>
    %241 = arith.mulf %238, %240 : vector<8x512xf32>
    %c2_113 = arith.constant 2 : index
    %c0_114 = arith.constant 0 : index
    %242 = vector.load %arg17[%c2_113, %c0_114] : memref<3x512xf32, #tpu.memory_space<vmem>>, vector<1x512xf32>
    %243 = vector.broadcast %242 : vector<1x512xf32> to vector<8x512xf32>
    %244 = arith.addf %241, %243 : vector<8x512xf32>
    %cst_115 = arith.constant 0.000000e+00 : f32
    %245 = vector.broadcast %cst_115 : f32 to vector<8x512xf32>
    %246 = arith.maximumf %244, %245 : vector<8x512xf32>
    %247 = arith.truncf %246 : vector<8x512xf32> to vector<8x512xbf16>
    %c0_116 = arith.constant 0 : index
    %c0_117 = arith.constant 0 : index
    %248 = vector.load %arg18[%c0_116, %c0_117] : memref<512x1024xbf16, #tpu.memory_space<vmem>>, vector<512x1024xbf16>
    %cst_118 = arith.constant dense<0.000000e+00> : vector<8x1024xf32>
    %249 = tpu.matmul %247, %248, %cst_118 {dimension_numbers = #tpu.dot_dimension_numbers<[1], [0], [0], [1], [0, 0, 1, 1], [], []>} : vector<8x512xbf16>, vector<512x1024xbf16>, vector<8x1024xf32> -> vector<8x1024xf32>
    %c0_119 = arith.constant 0 : index
    %c0_120 = arith.constant 0 : index
    %250 = vector.load %arg19[%c0_119, %c0_120] : memref<3x1024xf32, #tpu.memory_space<vmem>>, vector<1x1024xf32>
    %251 = vector.broadcast %250 : vector<1x1024xf32> to vector<8x1024xf32>
    %252 = arith.addf %249, %251 : vector<8x1024xf32>
    %cst_121 = arith.constant dense<0.000000e+00> : vector<8xf32>
    %253 = vector.multi_reduction <add>, %252, %cst_121 [1] : vector<8x1024xf32> to vector<8xf32>
    %254 = vector.shape_cast %253 : vector<8xf32> to vector<8x1xf32>
    %cst_122 = arith.constant 1.024000e+03 : f32
    %255 = vector.broadcast %cst_122 : f32 to vector<8x1xf32>
    %256 = arith.divf %254, %255 : vector<8x1xf32>
    %257 = arith.mulf %252, %252 : vector<8x1024xf32>
    %cst_123 = arith.constant dense<0.000000e+00> : vector<8xf32>
    %258 = vector.multi_reduction <add>, %257, %cst_123 [1] : vector<8x1024xf32> to vector<8xf32>
    %259 = vector.shape_cast %258 : vector<8xf32> to vector<8x1xf32>
    %cst_124 = arith.constant 1.024000e+03 : f32
    %260 = vector.broadcast %cst_124 : f32 to vector<8x1xf32>
    %261 = arith.divf %259, %260 : vector<8x1xf32>
    %262 = arith.mulf %256, %256 : vector<8x1xf32>
    %263 = arith.subf %261, %262 : vector<8x1xf32>
    %cst_125 = arith.constant 0.000000e+00 : f32
    %264 = vector.broadcast %cst_125 : f32 to vector<8x1xf32>
    %265 = arith.maximumf %263, %264 : vector<8x1xf32>
    %cst_126 = arith.constant 9.99999974E-6 : f32
    %266 = vector.broadcast %cst_126 : f32 to vector<8x1xf32>
    %267 = arith.addf %265, %266 : vector<8x1xf32>
    %268 = math.rsqrt %267 : vector<8x1xf32>
    %269 = vector.broadcast %256 : vector<8x1xf32> to vector<8x1024xf32>
    %270 = arith.subf %252, %269 : vector<8x1024xf32>
    %271 = vector.broadcast %268 : vector<8x1xf32> to vector<8x1024xf32>
    %272 = arith.mulf %270, %271 : vector<8x1024xf32>
    %c1_127 = arith.constant 1 : index
    %c0_128 = arith.constant 0 : index
    %273 = vector.load %arg19[%c1_127, %c0_128] : memref<3x1024xf32, #tpu.memory_space<vmem>>, vector<1x1024xf32>
    %274 = vector.broadcast %273 : vector<1x1024xf32> to vector<8x1024xf32>
    %275 = arith.mulf %272, %274 : vector<8x1024xf32>
    %c2_129 = arith.constant 2 : index
    %c0_130 = arith.constant 0 : index
    %276 = vector.load %arg19[%c2_129, %c0_130] : memref<3x1024xf32, #tpu.memory_space<vmem>>, vector<1x1024xf32>
    %277 = vector.broadcast %276 : vector<1x1024xf32> to vector<8x1024xf32>
    %278 = arith.addf %275, %277 : vector<8x1024xf32>
    %cst_131 = arith.constant 0.000000e+00 : f32
    %279 = vector.broadcast %cst_131 : f32 to vector<8x1024xf32>
    %280 = arith.maximumf %278, %279 : vector<8x1024xf32>
    %c0_132 = arith.constant 0 : index
    %c0_133 = arith.constant 0 : index
    %281 = vector.load %arg20[%c0_132, %c0_133] : memref<8x1024xf32, #tpu.memory_space<vmem>>, vector<8x1024xf32>
    tpu.vector_store %arg20[%c0_132, %c0_133], %280 {strides = array<i32>} : memref<8x1024xf32, #tpu.memory_space<vmem>>, vector<8x1024xf32>,
    return
  }
  func.func @transform_0(%arg0: i32) -> (i32, i32) {
    %c0_i32 = arith.constant 0 : i32
    %c0_i32_0 = arith.constant 0 : i32
    return %arg0, %c0_i32 : i32, i32
  }
  func.func @transform_1(%arg0: i32) -> (i32, i32) {
    %c0_i32 = arith.constant 0 : i32
    %c0_i32_0 = arith.constant 0 : i32
    %c0_i32_1 = arith.constant 0 : i32
    return %c0_i32, %c0_i32_0 : i32, i32
  }
  func.func @transform_2(%arg0: i32) -> (i32, i32) {
    %c0_i32 = arith.constant 0 : i32
    %c0_i32_0 = arith.constant 0 : i32
    %c0_i32_1 = arith.constant 0 : i32
    return %c0_i32, %c0_i32_0 : i32, i32
  }
  func.func @transform_3(%arg0: i32) -> (i32, i32) {
    %c0_i32 = arith.constant 0 : i32
    %c0_i32_0 = arith.constant 0 : i32
    %c0_i32_1 = arith.constant 0 : i32
    return %c0_i32, %c0_i32_0 : i32, i32
  }
  func.func @transform_4(%arg0: i32) -> (i32, i32) {
    %c0_i32 = arith.constant 0 : i32
    %c0_i32_0 = arith.constant 0 : i32
    %c0_i32_1 = arith.constant 0 : i32
    return %c0_i32, %c0_i32_0 : i32, i32
  }
  func.func @transform_5(%arg0: i32) -> (i32, i32) {
    %c0_i32 = arith.constant 0 : i32
    %c0_i32_0 = arith.constant 0 : i32
    %c0_i32_1 = arith.constant 0 : i32
    return %c0_i32, %c0_i32_0 : i32, i32
  }
  func.func @transform_6(%arg0: i32) -> (i32, i32) {
    %c0_i32 = arith.constant 0 : i32
    %c0_i32_0 = arith.constant 0 : i32
    %c0_i32_1 = arith.constant 0 : i32
    return %c0_i32, %c0_i32_0 : i32, i32
  }
  func.func @transform_7(%arg0: i32) -> (i32, i32) {
    %c0_i32 = arith.constant 0 : i32
    %c0_i32_0 = arith.constant 0 : i32
    %c0_i32_1 = arith.constant 0 : i32
    return %c0_i32, %c0_i32_0 : i32, i32
  }
  func.func @transform_8(%arg0: i32) -> (i32, i32) {
    %c0_i32 = arith.constant 0 : i32
    %c0_i32_0 = arith.constant 0 : i32
    %c0_i32_1 = arith.constant 0 : i32
    return %c0_i32, %c0_i32_0 : i32, i32
  }
  func.func @transform_9(%arg0: i32) -> (i32, i32) {
    %c0_i32 = arith.constant 0 : i32
    %c0_i32_0 = arith.constant 0 : i32
    %c0_i32_1 = arith.constant 0 : i32
    return %c0_i32, %c0_i32_0 : i32, i32
  }
  func.func @transform_10(%arg0: i32) -> (i32, i32) {
    %c0_i32 = arith.constant 0 : i32
    %c0_i32_0 = arith.constant 0 : i32
    %c0_i32_1 = arith.constant 0 : i32
    return %c0_i32, %c0_i32_0 : i32, i32
  }
  func.func @transform_11(%arg0: i32) -> (i32, i32) {
    %c0_i32 = arith.constant 0 : i32
    %c0_i32_0 = arith.constant 0 : i32
    %c0_i32_1 = arith.constant 0 : i32
    return %c0_i32, %c0_i32_0 : i32, i32
  }
  func.func @transform_12(%arg0: i32) -> (i32, i32) {
    %c0_i32 = arith.constant 0 : i32
    %c0_i32_0 = arith.constant 0 : i32
    %c0_i32_1 = arith.constant 0 : i32
    return %c0_i32, %c0_i32_0 : i32, i32
  }
  func.func @transform_13(%arg0: i32) -> (i32, i32) {
    %c0_i32 = arith.constant 0 : i32
    %c0_i32_0 = arith.constant 0 : i32
    %c0_i32_1 = arith.constant 0 : i32
    return %c0_i32, %c0_i32_0 : i32, i32
  }
  func.func @transform_14(%arg0: i32) -> (i32, i32) {
    %c0_i32 = arith.constant 0 : i32
    %c0_i32_0 = arith.constant 0 : i32
    %c0_i32_1 = arith.constant 0 : i32
    return %c0_i32, %c0_i32_0 : i32, i32
  }
  func.func @transform_15(%arg0: i32) -> (i32, i32) {
    %c0_i32 = arith.constant 0 : i32
    %c0_i32_0 = arith.constant 0 : i32
    %c0_i32_1 = arith.constant 0 : i32
    return %c0_i32, %c0_i32_0 : i32, i32
  }
  func.func @transform_16(%arg0: i32) -> (i32, i32) {
    %c0_i32 = arith.constant 0 : i32
    %c0_i32_0 = arith.constant 0 : i32
    %c0_i32_1 = arith.constant 0 : i32
    return %c0_i32, %c0_i32_0 : i32, i32
  }
  func.func @transform_17(%arg0: i32) -> (i32, i32) {
    %c0_i32 = arith.constant 0 : i32
    %c0_i32_0 = arith.constant 0 : i32
    %c0_i32_1 = arith.constant 0 : i32
    return %c0_i32, %c0_i32_0 : i32, i32
  }
  func.func @transform_18(%arg0: i32) -> (i32, i32) {
    %c0_i32 = arith.constant 0 : i32
    %c0_i32_0 = arith.constant 0 : i32
    %c0_i32_1 = arith.constant 0 : i32
    return %c0_i32, %c0_i32_0 : i32, i32
  }
  func.func @transform_19(%arg0: i32) -> (i32, i32) {
    %c0_i32 = arith.constant 0 : i32
    %c0_i32_0 = arith.constant 0 : i32
    return %arg0, %c0_i32 : i32, i32
  }
}

</mosaic_0001>

<bundles_post_ra>
// kernel: autoencoder_forward.1
= control target key start
LH: loop header
LB: loop body
LE: loop exit
PB: predicated region body
PF: predicated region fallthrough
CT: control target
= control target key end

     0   :  { %s9936_s0 = inlined_call_operand.vmem [shape: f32[8,256], index: 0, kind: input, shape index: {}]   ;;  %s9937_s1 = inlined_call_operand.hbm [shape: bf16[256,1024], index: 1, kind: input, shape index: {}]   ;;  %s9938_s2 = inlined_call_operand.vmem [shape: f32[3,1024], index: 2, kind: input, shape index: {}]   ;;  %s9939_s3 = inlined_call_operand.hbm [shape: bf16[1024,512], index: 3, kind: input, shape index: {}]   ;;  %s9940_s4 = inlined_call_operand.hbm [shape: f32[3,512], index: 4, kind: input, shape index: {}]   ;;  %s9941_s5 = inlined_call_operand.hbm [shape: bf16[512,256], index: 5, kind: input, shape index: {}]   ;;  %s9942_s6 = inlined_call_operand.hbm [shape: f32[3,256], index: 6, kind: input, shape index: {}]   ;;  %s9943_s7 = inlined_call_operand.vmem [shape: bf16[256,128], index: 7, kind: input, shape index: {}]   ;;  %s9944_s8 = inlined_call_operand.hbm [shape: f32[3,128], index: 8, kind: input, shape index: {}]   ;;  %s9945_s9 = inlined_call_operand.hbm [shape: bf16[128,128], index: 9, kind: input, shape index: {}]   ;;  %s9946_s10 = inlined_call_operand.vmem [shape: f32[1,128], index: 10, kind: input, shape index: {}]   ;;  %s9947_s11 = inlined_call_operand.hbm [shape: bf16[128,128], index: 11, kind: input, shape index: {}]   ;;  %s9948_s12 = inlined_call_operand.hbm [shape: f32[3,128], index: 12, kind: input, shape index: {}]   ;;  %s9949_s13 = inlined_call_operand.hbm [shape: bf16[128,256], index: 13, kind: input, shape index: {}]   ;;  %s9950_s14 = inlined_call_operand.hbm [shape: f32[3,256], index: 14, kind: input, shape index: {}]   ;;  %s9951_s15 = inlined_call_operand.hbm [shape: bf16[256,512], index: 15, kind: input, shape index: {}]   ;;  %s9952_s16 = inlined_call_operand.hbm [shape: f32[3,512], index: 16, kind: input, shape index: {}]   ;;  %s9953_s17 = inlined_call_operand.hbm [shape: bf16[512,1024], index: 17, kind: input, shape index: {}]   ;;  %s9954_s18 = inlined_call_operand.vmem [shape: f32[3,1024], index: 18, kind: input, shape index: {}]   ;;  %s9955_s19 = inlined_call_operand.vmem [shape: f32[8,1024], index: 19, kind: output, shape index: {}]  }
   0x1   :  { %9962 = sst [smem:[#allocation32_spill]] %s9936_s0 }
   0x2   :  { %9963 = sst [smem:[#allocation33_spill]] %s9937_s1 }
   0x3   :  { %9964 = sst [smem:[#allocation34_spill]] %s9938_s2 }
   0x4   :  { %9965 = sst [smem:[#allocation35_spill]] %s9939_s3 }
   0x5   :  { %9966 = sst [smem:[#allocation36_spill]] %s9955_s19 }
   0x6   :  { %24 = vsyncpa [#allocation3], 0 }
   0x7   :  { %25 = vsyncpa [#allocation5], 0 }
   0x8   :  { %26 = vsyncpa [#allocation8], 0 }
   0x9   :  { %27 = vsyncpa [#allocation11], 0 }
   0xa   :  { %28 = vsyncpa [#allocation14], 0 }
   0xb   :  { %29 = vsyncpa [#allocation17], 0 }
   0xc   :  { %30 = vsyncpa [#allocation20], 0 }
   0xd   :  { %31 = vsyncpa [#allocation23], 0  ;;  %s9177_s0 = smov [#allocation4]   ;;  %s9967_s1 = sld [smem:[#allocation35_spill]] }
   0xe   :  { %s53_s30 = sshll.u32 %s9177_s0, 4  ;;  %s54_s30 = int_to_ptr.vmem [resolvable:$true] %s53_s30 }
  0x13   :  { %s8853_s22 = scalar_lea.hbm %s9967_s1, 32768 }
  0x14   :  { %p8854_p0 = scmp.ne.s32.totalorder %s9967_s1, %s8853_s22  ;;  %p8857_p1 = scmp.lt.u32.totalorder %s8853_s22, %s9967_s1 }
  0x16   :  { %p8859_p2 = pnand %p8857_p1, %p8854_p0 }
  0x18   :  { %8862 = shalt.err (!%p8859_p2)
}
  0x19   :  { %s8863_s3 = scalar_lea.vmem %s54_s30, 32768  ;;  %p8868_p4 = scmp.lt.s32.totalorder %s54_s30, %s54_s30 }
  0x1a   :  { %p8864_p3 = scmp.ne.s32.totalorder %s54_s30, %s8863_s3  ;;  %p8869_p5 = scmp.lt.s32.totalorder %s8863_s3, %s8863_s3 }
  0x1c   :  { %p8870_p6 = por %p8869_p5, %p8868_p4 }
  0x1e   :  { %p8871_p7 = pnand %p8870_p6, %p8864_p3 }
  0x20   :  { %8874 = shalt.err (!%p8871_p7)
}
  0x21   :  { %s9961_s26 = smov 256   ;;  %s9179_s27 = smov 16  }
  0x22   :  { %59 = dma.hbm_to_vmem [thread:$0]  %s9967_s1, 32768, %s54_s30, [#allocation5], %s9961_s26, %s9961_s26, %s9179_s27  }
  0x23   :  { %s9180_s0 = smov [#allocation7]   ;;  %s8875_s2 = scalar_lea.hbm %s9941_s5, 8192 }
  0x24   :  { %s75_s20 = sshll.u32 %s9180_s0, 4  ;;  %p8876_p8 = scmp.ne.s32.totalorder %s9941_s5, %s8875_s2  ;;  %s76_s20 = int_to_ptr.vmem [resolvable:$true] %s75_s20 }
  0x25   :  { %p8879_p9 = scmp.lt.u32.totalorder %s8875_s2, %s9941_s5 }
  0x27   :  { %p8881_p10 = pnand %p8879_p9, %p8876_p8 }
  0x29   :  { %8884 = shalt.err (!%p8881_p10)
}
  0x2a   :  { %s8885_s19 = scalar_lea.vmem %s76_s20, 8192  ;;  %p8890_p12 = scmp.lt.s32.totalorder %s76_s20, %s76_s20 }
  0x2b   :  { %p8886_p11 = scmp.ne.s32.totalorder %s76_s20, %s8885_s19  ;;  %p8891_p13 = scmp.lt.s32.totalorder %s8885_s19, %s8885_s19 }
  0x2d   :  { %p8892_p0 = por %p8891_p13, %p8890_p12 }
  0x2f   :  { %p8893_p1 = pnand %p8892_p0, %p8886_p11 }
  0x31   :  { %8896 = shalt.err (!%p8893_p1)
}
  0x32   :  { %s9181_s30 = smov 128   ;;  %s9182_s1 = smov 8  }
  0x33   :  { %81 = dma.hbm_to_vmem [thread:$0]  %s9941_s5, 8192, %s76_s20, [#allocation8], %s9181_s30, %s9181_s30, %s9182_s1  }
  0x34   :  { %s9183_s0 = smov [#allocation10]   ;;  %s8897_s23 = scalar_lea.hbm %s9944_s8, 64 }
  0x35   :  { %s100_s21 = sshll.u32 %s9183_s0, 4  ;;  %p8898_p2 = scmp.ne.s32.totalorder %s9944_s8, %s8897_s23  ;;  %s101_s21 = int_to_ptr.vmem [resolvable:$true] %s100_s21 }
  0x36   :  { %p8901_p3 = scmp.lt.u32.totalorder %s8897_s23, %s9944_s8 }
  0x38   :  { %p8903_p4 = pnand %p8901_p3, %p8898_p2 }
  0x3a   :  { %8906 = shalt.err (!%p8903_p4)
}
  0x3b   :  { %s8907_s26 = scalar_lea.vmem %s101_s21, 64  ;;  %p8912_p6 = scmp.lt.s32.totalorder %s101_s21, %s101_s21 }
  0x3c   :  { %p8908_p5 = scmp.ne.s32.totalorder %s101_s21, %s8907_s26  ;;  %p8913_p7 = scmp.lt.s32.totalorder %s8907_s26, %s8907_s26 }
  0x3e   :  { %p8914_p8 = por %p8913_p7, %p8912_p6 }
  0x40   :  { %p8915_p9 = pnand %p8914_p8, %p8908_p5 }
  0x42   :  { %8918 = shalt.err (!%p8915_p9)
}
  0x43   :  { %103 = dma.hbm_to_vmem [thread:$0]  %s9944_s8, 64, %s101_s21, [#allocation11]  }
  0x44   :  { %s9184_s28 = smov [#allocation13]   ;;  %s9185_s0 = smov [#allocation16]  }
  0x45   :  { %s123_s29 = sshll.u32 %s9184_s28, 4  ;;  %s145_s22 = sshll.u32 %s9185_s0, 4  ;;  %s124_s29 = int_to_ptr.vmem [resolvable:$true] %s123_s29  ;;  %s146_s22 = int_to_ptr.vmem [resolvable:$true] %s145_s22 }
  0x46   :  { %s8919_s19 = scalar_lea.hbm %s9947_s11, 1024 }
  0x47   :  { %p8920_p10 = scmp.ne.s32.totalorder %s9947_s11, %s8919_s19  ;;  %p8923_p11 = scmp.lt.u32.totalorder %s8919_s19, %s9947_s11 }
  0x49   :  { %p8925_p12 = pnand %p8923_p11, %p8920_p10 }
  0x4b   :  { %8928 = shalt.err (!%p8925_p12)
}
  0x4c   :  { %s8929_s8 = scalar_lea.vmem %s124_s29, 1024  ;;  %p8934_p0 = scmp.lt.s32.totalorder %s124_s29, %s124_s29 }
  0x4d   :  { %p8930_p13 = scmp.ne.s32.totalorder %s124_s29, %s8929_s8  ;;  %p8935_p1 = scmp.lt.s32.totalorder %s8929_s8, %s8929_s8 }
  0x4f   :  { %p8936_p2 = por %p8935_p1, %p8934_p0 }
  0x51   :  { %p8937_p3 = pnand %p8936_p2, %p8930_p13 }
  0x53   :  { %8940 = shalt.err (!%p8937_p3)
}
  0x54   :  { %s9186_s21 = smov 64   ;;  %s9187_s5 = smov 4  }
  0x55   :  { %129 = dma.hbm_to_vmem [thread:$0]  %s9947_s11, 1024, %s124_s29, [#allocation14], %s9186_s21, %s9186_s21, %s9187_s5  }
  0x56   :  { %s8941_s23 = scalar_lea.hbm %s9949_s13, 2048 }
  0x57   :  { %p8942_p4 = scmp.ne.s32.totalorder %s9949_s13, %s8941_s23  ;;  %p8945_p5 = scmp.lt.u32.totalorder %s8941_s23, %s9949_s13 }
  0x59   :  { %p8947_p6 = pnand %p8945_p5, %p8942_p4 }
  0x5b   :  { %8950 = shalt.err (!%p8947_p6)
}
  0x5c   :  { %s8951_s3 = scalar_lea.vmem %s146_s22, 2048  ;;  %p8956_p8 = scmp.lt.s32.totalorder %s146_s22, %s146_s22 }
  0x5d   :  { %p8952_p7 = scmp.ne.s32.totalorder %s146_s22, %s8951_s3  ;;  %p8957_p9 = scmp.lt.s32.totalorder %s8951_s3, %s8951_s3 }
  0x5f   :  { %p8958_p10 = por %p8957_p9, %p8956_p8 }
  0x61   :  { %p8959_p11 = pnand %p8958_p10, %p8952_p7 }
  0x63   :  { %8962 = shalt.err (!%p8959_p11)
}
  0x64   :  { %151 = dma.hbm_to_vmem [thread:$0]  %s9949_s13, 2048, %s146_s22, [#allocation17], %s9181_s30, %s9181_s30, %s9182_s1  }
  0x65   :  { %s9188_s8 = smov [#allocation19]   ;;  %s9189_s28 = smov [#allocation2]  }
  0x66   :  { %s167_s20 = sshll.u32 %s9188_s8, 4  ;;  %s39_s0 = sshll.u32 %s9189_s28, 4  ;;  %s168_s20 = int_to_ptr.vmem [resolvable:$true] %s167_s20  ;;  %s40_s0 = int_to_ptr.vmem [resolvable:$true] %s39_s0 }
  0x67   :  { %s8963_s19 = scalar_lea.hbm %s9951_s15, 8192 }
  0x68   :  { %p8964_p12 = scmp.ne.s32.totalorder %s9951_s15, %s8963_s19  ;;  %p8967_p13 = scmp.lt.u32.totalorder %s8963_s19, %s9951_s15 }
  0x6a   :  { %p8969_p0 = pnand %p8967_p13, %p8964_p12 }
  0x6c   :  { %8972 = shalt.err (!%p8969_p0)
}
  0x6d   :  { %s8973_s13 = scalar_lea.vmem %s168_s20, 8192  ;;  %p8978_p2 = scmp.lt.s32.totalorder %s168_s20, %s168_s20 }
  0x6e   :  { %p8974_p1 = scmp.ne.s32.totalorder %s168_s20, %s8973_s13  ;;  %p8979_p3 = scmp.lt.s32.totalorder %s8973_s13, %s8973_s13 }
  0x70   :  { %p8980_p4 = por %p8979_p3, %p8978_p2 }
  0x72   :  { %p8981_p5 = pnand %p8980_p4, %p8974_p1 }
  0x74   :  { %8984 = shalt.err (!%p8981_p5)
}
  0x75   :  { %s9968_s30 = smov 256   ;;  %s9969_s8 = sld [smem:[#allocation33_spill]] }
  0x76   :  { %173 = dma.hbm_to_vmem [thread:$0]  %s9951_s15, 8192, %s168_s20, [#allocation20], %s9968_s30, %s9968_s30, %s9179_s27  }
  0x7b   :  { %s8985_s28 = scalar_lea.hbm %s9969_s8, 16384 }
  0x7c   :  { %p8986_p6 = scmp.ne.s32.totalorder %s9969_s8, %s8985_s28  ;;  %p8989_p7 = scmp.lt.u32.totalorder %s8985_s28, %s9969_s8 }
  0x7e   :  { %p8991_p8 = pnand %p8989_p7, %p8986_p6 }
  0x80   :  { %8994 = shalt.err (!%p8991_p8)
}
  0x81   :  { %s8995_s25 = scalar_lea.vmem %s40_s0, 16384  ;;  %p9000_p10 = scmp.lt.s32.totalorder %s40_s0, %s40_s0 }
  0x82   :  { %p8996_p9 = scmp.ne.s32.totalorder %s40_s0, %s8995_s25  ;;  %p9001_p11 = scmp.lt.s32.totalorder %s8995_s25, %s8995_s25 }
  0x84   :  { %p9002_p12 = por %p9001_p11, %p9000_p10 }
  0x86   :  { %p9003_p13 = pnand %p9002_p12, %p8996_p9 }
  0x88   :  { %9006 = shalt.err (!%p9003_p13)
}
  0x89   :  { %s9190_s15 = smov 512   ;;  %s9191_s27 = smov 32  }
  0x8a   :  { %45 = dma.hbm_to_vmem [thread:$0]  %s9969_s8, 16384, %s40_s0, [#allocation3], %s9190_s15, %s9190_s15, %s9191_s27  }
  0x8b   :  { %s9192_s3 = smov [#allocation6]   ;;  %s9193_s30 = smov [#allocation9]  }
  0x8c   :  { %s66_s13 = sshll.u32 %s9192_s3, 4  ;;  %s88_s1 = sshll.u32 %s9193_s30, 4  ;;  %s67_s13 = int_to_ptr.vmem [resolvable:$true] %s66_s13  ;;  %s89_s1 = int_to_ptr.vmem [resolvable:$true] %s88_s1 }
  0x8d   :  { %s9007_s29 = scalar_lea.hbm %s9940_s4, 256 }
  0x8e   :  { %p9008_p0 = scmp.ne.s32.totalorder %s9940_s4, %s9007_s29  ;;  %p9011_p1 = scmp.lt.u32.totalorder %s9007_s29, %s9940_s4 }
  0x90   :  { %p9013_p2 = pnand %p9011_p1, %p9008_p0 }
  0x92   :  { %9016 = shalt.err (!%p9013_p2)
}
  0x93   :  { %s9017_s0 = scalar_lea.vmem %s67_s13, 256  ;;  %p9022_p4 = scmp.lt.s32.totalorder %s67_s13, %s67_s13 }
  0x94   :  { %p9018_p3 = scmp.ne.s32.totalorder %s67_s13, %s9017_s0  ;;  %p9023_p5 = scmp.lt.s32.totalorder %s9017_s0, %s9017_s0 }
  0x96   :  { %p9024_p6 = por %p9023_p5, %p9022_p4 }
  0x98   :  { %p9025_p7 = pnand %p9024_p6, %p9018_p3 }
  0x9a   :  { %9028 = shalt.err (!%p9025_p7)
}
  0x9b   :  { %69 = dma.hbm_to_vmem [thread:$0]  %s9940_s4, 256, %s67_s13, [#allocation5]  }
  0x9c   :  { %s9029_s26 = scalar_lea.hbm %s9942_s6, 128 }
  0x9d   :  { %p9030_p8 = scmp.ne.s32.totalorder %s9942_s6, %s9029_s26  ;;  %p9033_p9 = scmp.lt.u32.totalorder %s9029_s26, %s9942_s6 }
  0x9f   :  { %p9035_p10 = pnand %p9033_p9, %p9030_p8 }
  0xa1   :  { %9038 = shalt.err (!%p9035_p10)
}
  0xa2   :  { %s9039_s29 = scalar_lea.vmem %s89_s1, 128  ;;  %p9044_p12 = scmp.lt.s32.totalorder %s89_s1, %s89_s1 }
  0xa3   :  { %p9040_p11 = scmp.ne.s32.totalorder %s89_s1, %s9039_s29  ;;  %p9045_p13 = scmp.lt.s32.totalorder %s9039_s29, %s9039_s29 }
  0xa5   :  { %p9046_p0 = por %p9045_p13, %p9044_p12 }
  0xa7   :  { %p9047_p1 = pnand %p9046_p0, %p9040_p11 }
  0xa9   :  { %9050 = shalt.err (!%p9047_p1)
}
  0xaa   :  { %91 = dma.hbm_to_vmem [thread:$0]  %s9942_s6, 128, %s89_s1, [#allocation8]  }
  0xab   :  { %s9194_s28 = smov [#allocation12]   ;;  %s9195_s23 = smov [#allocation15]  }
  0xac   :  { %s109_s2 = sshll.u32 %s9194_s28, 4  ;;  %s136_s19 = sshll.u32 %s9195_s23, 4  ;;  %s110_s2 = int_to_ptr.vmem [resolvable:$true] %s109_s2  ;;  %s137_s19 = int_to_ptr.vmem [resolvable:$true] %s136_s19 }
  0xad   :  { %s9051_s24 = scalar_lea.hbm %s9945_s9, 1024 }
  0xae   :  { %p9052_p2 = scmp.ne.s32.totalorder %s9945_s9, %s9051_s24  ;;  %p9055_p3 = scmp.lt.u32.totalorder %s9051_s24, %s9945_s9 }
  0xb0   :  { %p9057_p4 = pnand %p9055_p3, %p9052_p2 }
  0xb2   :  { %9060 = shalt.err (!%p9057_p4)
}
  0xb3   :  { %s9061_s6 = scalar_lea.vmem %s110_s2, 1024  ;;  %p9066_p6 = scmp.lt.s32.totalorder %s110_s2, %s110_s2 }
  0xb4   :  { %p9062_p5 = scmp.ne.s32.totalorder %s110_s2, %s9061_s6  ;;  %p9067_p7 = scmp.lt.s32.totalorder %s9061_s6, %s9061_s6 }
  0xb6   :  { %p9068_p8 = por %p9067_p7, %p9066_p6 }
  0xb8   :  { %p9069_p9 = pnand %p9068_p8, %p9062_p5 }
  0xba   :  { %9072 = shalt.err (!%p9069_p9)
}
  0xbb   :  { %115 = dma.hbm_to_vmem [thread:$0]  %s9945_s9, 1024, %s110_s2, [#allocation11], %s9186_s21, %s9186_s21, %s9187_s5  }
  0xbc   :  { %s9073_s29 = scalar_lea.hbm %s9948_s12, 64 }
  0xbd   :  { %p9074_p10 = scmp.ne.s32.totalorder %s9948_s12, %s9073_s29  ;;  %p9077_p11 = scmp.lt.u32.totalorder %s9073_s29, %s9948_s12 }
  0xbf   :  { %p9079_p12 = pnand %p9077_p11, %p9074_p10 }
  0xc1   :  { %9082 = shalt.err (!%p9079_p12)
}
  0xc2   :  { %s9083_s0 = scalar_lea.vmem %s137_s19, 64  ;;  %p9088_p0 = scmp.lt.s32.totalorder %s137_s19, %s137_s19 }
  0xc3   :  { %p9084_p13 = scmp.ne.s32.totalorder %s137_s19, %s9083_s0  ;;  %p9089_p1 = scmp.lt.s32.totalorder %s9083_s0, %s9083_s0 }
  0xc5   :  { %p9090_p2 = por %p9089_p1, %p9088_p0 }
  0xc7   :  { %p9091_p3 = pnand %p9090_p2, %p9084_p13 }
  0xc9   :  { %9094 = shalt.err (!%p9091_p3)
}
  0xca   :  { %139 = dma.hbm_to_vmem [thread:$0]  %s9948_s12, 64, %s137_s19, [#allocation14]  }
  0xcb   :  { %s9196_s5 = smov [#allocation18]   ;;  %s9197_s8 = smov [#allocation21]  }
  0xcc   :  { %s158_s2 = sshll.u32 %s9196_s5, 4  ;;  %s180_s24 = sshll.u32 %s9197_s8, 4  ;;  %s159_s2 = int_to_ptr.vmem [resolvable:$true] %s158_s2  ;;  %s181_s24 = int_to_ptr.vmem [resolvable:$true] %s180_s24 }
  0xcd   :  { %s9095_s26 = scalar_lea.hbm %s9950_s14, 128 }
  0xce   :  { %p9096_p4 = scmp.ne.s32.totalorder %s9950_s14, %s9095_s26  ;;  %p9099_p5 = scmp.lt.u32.totalorder %s9095_s26, %s9950_s14 }
  0xd0   :  { %p9101_p6 = pnand %p9099_p5, %p9096_p4 }
  0xd2   :  { %9104 = shalt.err (!%p9101_p6)
}
  0xd3   :  { %s9105_s12 = scalar_lea.vmem %s159_s2, 128  ;;  %p9110_p8 = scmp.lt.s32.totalorder %s159_s2, %s159_s2 }
  0xd4   :  { %p9106_p7 = scmp.ne.s32.totalorder %s159_s2, %s9105_s12  ;;  %p9111_p9 = scmp.lt.s32.totalorder %s9105_s12, %s9105_s12 }
  0xd6   :  { %p9112_p10 = por %p9111_p9, %p9110_p8 }
  0xd8   :  { %p9113_p11 = pnand %p9112_p10, %p9106_p7 }
  0xda   :  { %9116 = shalt.err (!%p9113_p11)
}
  0xdb   :  { %161 = dma.hbm_to_vmem [thread:$0]  %s9950_s14, 128, %s159_s2, [#allocation17]  }
  0xdc   :  { %s9117_s4 = scalar_lea.hbm %s9952_s16, 256 }
  0xdd   :  { %p9118_p12 = scmp.ne.s32.totalorder %s9952_s16, %s9117_s4  ;;  %p9121_p13 = scmp.lt.u32.totalorder %s9117_s4, %s9952_s16 }
  0xdf   :  { %p9123_p0 = pnand %p9121_p13, %p9118_p12 }
  0xe1   :  { %9126 = shalt.err (!%p9123_p0)
}
  0xe2   :  { %s9127_s9 = scalar_lea.vmem %s181_s24, 256  ;;  %p9132_p2 = scmp.lt.s32.totalorder %s181_s24, %s181_s24 }
  0xe3   :  { %p9128_p1 = scmp.ne.s32.totalorder %s181_s24, %s9127_s9  ;;  %p9133_p3 = scmp.lt.s32.totalorder %s9127_s9, %s9127_s9 }
  0xe5   :  { %p9134_p4 = por %p9133_p3, %p9132_p2 }
  0xe7   :  { %p9135_p5 = pnand %p9134_p4, %p9128_p1 }
  0xe9   :  { %9138 = shalt.err (!%p9135_p5)
}
  0xea   :  { %183 = dma.hbm_to_vmem [thread:$0]  %s9952_s16, 256, %s181_s24, [#allocation20]  }
  0xeb   :  { %s9198_s5 = smov [#allocation22]   ;;  %s9139_s20 = scalar_lea.hbm %s9953_s17, 32768 }
  0xec   :  { %s189_s2 = sshll.u32 %s9198_s5, 4  ;;  %p9140_p6 = scmp.ne.s32.totalorder %s9953_s17, %s9139_s20  ;;  %s190_s2 = int_to_ptr.vmem [resolvable:$true] %s189_s2 }
  0xed   :  { %p9143_p7 = scmp.lt.u32.totalorder %s9139_s20, %s9953_s17 }
  0xef   :  { %p9145_p8 = pnand %p9143_p7, %p9140_p6 }
  0xf1   :  { %9148 = shalt.err (!%p9145_p8)
}
  0xf2   :  { %s9149_s30 = scalar_lea.vmem %s190_s2, 32768  ;;  %p9154_p10 = scmp.lt.s32.totalorder %s190_s2, %s190_s2 }
  0xf3   :  { %p9150_p9 = scmp.ne.s32.totalorder %s190_s2, %s9149_s30  ;;  %p9155_p11 = scmp.lt.s32.totalorder %s9149_s30, %s9149_s30 }
  0xf5   :  { %p9156_p12 = por %p9155_p11, %p9154_p10 }
  0xf7   :  { %p9157_p13 = pnand %p9156_p12, %p9150_p9 }
  0xf9   :  { %9160 = shalt.err (!%p9157_p13)
}
  0xfa   :  { %195 = dma.hbm_to_vmem [thread:$0]  %s9953_s17, 32768, %s190_s2, [#allocation23], %s9190_s15, %s9190_s15, %s9191_s27  }
  0xfb   :  { %9161 = dma.done.wait [#allocation3], 16384  }
  0xfc   :  { %9162 = vsyncadd [#allocation3], 4294950912 }
  0xfd   :  { %9163 = dma.done.wait [#allocation5], 33024  }
  0xfe   :  { %9164 = vsyncadd [#allocation5], 4294934272 }
  0xff   :  { %9165 = dma.done.wait [#allocation8], 8320  }
 0x100   :  { %9166 = vsyncadd [#allocation8], 4294958976 }
 0x101   :  { %9167 = dma.done.wait [#allocation11], 1088  }
 0x102   :  { %9168 = vsyncadd [#allocation11], 4294966208 }
 0x103   :  { %9169 = dma.done.wait [#allocation14], 1088  }
 0x104   :  { %9170 = vsyncadd [#allocation14], 4294966208 }
 0x105   :  { %9171 = dma.done.wait [#allocation17], 2176  }
 0x106   :  { %9172 = vsyncadd [#allocation17], 4294965120 }
 0x107   :  { %9173 = dma.done.wait [#allocation20], 8448  }
 0x108   :  { %9174 = vsyncadd [#allocation20], 4294958848 }
 0x109   :  { %9175 = dma.done.wait [#allocation23], 32768  }
 0x10a   :  { %9176 = vsyncadd [#allocation23], 4294934528  ;;  %v245_v0 = vld [vmem:[#allocation2] sm:$0xff]  ;;  %v246_v2 = vld [vmem:[#allocation2 + $0x8] sm:$0xff]  ;;  %s9970_s27 = sld [smem:[#allocation32_spill]]  ;;  %s9971_s29 = sld [smem:[#allocation34_spill]] }
 0x10b   :  { %v249_v1 = vld [vmem:[#allocation2 + $0x20] sm:$0xff]  ;;  %v250_v5 = vld [vmem:[#allocation2 + $0x28] sm:$0xff]  ;;  %vm9200_vm0 = vmmov 0   ;;  %s9972_s6 = sld [smem:[#allocation36_spill]] }
 0x10c   :  { %v7216_v3 = vcombine.high %v245_v0, %v249_v1  ;;  %v7215_v4 = vcombine.low %v245_v0, %v249_v1  ;;  %v253_v6 = vld [vmem:[#allocation2 + $0x40] sm:$0xff]  ;;  %v7218_v8 = vcombine.high %v246_v2, %v250_v5  ;;  %v7217_v9 = vcombine.low %v246_v2, %v250_v5  ;;  %v254_v11 = vld [vmem:[#allocation2 + $0x48] sm:$0xff] }
 0x10d   :  { %v257_v7 = vld [vmem:[#allocation2 + $0x60] sm:$0xff]  ;;  %v258_v12 = vld [vmem:[#allocation2 + $0x68] sm:$0xff] }
 0x10e   :  { %v7224_v10 = vcombine.high %v253_v6, %v257_v7  ;;  %v261_v13 = vld [vmem:[#allocation2 + $0x80] sm:$0xff]  ;;  %1055 = vmatprep.subr.bf16.mxu0 %v7216_v3  ;;  %v7226_v14 = vcombine.high %v254_v11, %v258_v12  ;;  %v262_v16 = vld [vmem:[#allocation2 + $0x88] sm:$0xff]  ;;  %1096 = vmatprep.subr.bf16.mxu1 %v7218_v8  ;;  %v7223_v18 = vcombine.low %v253_v6, %v257_v7 }
 0x10f   :  { %v265_v15 = vld [vmem:[#allocation2 + $0xa0] sm:$0xff]  ;;  %v266_v17 = vld [vmem:[#allocation2 + $0xa8] sm:$0xff]  ;;  %1056 = vmatpush1.bf16.msra.mxu0 %v7215_v4  ;;  %1097 = vmatpush1.bf16.msra.mxu1 %v7217_v9  ;;  %v7225_v19 = vcombine.low %v254_v11, %v258_v12 }
 0x110   :  { %1057 = vmatprep.subr.bf16.mxu0 %v7224_v10  ;;  %v7232_v20 = vcombine.high %v261_v13, %v265_v15  ;;  %1098 = vmatprep.subr.bf16.mxu1 %v7226_v14  ;;  %v7234_v21 = vcombine.high %v262_v16, %v266_v17  ;;  %v269_v22 = vld [vmem:[#allocation2 + $0xc0] sm:$0xff]  ;;  %v270_v24 = vld [vmem:[#allocation2 + $0xc8] sm:$0xff]  ;;  %v7231_v26 = vcombine.low %v261_v13, %v265_v15 }
 0x111   :  { %v273_v23 = vld [vmem:[#allocation2 + $0xe0] sm:$0xff]  ;;  %v274_v25 = vld [vmem:[#allocation2 + $0xe8] sm:$0xff]  ;;  %v7233_v27 = vcombine.low %v262_v16, %v266_v17 }
 0x112   :  { %v7240_v28 = vcombine.high %v269_v22, %v273_v23  ;;  %v7242_v29 = vcombine.high %v270_v24, %v274_v25  ;;  %v277_v30 = vld [vmem:[#allocation2 + $0x100] sm:$0xff]  ;;  %v278_v32 = vld [vmem:[#allocation2 + $0x108] sm:$0xff]  ;;  %v7239_v34 = vcombine.low %v269_v22, %v273_v23  ;;  %v7241_v35 = vcombine.low %v270_v24, %v274_v25 }
 0x113   :  { %1058 = vmatpush1.bf16.msra.mxu0 %v7223_v18  ;;  %1099 = vmatpush1.bf16.msra.mxu1 %v7225_v19  ;;  %v281_v31 = vld [vmem:[#allocation2 + $0x120] sm:$0xff]  ;;  %v282_v33 = vld [vmem:[#allocation2 + $0x128] sm:$0xff] }
 0x114   :  { %1059 = vmatprep.subr.bf16.mxu0 %v7232_v20  ;;  %1100 = vmatprep.subr.bf16.mxu1 %v7234_v21  ;;  %v7248_v36 = vcombine.high %v277_v30, %v281_v31  ;;  %v7250_v37 = vcombine.high %v278_v32, %v282_v33  ;;  %v285_v38 = vld [vmem:[#allocation2 + $0x140] sm:$0xff]  ;;  %v286_v40 = vld [vmem:[#allocation2 + $0x148] sm:$0xff]  ;;  %v7247_v42 = vcombine.low %v277_v30, %v281_v31 }
 0x115   :  { %v289_v39 = vld [vmem:[#allocation2 + $0x160] sm:$0xff]  ;;  %v290_v41 = vld [vmem:[#allocation2 + $0x168] sm:$0xff]  ;;  %v7249_v43 = vcombine.low %v278_v32, %v282_v33 }
 0x116   :  { %v7256_v44 = vcombine.high %v285_v38, %v289_v39  ;;  %v7258_v45 = vcombine.high %v286_v40, %v290_v41  ;;  %v293_v46 = vld [vmem:[#allocation2 + $0x180] sm:$0xff]  ;;  %v294_v48 = vld [vmem:[#allocation2 + $0x188] sm:$0xff]  ;;  %v7255_v50 = vcombine.low %v285_v38, %v289_v39  ;;  %v7257_v51 = vcombine.low %v286_v40, %v290_v41 }
 0x117   :  { %1060 = vmatpush1.bf16.msra.mxu0 %v7231_v26  ;;  %1101 = vmatpush1.bf16.msra.mxu1 %v7233_v27  ;;  %v297_v47 = vld [vmem:[#allocation2 + $0x1a0] sm:$0xff]  ;;  %v298_v49 = vld [vmem:[#allocation2 + $0x1a8] sm:$0xff] }
 0x118   :  { %1061 = vmatprep.subr.bf16.mxu0 %v7240_v28  ;;  %1102 = vmatprep.subr.bf16.mxu1 %v7242_v29  ;;  %v7264_v52 = vcombine.high %v293_v46, %v297_v47  ;;  %v242_v53 = vld [vmem:[%s9970_s27 + $0x8] sm:$0xff]  ;;  %v7266_v54 = vcombine.high %v294_v48, %v298_v49  ;;  %v301_v55 = vld [vmem:[#allocation2 + $0x1c0] sm:$0xff]  ;;  %v7263_v60 = vcombine.low %v293_v46, %v297_v47 }
 0x119   :  { %v305_v56 = vld [vmem:[#allocation2 + $0x1e0] sm:$0xff]  ;;  %v9497_v57 = vpack.c.bf16 %v242_v53, %v242_v53  ;;  %v302_v58 = vld [vmem:[#allocation2 + $0x1c8] sm:$0xff]  ;;  %v7265_v61 = vcombine.low %v294_v48, %v298_v49 }
 0x11a   :  { %v306_v59 = vld [vmem:[#allocation2 + $0x1e8] sm:$0xff]  ;;  %v7272_v62 = vcombine.high %v301_v55, %v305_v56  ;;  %v309_v0 = vld [vmem:[#allocation2 + $0x200] sm:$0xff]  ;;  %v7271_v4 = vcombine.low %v301_v55, %v305_v56 }
 0x11b   :  { %1062 = vmatpush1.bf16.msra.mxu0 %v7239_v34  ;;  %1103 = vmatpush1.bf16.msra.mxu1 %v7241_v35  ;;  %v7274_v63 = vcombine.high %v302_v58, %v306_v59  ;;  %v313_v1 = vld [vmem:[#allocation2 + $0x220] sm:$0xff]  ;;  %v310_v2 = vld [vmem:[#allocation2 + $0x208] sm:$0xff]  ;;  %v7273_v5 = vcombine.low %v302_v58, %v306_v59 }
 0x11c   :  { %1063 = vmatprep.subr.bf16.mxu0 %v7248_v36  ;;  %1104 = vmatprep.subr.bf16.mxu1 %v7250_v37  ;;  %v314_v3 = vld [vmem:[#allocation2 + $0x228] sm:$0xff]  ;;  %v7280_v6 = vcombine.high %v309_v0, %v313_v1  ;;  %v317_v8 = vld [vmem:[#allocation2 + $0x240] sm:$0xff]  ;;  %v7279_v12 = vcombine.low %v309_v0, %v313_v1 }
 0x11d   :  { %1087 = vmatprep.mubr.bf16.mxu0 %v9497_v57  ;;  %1128 = vmatprep.mubr.bf16.mxu1 %v9497_v57  ;;  %v7282_v7 = vcombine.high %v310_v2, %v314_v3  ;;  %v321_v9 = vld [vmem:[#allocation2 + $0x260] sm:$0xff]  ;;  %v318_v10 = vld [vmem:[#allocation2 + $0x248] sm:$0xff]  ;;  %v7281_v13 = vcombine.low %v310_v2, %v314_v3  ;;  %v248_v2 = vld [vmem:[#allocation2 + $0x18] sm:$0xff] }
 0x11e   :  { %v322_v11 = vld [vmem:[#allocation2 + $0x268] sm:$0xff]  ;;  %v7288_v14 = vcombine.high %v317_v8, %v321_v9  ;;  %v325_v16 = vld [vmem:[#allocation2 + $0x280] sm:$0xff]  ;;  %v7287_v20 = vcombine.low %v317_v8, %v321_v9  ;;  %v252_v3 = vld [vmem:[#allocation2 + $0x38] sm:$0xff] }
 0x11f   :  { %1064 = vmatpush1.bf16.msra.mxu0 %v7247_v42  ;;  %1105 = vmatpush1.bf16.msra.mxu1 %v7249_v43  ;;  %v7290_v15 = vcombine.high %v318_v10, %v322_v11  ;;  %v329_v17 = vld [vmem:[#allocation2 + $0x2a0] sm:$0xff]  ;;  %v326_v18 = vld [vmem:[#allocation2 + $0x288] sm:$0xff]  ;;  %v7289_v21 = vcombine.low %v318_v10, %v322_v11  ;;  %v259_v8 = vld [vmem:[#allocation2 + $0x70] sm:$0xff] }
 0x120   :  { %1065 = vmatprep.subr.bf16.mxu0 %v7256_v44  ;;  %1106 = vmatprep.subr.bf16.mxu1 %v7258_v45  ;;  %v330_v19 = vld [vmem:[#allocation2 + $0x2a8] sm:$0xff]  ;;  %v7296_v22 = vcombine.high %v325_v16, %v329_v17  ;;  %v333_v24 = vld [vmem:[#allocation2 + $0x2c0] sm:$0xff]  ;;  %v7295_v28 = vcombine.low %v325_v16, %v329_v17  ;;  %v256_v11 = vld [vmem:[#allocation2 + $0x58] sm:$0xff] }
 0x121   :  { %v7298_v23 = vcombine.high %v326_v18, %v330_v19  ;;  %v337_v25 = vld [vmem:[#allocation2 + $0x2e0] sm:$0xff]  ;;  %v334_v26 = vld [vmem:[#allocation2 + $0x2c8] sm:$0xff]  ;;  %v7297_v29 = vcombine.low %v326_v18, %v330_v19  ;;  %v263_v16 = vld [vmem:[#allocation2 + $0x90] sm:$0xff]  ;;  %v7221_v18 = vcombine.low %v248_v2, %v252_v3 }
 0x122   :  { %v338_v27 = vld [vmem:[#allocation2 + $0x2e8] sm:$0xff]  ;;  %v7304_v30 = vcombine.high %v333_v24, %v337_v25  ;;  %v341_v32 = vld [vmem:[#allocation2 + $0x300] sm:$0xff]  ;;  %v7303_v36 = vcombine.low %v333_v24, %v337_v25  ;;  %v267_v17 = vld [vmem:[#allocation2 + $0xb0] sm:$0xff] }
 0x123   :  { %1066 = vmatpush1.bf16.msra.mxu0 %v7255_v50  ;;  %1107 = vmatpush1.bf16.msra.mxu1 %v7257_v51  ;;  %v7306_v31 = vcombine.high %v334_v26, %v338_v27  ;;  %v345_v33 = vld [vmem:[#allocation2 + $0x320] sm:$0xff]  ;;  %v342_v34 = vld [vmem:[#allocation2 + $0x308] sm:$0xff]  ;;  %v7305_v39 = vcombine.low %v334_v26, %v338_v27  ;;  %v271_v24 = vld [vmem:[#allocation2 + $0xd0] sm:$0xff]  ;;  %v7236_v27 = vcombine.high %v263_v16, %v267_v17 }
 0x124   :  { %1067 = vmatprep.subr.bf16.mxu0 %v7264_v52  ;;  %1108 = vmatprep.subr.bf16.mxu1 %v7266_v54  ;;  %v346_v35 = vld [vmem:[#allocation2 + $0x328] sm:$0xff]  ;;  %v349_v37 = vld [vmem:[#allocation2 + $0x340] sm:$0xff]  ;;  %v7312_v40 = vcombine.high %v341_v32, %v345_v33  ;;  %v7311_v44 = vcombine.low %v341_v32, %v345_v33  ;;  %v275_v25 = vld [vmem:[#allocation2 + $0xf0] sm:$0xff] }
 0x125   :  { %v353_v38 = vld [vmem:[#allocation2 + $0x360] sm:$0xff]  ;;  %v350_v41 = vld [vmem:[#allocation2 + $0x348] sm:$0xff]  ;;  %v7314_v43 = vcombine.high %v342_v34, %v346_v35  ;;  %v7313_v47 = vcombine.low %v342_v34, %v346_v35  ;;  %v279_v32 = vld [vmem:[#allocation2 + $0x110] sm:$0xff]  ;;  %v7244_v35 = vcombine.high %v271_v24, %v275_v25 }
 0x126   :  { %v354_v42 = vld [vmem:[#allocation2 + $0x368] sm:$0xff]  ;;  %v357_v45 = vld [vmem:[#allocation2 + $0x380] sm:$0xff]  ;;  %v7320_v48 = vcombine.high %v349_v37, %v353_v38  ;;  %v7319_v52 = vcombine.low %v349_v37, %v353_v38  ;;  %v283_v33 = vld [vmem:[#allocation2 + $0x130] sm:$0xff] }
 0x127   :  { %1068 = vmatpush1.bf16.msra.mxu0 %v7263_v60  ;;  %1109 = vmatpush1.bf16.msra.mxu1 %v7265_v61  ;;  %v361_v46 = vld [vmem:[#allocation2 + $0x3a0] sm:$0xff]  ;;  %v358_v49 = vld [vmem:[#allocation2 + $0x388] sm:$0xff]  ;;  %v7322_v51 = vcombine.high %v350_v41, %v354_v42  ;;  %v7321_v55 = vcombine.low %v350_v41, %v354_v42  ;;  %v284_v37 = vld [vmem:[#allocation2 + $0x138] sm:$0xff] }
 0x128   :  { %1069 = vmatprep.subr.bf16.mxu0 %v7272_v62  ;;  %1110 = vmatprep.subr.bf16.mxu1 %v7274_v63  ;;  %v362_v50 = vld [vmem:[#allocation2 + $0x3a8] sm:$0xff]  ;;  %v365_v53 = vld [vmem:[#allocation2 + $0x3c0] sm:$0xff]  ;;  %v7328_v56 = vcombine.high %v357_v45, %v361_v46  ;;  %v7327_v61 = vcombine.low %v357_v45, %v361_v46  ;;  %v247_v62 = vld [vmem:[#allocation2 + $0x10] sm:$0xff]  ;;  %v7251_v46 = vcombine.low %v279_v32, %v283_v33 }
 0x129   :  { %v369_v54 = vld [vmem:[#allocation2 + $0x3e0] sm:$0xff]  ;;  %v366_v58 = vld [vmem:[#allocation2 + $0x3c8] sm:$0xff]  ;;  %v7330_v60 = vcombine.high %v358_v49, %v362_v50  ;;  %v251_v63 = vld [vmem:[#allocation2 + $0x30] sm:$0xff]  ;;  %v7329_v0 = vcombine.low %v358_v49, %v362_v50 }
 0x12a   :  { %v370_v59 = vld [vmem:[#allocation2 + $0x3e8] sm:$0xff]  ;;  %v7336_v1 = vcombine.high %v365_v53, %v369_v54  ;;  %v7220_v10 = vcombine.high %v247_v62, %v251_v63  ;;  %v291_v41 = vld [vmem:[#allocation2 + $0x170] sm:$0xff] }
 0x12b   :  { %1070 = vmatpush1.bf16.msra.mxu0 %v7271_v4  ;;  %1111 = vmatpush1.bf16.msra.mxu1 %v7273_v5  ;;  %v7338_v4 = vcombine.high %v366_v58, %v370_v59  ;;  %v241_v5 = vld [vmem:[%s9970_s27] sm:$0xff]  ;;  %v7337_v9 = vcombine.low %v366_v58, %v370_v59 }
 0x12c   :  { %1071 = vmatprep.subr.bf16.mxu0 %v7280_v6  ;;  %1112 = vmatprep.subr.bf16.mxu1 %v7282_v7  ;;  %v7335_v6 = vcombine.low %v365_v53, %v369_v54  ;;  %v255_v7 = vld [vmem:[#allocation2 + $0x50] sm:$0xff] }
 0x12d   :  { %v7228_v19 = vcombine.high %v255_v7, %v259_v8 }
 0x12f   :  { %1072 = vmatpush1.bf16.msra.mxu0 %v7279_v12  ;;  %1113 = vmatpush1.bf16.msra.mxu1 %v7281_v13  ;;  %v260_v12 = vld [vmem:[#allocation2 + $0x78] sm:$0xff]  ;;  %v7222_v13 = vcombine.high %v248_v2, %v252_v3 }
 0x130   :  { %1073 = vmatprep.subr.bf16.mxu0 %v7288_v14  ;;  %1114 = vmatprep.subr.bf16.mxu1 %v7290_v15  ;;  %v9504_v14 = vpack.c.bf16 %v241_v5, %v241_v5  ;;  %v7219_v15 = vcombine.low %v247_v62, %v251_v63  ;;  %v7229_v26 = vcombine.low %v256_v11, %v260_v12  ;;  %v316_v5 = vld [vmem:[#allocation2 + $0x238] sm:$0xff] }
 0x133   :  { %1074 = vmatpush1.bf16.msra.mxu0 %v7287_v20  ;;  %1115 = vmatpush1.bf16.msra.mxu1 %v7289_v21  ;;  %v264_v20 = vld [vmem:[#allocation2 + $0x98] sm:$0xff] }
 0x134   :  { %1075 = vmatprep.subr.bf16.mxu0 %v7296_v22  ;;  %1116 = vmatprep.subr.bf16.mxu1 %v7298_v23  ;;  %v268_v21 = vld [vmem:[#allocation2 + $0xb8] sm:$0xff]  ;;  %v7230_v22 = vcombine.high %v256_v11, %v260_v12  ;;  %v7227_v23 = vcombine.low %v255_v7, %v259_v8  ;;  %v319_v8 = vld [vmem:[#allocation2 + $0x250] sm:$0xff] }
 0x135   :  { %v7237_v34 = vcombine.low %v264_v20, %v268_v21  ;;  %v320_v12 = vld [vmem:[#allocation2 + $0x258] sm:$0xff] }
 0x137   :  { %1076 = vmatpush1.bf16.msra.mxu0 %v7295_v28  ;;  %1117 = vmatpush1.bf16.msra.mxu1 %v7297_v29  ;;  %v272_v28 = vld [vmem:[#allocation2 + $0xd8] sm:$0xff] }
 0x138   :  { %1077 = vmatprep.subr.bf16.mxu0 %v7304_v30  ;;  %1118 = vmatprep.subr.bf16.mxu1 %v7306_v31  ;;  %v276_v29 = vld [vmem:[#allocation2 + $0xf8] sm:$0xff]  ;;  %v7238_v30 = vcombine.high %v264_v20, %v268_v21  ;;  %v7235_v31 = vcombine.low %v263_v16, %v267_v17  ;;  %v327_v17 = vld [vmem:[#allocation2 + $0x290] sm:$0xff] }
 0x139   :  { %v7246_v38 = vcombine.high %v272_v28, %v276_v29  ;;  %v7245_v42 = vcombine.low %v272_v28, %v276_v29  ;;  %v328_v21 = vld [vmem:[#allocation2 + $0x298] sm:$0xff] }
 0x13a   :  { %v336_v29 = vld [vmem:[#allocation2 + $0x2d8] sm:$0xff] }
 0x13b   :  { %1078 = vmatpush1.bf16.msra.mxu0 %v7303_v36  ;;  %1119 = vmatpush1.bf16.msra.mxu1 %v7305_v39  ;;  %v280_v36 = vld [vmem:[#allocation2 + $0x118] sm:$0xff]  ;;  %v7243_v39 = vcombine.low %v271_v24, %v275_v25  ;;  %v335_v25 = vld [vmem:[#allocation2 + $0x2d0] sm:$0xff] }
 0x13c   :  { %1079 = vmatprep.subr.bf16.mxu0 %v7312_v40  ;;  %1120 = vmatprep.subr.bf16.mxu1 %v7314_v43  ;;  %v287_v40 = vld [vmem:[#allocation2 + $0x150] sm:$0xff]  ;;  %v288_v43 = vld [vmem:[#allocation2 + $0x158] sm:$0xff]  ;;  %v7254_v45 = vcombine.high %v280_v36, %v284_v37  ;;  %v7253_v49 = vcombine.low %v280_v36, %v284_v37 }
 0x13d   :  { %v7260_v50 = vcombine.high %v287_v40, %v291_v41  ;;  %v7259_v54 = vcombine.low %v287_v40, %v291_v41  ;;  %v344_v37 = vld [vmem:[#allocation2 + $0x318] sm:$0xff]  ;;  %v351_v41 = vld [vmem:[#allocation2 + $0x350] sm:$0xff] }
 0x13f   :  { %1080 = vmatpush1.bf16.msra.mxu0 %v7311_v44  ;;  %1121 = vmatpush1.bf16.msra.mxu1 %v7313_v47  ;;  %v292_v44 = vld [vmem:[#allocation2 + $0x178] sm:$0xff]  ;;  %v295_v47 = vld [vmem:[#allocation2 + $0x190] sm:$0xff] }
 0x140   :  { %1081 = vmatprep.subr.bf16.mxu0 %v7320_v48  ;;  %1122 = vmatprep.subr.bf16.mxu1 %v7322_v51  ;;  %v299_v48 = vld [vmem:[#allocation2 + $0x1b0] sm:$0xff]  ;;  %v296_v51 = vld [vmem:[#allocation2 + $0x198] sm:$0xff]  ;;  %v7262_v53 = vcombine.high %v288_v43, %v292_v44  ;;  %v7261_v58 = vcombine.low %v288_v43, %v292_v44 }
 0x141   :  { %v7268_v59 = vcombine.high %v295_v47, %v299_v48  ;;  %v7267_v63 = vcombine.low %v295_v47, %v299_v48  ;;  %v352_v44 = vld [vmem:[#allocation2 + $0x358] sm:$0xff]  ;;  %v359_v48 = vld [vmem:[#allocation2 + $0x390] sm:$0xff] }
 0x143   :  { %1082 = vmatpush1.bf16.msra.mxu0 %v7319_v52  ;;  %1123 = vmatpush1.bf16.msra.mxu1 %v7321_v55  ;;  %v300_v52 = vld [vmem:[#allocation2 + $0x1b8] sm:$0xff]  ;;  %v303_v55 = vld [vmem:[#allocation2 + $0x1d0] sm:$0xff] }
 0x144   :  { %1083 = vmatprep.subr.bf16.mxu0 %v7328_v56  ;;  %1124 = vmatprep.subr.bf16.mxu1 %v7330_v60  ;;  %v307_v56 = vld [vmem:[#allocation2 + $0x1f0] sm:$0xff]  ;;  %v304_v60 = vld [vmem:[#allocation2 + $0x1d8] sm:$0xff]  ;;  %v7270_v62 = vcombine.high %v296_v51, %v300_v52  ;;  %v7269_v2 = vcombine.low %v296_v51, %v300_v52 }
 0x145   :  { %v7276_v3 = vcombine.high %v303_v55, %v307_v56  ;;  %v7275_v7 = vcombine.low %v303_v55, %v307_v56  ;;  %v360_v52 = vld [vmem:[#allocation2 + $0x398] sm:$0xff]  ;;  %v367_v56 = vld [vmem:[#allocation2 + $0x3d0] sm:$0xff] }
 0x147   :  { %1084 = vmatpush1.bf16.msra.mxu0 %v7327_v61  ;;  %1125 = vmatpush1.bf16.msra.mxu1 %v7329_v0  ;;  %v308_v61 = vld [vmem:[#allocation2 + $0x1f8] sm:$0xff]  ;;  %v311_v0 = vld [vmem:[#allocation2 + $0x210] sm:$0xff] }
 0x148   :  { %1085 = vmatprep.subr.bf16.mxu0 %v7336_v1  ;;  %1126 = vmatprep.subr.bf16.mxu1 %v7338_v4  ;;  %v315_v1 = vld [vmem:[#allocation2 + $0x230] sm:$0xff]  ;;  %v312_v4 = vld [vmem:[#allocation2 + $0x218] sm:$0xff] }
 0x149   :  { %v7284_v11 = vcombine.high %v311_v0, %v315_v1  ;;  %v7283_v16 = vcombine.low %v311_v0, %v315_v1 }
 0x14b   :  { %1086 = vmatpush1.bf16.msra.mxu0 %v7335_v6  ;;  %1127 = vmatpush1.bf16.msra.mxu1 %v7337_v9  ;;  %v7278_v6 = vcombine.high %v304_v60, %v308_v61  ;;  %v323_v9 = vld [vmem:[#allocation2 + $0x270] sm:$0xff] }
 0x14c   :  { %1137 = vmatprep.subr.bf16.mxu0 %v7220_v10  ;;  %1178 = vmatprep.subr.bf16.mxu1 %v7222_v13  ;;  %v7277_v10 = vcombine.low %v304_v60, %v308_v61  ;;  %v324_v13 = vld [vmem:[#allocation2 + $0x278] sm:$0xff]  ;;  %v7292_v20 = vcombine.high %v319_v8, %v323_v9  ;;  %v7291_v24 = vcombine.low %v319_v8, %v323_v9 }
 0x14d   :  { %v368_v61 = vld [vmem:[#allocation2 + $0x3d8] sm:$0xff] }
 0x14e   :  { %1088 = vmatmul.mubr.bf16.vlgmr.msra.gmra.mrb[0].mxu0 %v9504_v14  ;;  %1129 = vmatmul.mubr.bf16.vlgmr.msra.gmra.mrb[0].mxu1 %v9504_v14  ;;  %v8208_v8 = vld [vmem:[#allocation4 + $0x8] ss:$16 sps:$4 sm:$0xff]   ;;  %v8210_v9 = vld [vmem:[#allocation4 + $0xc] ss:$16 sps:$4 sm:$0xff]  }
 0x14f   :  { %1138 = vmatpush1.bf16.msra.mxu0 %v7219_v15  ;;  %1179 = vmatpush1.bf16.msra.mxu1 %v7221_v18  ;;  %v7286_v15 = vcombine.high %v312_v4, %v316_v5  ;;  %v331_v18 = vld [vmem:[#allocation2 + $0x2b0] sm:$0xff] }
 0x150   :  { %1139 = vmatprep.subr.bf16.mxu0 %v7228_v19  ;;  %1180 = vmatprep.subr.bf16.mxu1 %v7230_v22  ;;  %v7285_v19 = vcombine.low %v312_v4, %v316_v5  ;;  %v332_v22 = vld [vmem:[#allocation2 + $0x2b8] sm:$0xff]  ;;  %v7300_v28 = vcombine.high %v327_v17, %v331_v18 }
 0x151   :  { %1169 = vmatprep.mubr.bf16.mxu0 %v9497_v57  ;;  %1210 = vmatprep.mubr.bf16.mxu1 %v9497_v57  ;;  %v7252_v57 = vcombine.high %v279_v32, %v283_v33  ;;  %v7299_v32 = vcombine.low %v327_v17, %v331_v18  ;;  %v343_v33 = vld [vmem:[#allocation2 + $0x310] sm:$0xff] }
 0x152   :  { %v8217_v17 = vld [vmem:[#allocation4 + $0x40] ss:$16 sps:$4 sm:$0xff]   ;;  %v8225_v18 = vld [vmem:[#allocation4 + $0x64] ss:$16 sps:$4 sm:$0xff]  }
 0x153   :  { %1140 = vmatpush1.bf16.msra.mxu0 %v7227_v23  ;;  %1181 = vmatpush1.bf16.msra.mxu1 %v7229_v26  ;;  %v7294_v23 = vcombine.high %v320_v12, %v324_v13  ;;  %v339_v26 = vld [vmem:[#allocation2 + $0x2f0] sm:$0xff] }
 0x154   :  { %1141 = vmatprep.subr.bf16.mxu0 %v7236_v27  ;;  %1182 = vmatprep.subr.bf16.mxu1 %v7238_v30  ;;  %v7293_v27 = vcombine.low %v320_v12, %v324_v13  ;;  %v340_v30 = vld [vmem:[#allocation2 + $0x2f8] sm:$0xff]  ;;  %v7308_v36 = vcombine.high %v335_v25, %v339_v26  ;;  %v7307_v40 = vcombine.low %v335_v25, %v339_v26  ;;  %v8211_v12 = vld [vmem:[#allocation4 + $0x20] ss:$16 sps:$4 sm:$0xff]   ;;  %v8237_v26 = vld [vmem:[#allocation4 + $0xa4] ss:$16 sps:$4 sm:$0xff]  }
 0x155   :  { %v8214_v13 = vld [vmem:[#allocation4 + $0x28] ss:$16 sps:$4 sm:$0xff]  }
 0x156   :  { %v8232_v25 = vld [vmem:[#allocation4 + $0x88] ss:$16 sps:$4 sm:$0xff]  }
 0x157   :  { %1142 = vmatpush1.bf16.msra.mxu0 %v7235_v31  ;;  %1183 = vmatpush1.bf16.msra.mxu1 %v7237_v34  ;;  %v7302_v31 = vcombine.high %v328_v21, %v332_v22  ;;  %v347_v34 = vld [vmem:[#allocation2 + $0x330] sm:$0xff] }
 0x158   :  { %1143 = vmatprep.subr.bf16.mxu0 %v7244_v35  ;;  %1184 = vmatprep.subr.bf16.mxu1 %v7246_v38  ;;  %v7301_v35 = vcombine.low %v328_v21, %v332_v22  ;;  %v348_v38 = vld [vmem:[#allocation2 + $0x338] sm:$0xff]  ;;  %v7316_v43 = vcombine.high %v343_v33, %v347_v34  ;;  %v7315_v47 = vcombine.low %v343_v33, %v347_v34  ;;  %v8231_v22 = vld [vmem:[#allocation4 + $0x84] ss:$16 sps:$4 sm:$0xff]  }
 0x159   :  { %v8226_v21 = vld [vmem:[#allocation4 + $0x68] ss:$16 sps:$4 sm:$0xff]   ;;  %v8249_v34 = vld [vmem:[#allocation4 + $0xe4] ss:$16 sps:$4 sm:$0xff]  }
 0x15a   :  { %v8244_v33 = vld [vmem:[#allocation4 + $0xc8] ss:$16 sps:$4 sm:$0xff]  }
 0x15b   :  { %1144 = vmatpush1.bf16.msra.mxu0 %v7243_v39  ;;  %1185 = vmatpush1.bf16.msra.mxu1 %v7245_v42  ;;  %v7310_v39 = vcombine.high %v336_v29, %v340_v30  ;;  %v355_v42 = vld [vmem:[#allocation2 + $0x370] sm:$0xff] }
 0x15c   :  { %1145 = vmatprep.subr.bf16.mxu0 %v7252_v57  ;;  %1186 = vmatprep.subr.bf16.mxu1 %v7254_v45  ;;  %v7309_v57 = vcombine.low %v336_v29, %v340_v30  ;;  %v356_v45 = vld [vmem:[#allocation2 + $0x378] sm:$0xff]  ;;  %v7324_v51 = vcombine.high %v351_v41, %v355_v42  ;;  %v7323_v55 = vcombine.low %v351_v41, %v355_v42  ;;  %v8243_v30 = vld [vmem:[#allocation4 + $0xc4] ss:$16 sps:$4 sm:$0xff]  }
 0x15d   :  { %v8238_v29 = vld [vmem:[#allocation4 + $0xa8] ss:$16 sps:$4 sm:$0xff]  }
 0x15f   :  { %1146 = vmatpush1.bf16.msra.mxu0 %v7251_v46  ;;  %1187 = vmatpush1.bf16.msra.mxu1 %v7253_v49  ;;  %v7318_v46 = vcombine.high %v344_v37, %v348_v38  ;;  %v363_v49 = vld [vmem:[#allocation2 + $0x3b0] sm:$0xff] }
 0x160   :  { %1147 = vmatprep.subr.bf16.mxu0 %v7260_v50  ;;  %1188 = vmatprep.subr.bf16.mxu1 %v7262_v53  ;;  %v7317_v50 = vcombine.low %v344_v37, %v348_v38  ;;  %v364_v53 = vld [vmem:[#allocation2 + $0x3b8] sm:$0xff]  ;;  %v7332_v60 = vcombine.high %v359_v48, %v363_v49  ;;  %v7331_v0 = vcombine.low %v359_v48, %v363_v49 }
 0x161   :  { %v7333_v1 = vcombine.low %v360_v52, %v364_v53  ;;  %v8250_v37 = vld [vmem:[#allocation4 + $0xe8] ss:$16 sps:$4 sm:$0xff]  }
 0x162   :  { %v373_v49 = vld [vmem:[%s9971_s29] ss:$4 sm:$0xff] }
 0x163   :  { %1148 = vmatpush1.bf16.msra.mxu0 %v7259_v54  ;;  %1189 = vmatpush1.bf16.msra.mxu1 %v7261_v58  ;;  %v7326_v54 = vcombine.high %v352_v44, %v356_v45  ;;  %v371_v58 = vld [vmem:[#allocation2 + $0x3f0] sm:$0xff] }
 0x164   :  { %1149 = vmatprep.subr.bf16.mxu0 %v7268_v59  ;;  %1190 = vmatprep.subr.bf16.mxu1 %v7270_v62  ;;  %v7325_v59 = vcombine.low %v352_v44, %v356_v45  ;;  %v372_v62 = vld [vmem:[#allocation2 + $0x3f8] sm:$0xff]  ;;  %v7339_v4 = vcombine.low %v367_v56, %v371_v58  ;;  %v375_v45 = vlaneseq }
 0x165   :  { %v7341_v5 = vcombine.low %v368_v61, %v372_v62 }
 0x167   :  { %1150 = vmatpush1.bf16.msra.mxu0 %v7267_v63  ;;  %1191 = vmatpush1.bf16.msra.mxu1 %v7269_v2  ;;  %v7334_v63 = vcombine.high %v360_v52, %v364_v53  ;;  %v7340_v2 = vcombine.high %v367_v56, %v371_v58 }
 0x168   :  { %1151 = vmatprep.subr.bf16.mxu0 %v7276_v3  ;;  %1192 = vmatprep.subr.bf16.mxu1 %v7278_v6  ;;  %v7342_v3 = vcombine.high %v368_v61, %v372_v62  ;;  %v8205_v6 = vld [vmem:[#allocation4] ss:$16 sps:$4 sm:$0xff]  }
 0x16b   :  { %1152 = vmatpush1.bf16.msra.mxu0 %v7275_v7  ;;  %1193 = vmatpush1.bf16.msra.mxu1 %v7277_v10  ;;  %v8207_v7 = vld [vmem:[#allocation4 + $0x4] ss:$16 sps:$4 sm:$0xff]  }
 0x16c   :  { %1153 = vmatprep.subr.bf16.mxu0 %v7284_v11  ;;  %1194 = vmatprep.subr.bf16.mxu1 %v7286_v15  ;;  %v8213_v10 = vld [vmem:[#allocation4 + $0x24] ss:$16 sps:$4 sm:$0xff]   ;;  %v8216_v11 = vld [vmem:[#allocation4 + $0x2c] ss:$16 sps:$4 sm:$0xff]  }
 0x16d   :  { %v8219_v15 = vld [vmem:[#allocation4 + $0x44] ss:$16 sps:$4 sm:$0xff]  }
 0x16f   :  { %1154 = vmatpush1.bf16.msra.mxu0 %v7283_v16  ;;  %1195 = vmatpush1.bf16.msra.mxu1 %v7285_v19  ;;  %v8222_v16 = vld [vmem:[#allocation4 + $0x4c] ss:$16 sps:$4 sm:$0xff]  }
 0x170   :  { %1155 = vmatprep.subr.bf16.mxu0 %v7292_v20  ;;  %1196 = vmatprep.subr.bf16.mxu1 %v7294_v23  ;;  %v8228_v19 = vld [vmem:[#allocation4 + $0x6c] ss:$16 sps:$4 sm:$0xff]   ;;  %v8223_v20 = vld [vmem:[#allocation4 + $0x60] ss:$16 sps:$4 sm:$0xff]  }
 0x171   :  { %v8234_v23 = vld [vmem:[#allocation4 + $0x8c] ss:$16 sps:$4 sm:$0xff]  }
 0x173   :  { %1156 = vmatpush1.bf16.msra.mxu0 %v7291_v24  ;;  %1197 = vmatpush1.bf16.msra.mxu1 %v7293_v27  ;;  %v8229_v24 = vld [vmem:[#allocation4 + $0x80] ss:$16 sps:$4 sm:$0xff]   ;;  %v8240_v27 = vld [vmem:[#allocation4 + $0xac] ss:$16 sps:$4 sm:$0xff]  }
 0x174   :  { %1157 = vmatprep.subr.bf16.mxu0 %v7300_v28  ;;  %1198 = vmatprep.subr.bf16.mxu1 %v7302_v31  ;;  %v8235_v28 = vld [vmem:[#allocation4 + $0xa0] ss:$16 sps:$4 sm:$0xff]   ;;  %v8246_v31 = vld [vmem:[#allocation4 + $0xcc] ss:$16 sps:$4 sm:$0xff]  }
 0x177   :  { %1158 = vmatpush1.bf16.msra.mxu0 %v7299_v32  ;;  %1199 = vmatpush1.bf16.msra.mxu1 %v7301_v35  ;;  %v8241_v32 = vld [vmem:[#allocation4 + $0xc0] ss:$16 sps:$4 sm:$0xff]   ;;  %v8252_v35 = vld [vmem:[#allocation4 + $0xec] ss:$16 sps:$4 sm:$0xff]  }
 0x178   :  { %1159 = vmatprep.subr.bf16.mxu0 %v7308_v36  ;;  %1200 = vmatprep.subr.bf16.mxu1 %v7310_v39  ;;  %v8247_v36 = vld [vmem:[#allocation4 + $0xe0] ss:$16 sps:$4 sm:$0xff]  }
 0x17b   :  { %1160 = vmatpush1.bf16.msra.mxu0 %v7307_v40  ;;  %1201 = vmatpush1.bf16.msra.mxu1 %v7309_v57 }
 0x17c   :  { %1161 = vmatprep.subr.bf16.mxu0 %v7316_v43  ;;  %1202 = vmatprep.subr.bf16.mxu1 %v7318_v46  ;;  %v376_v46 = vshrl.u32 %v375_v45, 7  ;;  %v8262_v45 = vld [vmem:[#allocation4 + $0x128] ss:$16 sps:$4 sm:$0xff]  }
 0x17e   :  { %v9514_v48 = vsub.s32 1, %v376_v46  ;;  %v9521_v52 = vsub.s32 2, %v376_v46  ;;  %v9528_v56 = vsub.s32 3, %v376_v46 }
 0x17f   :  { %1162 = vmatpush1.bf16.msra.mxu0 %v7315_v47  ;;  %1203 = vmatpush1.bf16.msra.mxu1 %v7317_v50  ;;  %v9512_v47 = vsub.s32 0, %v376_v46 }
 0x180   :  { %1163 = vmatprep.subr.bf16.mxu0 %v7324_v51  ;;  %1204 = vmatprep.subr.bf16.mxu1 %v7326_v54  ;;  %v382_v51 = vrot.slane %v373_v49, %v9514_v48  ;;  %v390_v61 = vrot.slane %v373_v49, %v9528_v56 }
 0x181   :  { %v378_v50 = vrot.slane %v373_v49, %v9512_v47 }
 0x183   :  { %1164 = vmatpush1.bf16.msra.mxu0 %v7323_v55  ;;  %1205 = vmatpush1.bf16.msra.mxu1 %v7325_v59  ;;  %v386_v55 = vrot.slane %v373_v49, %v9521_v52 }
 0x184   :  { %1165 = vmatprep.subr.bf16.mxu0 %v7332_v60  ;;  %1206 = vmatprep.subr.bf16.mxu1 %v7334_v63  ;;  %v9539_v63 = vsub.s32 4, %v376_v46 }
 0x187   :  { %1166 = vmatpush1.bf16.msra.mxu0 %v7331_v0  ;;  %1207 = vmatpush1.bf16.msra.mxu1 %v7333_v1  ;;  %v9541_v0 = vsub.s32 5, %v376_v46  ;;  %v9543_v1 = vsub.s32 6, %v376_v46 }
 0x188   :  { %1167 = vmatprep.subr.bf16.mxu0 %v7340_v2  ;;  %1208 = vmatprep.subr.bf16.mxu1 %v7342_v3 }
 0x18b   :  { %1168 = vmatpush1.bf16.msra.mxu0 %v7339_v4  ;;  %1209 = vmatpush1.bf16.msra.mxu1 %v7341_v5 }
 0x18c   :  { %2945 = vmatprep.subr.bf16.mxu0 %v8207_v7  ;;  %3109 = vmatprep.subr.bf16.mxu1 %v8210_v9  ;;  %v398_v7 = vrot.slane %v373_v49, %v9541_v0 }
 0x18e   :  { %1170 = vmatmul.mubr.bf16.vlgmr.msra.gmra.mrb[4].mxu0 %v9504_v14  ;;  %1211 = vmatmul.mubr.bf16.vlgmr.msra.gmra.mrb[4].mxu1 %v9504_v14  ;;  %v8220_v14 = vld [vmem:[#allocation4 + $0x48] ss:$16 sps:$4 sm:$0xff]  }
 0x18f   :  { %2946 = vmatpush1.bf16.msra.mxu0 %v8205_v6  ;;  %3110 = vmatpush1.bf16.msra.mxu1 %v8208_v8  ;;  %v394_v6 = vrot.slane %v373_v49, %v9539_v63  ;;  %v402_v8 = vrot.slane %v373_v49, %v9543_v1 }
 0x190   :  { %2947 = vmatprep.subr.bf16.mxu0 %v8213_v10  ;;  %3111 = vmatprep.subr.bf16.mxu1 %v8216_v11  ;;  %v9555_v11 = vsub.s32 7, %v376_v46  ;;  %v8267_v46 = vld [vmem:[#allocation4 + $0x144] ss:$16 sps:$4 sm:$0xff]  }
 0x193   :  { %2948 = vmatpush1.bf16.msra.mxu0 %v8211_v12  ;;  %3112 = vmatpush1.bf16.msra.mxu1 %v8214_v13 }
 0x194   :  { %2949 = vmatprep.subr.bf16.mxu0 %v8219_v15  ;;  %3113 = vmatprep.subr.bf16.mxu1 %v8222_v16 }
 0x197   :  { %2950 = vmatpush1.bf16.msra.mxu0 %v8217_v17  ;;  %3114 = vmatpush1.bf16.msra.mxu1 %v8220_v14 }
 0x198   :  { %2951 = vmatprep.subr.bf16.mxu0 %v8225_v18  ;;  %3115 = vmatprep.subr.bf16.mxu1 %v8228_v19 }
 0x19b   :  { %2952 = vmatpush1.bf16.msra.mxu0 %v8223_v20  ;;  %3116 = vmatpush1.bf16.msra.mxu1 %v8226_v21 }
 0x19c   :  { %2953 = vmatprep.subr.bf16.mxu0 %v8231_v22  ;;  %3117 = vmatprep.subr.bf16.mxu1 %v8234_v23 }
 0x19f   :  { %2954 = vmatpush1.bf16.msra.mxu0 %v8229_v24  ;;  %3118 = vmatpush1.bf16.msra.mxu1 %v8232_v25  ;;  %v406_v24 = vrot.slane %v373_v49, %v9555_v11  ;;  %v8270_v49 = vld [vmem:[#allocation4 + $0x14c] ss:$16 sps:$4 sm:$0xff]  }
 0x1a0   :  { %2955 = vmatprep.subr.bf16.mxu0 %v8237_v26  ;;  %3119 = vmatprep.subr.bf16.mxu1 %v8240_v27 }
 0x1a3   :  { %2956 = vmatpush1.bf16.msra.mxu0 %v8235_v28  ;;  %3120 = vmatpush1.bf16.msra.mxu1 %v8238_v29 }
 0x1a4   :  { %2957 = vmatprep.subr.bf16.mxu0 %v8243_v30  ;;  %3121 = vmatprep.subr.bf16.mxu1 %v8246_v31 }
 0x1a7   :  { %2958 = vmatpush1.bf16.msra.mxu0 %v8241_v32  ;;  %3122 = vmatpush1.bf16.msra.mxu1 %v8244_v33 }
 0x1a8   :  { %2959 = vmatprep.subr.bf16.mxu0 %v8249_v34  ;;  %3123 = vmatprep.subr.bf16.mxu1 %v8252_v35 }
 0x1ab   :  { %2960 = vmatpush1.bf16.msra.mxu0 %v8247_v36  ;;  %3124 = vmatpush1.bf16.msra.mxu1 %v8250_v37 }
 0x221   :  { %v1089_v38 = vpop.f32.mrb[0].mxu0  ;;  %v1130_v40 = vpop.f32.mrb[0].mxu1 }
 0x222   :  { %v1091_v39 = vpop.f32.mrb[1].mxu0  ;;  %v1132_v42 = vpop.f32.mrb[1].mxu1  ;;  %v9523_v53 = vadd.f32 %v1089_v38, %v378_v50  ;;  %v9534_v60 = vadd.f32 %v1130_v40, %v386_v55  ;;  %v8258_v40 = vld [vmem:[#allocation4 + $0x10c] ss:$16 sps:$4 sm:$0xff]   ;;  %v8265_v50 = vld [vmem:[#allocation4 + $0x140] ss:$16 sps:$4 sm:$0xff]  }
 0x223   :  { %v1093_v41 = vpop.f32.mrb[2].mxu0  ;;  %v1134_v43 = vpop.f32.mrb[2].mxu1  ;;  %v9525_v54 = vadd.f32 %v1091_v39, %v382_v51  ;;  %v9547_v4 = vadd.f32 %v1132_v42, %v390_v61  ;;  %v8255_v39 = vld [vmem:[#allocation4 + $0x104] ss:$16 sps:$4 sm:$0xff]   ;;  %v8256_v42 = vld [vmem:[#allocation4 + $0x108] ss:$16 sps:$4 sm:$0xff]   ;;  %3125 = vmatprep.subr.bf16.mxu1 %v8258_v40 }
 0x224   :  { %v1094_v57 = vpop.f32.mrb[3].mxu0  ;;  %v1135_v44 = vpop.f32.mrb[3].mxu1  ;;  %v1230_v58 = vmul.f32 %v9523_v53, %v9523_v53  ;;  %v1232_v3 = vmul.f32 %v9534_v60, %v9534_v60  ;;  %v8253_v41 = vld [vmem:[#allocation4 + $0x100] ss:$16 sps:$4 sm:$0xff]   ;;  %2961 = vmatprep.subr.bf16.mxu0 %v8255_v39  ;;  %3126 = vmatpush1.bf16.msra.mxu1 %v8256_v42  ;;  %v8264_v43 = vld [vmem:[#allocation4 + $0x12c] ss:$16 sps:$4 sm:$0xff]  }
 0x225   :  { %v1231_v59 = vmul.f32 %v9525_v54, %v9525_v54  ;;  %v1219_v62 = vadd.f32 %v9525_v54, %v9523_v53  ;;  %v1233_v10 = vmul.f32 %v9547_v4, %v9547_v4  ;;  %2962 = vmatpush1.bf16.msra.mxu0 %v8253_v41  ;;  %v8261_v57 = vld [vmem:[#allocation4 + $0x124] ss:$16 sps:$4 sm:$0xff]   ;;  %v8259_v44 = vld [vmem:[#allocation4 + $0x120] ss:$16 sps:$4 sm:$0xff]   ;;  %3127 = vmatprep.subr.bf16.mxu1 %v8264_v43  ;;  %v8268_v51 = vld [vmem:[#allocation4 + $0x148] ss:$16 sps:$4 sm:$0xff]  }
 0x226   :  { %2963 = vmatprep.subr.bf16.mxu0 %v8261_v57  ;;  %v8273_v55 = vld [vmem:[#allocation4 + $0x164] ss:$16 sps:$4 sm:$0xff]   ;;  %v8274_v61 = vld [vmem:[#allocation4 + $0x168] ss:$16 sps:$4 sm:$0xff]  }
 0x227   :  { %v1238_v2 = vadd.f32 %v1231_v59, %v1230_v58  ;;  %v1220_v5 = vadd.f32 %v1219_v62, %v9534_v60  ;;  %v8276_v58 = vld [vmem:[#allocation4 + $0x16c] ss:$16 sps:$4 sm:$0xff]   ;;  %v8271_v59 = vld [vmem:[#allocation4 + $0x160] ss:$16 sps:$4 sm:$0xff]   ;;  %v8279_v62 = vld [vmem:[#allocation4 + $0x184] ss:$16 sps:$4 sm:$0xff]  }
 0x228   :  { %3128 = vmatpush1.bf16.msra.mxu1 %v8262_v45 }
 0x229   :  { %v1239_v9 = vadd.f32 %v1238_v2, %v1232_v3  ;;  %v1221_v13 = vadd.f32 %v1220_v5, %v9547_v4  ;;  %2964 = vmatpush1.bf16.msra.mxu0 %v8259_v44  ;;  %3129 = vmatprep.subr.bf16.mxu1 %v8270_v49  ;;  %v8282_v2 = vld [vmem:[#allocation4 + $0x18c] ss:$16 sps:$4 sm:$0xff]   ;;  %v8277_v3 = vld [vmem:[#allocation4 + $0x180] ss:$16 sps:$4 sm:$0xff]   ;;  %v8280_v5 = vld [vmem:[#allocation4 + $0x188] ss:$16 sps:$4 sm:$0xff]  }
 0x22a   :  { %2965 = vmatprep.subr.bf16.mxu0 %v8267_v46 }
 0x22b   :  { %v1240_v21 = vadd.f32 %v1239_v9, %v1233_v10  ;;  %v8286_v9 = vld [vmem:[#allocation4 + $0x1a8] ss:$16 sps:$4 sm:$0xff]   ;;  %v8291_v10 = vld [vmem:[#allocation4 + $0x1c4] ss:$16 sps:$4 sm:$0xff]  }
 0x22c   :  { %3130 = vmatpush1.bf16.msra.mxu1 %v8268_v51 }
 0x22d   :  { %2966 = vmatpush1.bf16.msra.mxu0 %v8265_v50  ;;  %3131 = vmatprep.subr.bf16.mxu1 %v8276_v58 }
 0x22e   :  { %2967 = vmatprep.subr.bf16.mxu0 %v8273_v55 }
 0x230   :  { %3132 = vmatpush1.bf16.msra.mxu1 %v8274_v61 }
 0x231   :  { %2968 = vmatpush1.bf16.msra.mxu0 %v8271_v59  ;;  %3133 = vmatprep.subr.bf16.mxu1 %v8282_v2 }
 0x232   :  { %2969 = vmatprep.subr.bf16.mxu0 %v8279_v62 }
 0x234   :  { %3134 = vmatpush1.bf16.msra.mxu1 %v8280_v5 }
 0x235   :  { %2970 = vmatpush1.bf16.msra.mxu0 %v8277_v3 }
 0x261   :  { %v1171_v12 = vpop.f32.mrb[4].mxu0  ;;  %v1212_v17 = vpop.f32.mrb[4].mxu1 }
 0x262   :  { %v9558_v15 = vadd.f32 %v1171_v12, %v394_v6  ;;  %v1173_v16 = vpop.f32.mrb[5].mxu0  ;;  %v9562_v18 = vadd.f32 %v1212_v17, %v402_v8  ;;  %v1214_v20 = vpop.f32.mrb[5].mxu1  ;;  %v8285_v6 = vld [vmem:[#allocation4 + $0x1a4] ss:$16 sps:$4 sm:$0xff]   ;;  %v8283_v8 = vld [vmem:[#allocation4 + $0x1a0] ss:$16 sps:$4 sm:$0xff]  }
 0x263   :  { %v9560_v14 = vadd.f32 %v1173_v16, %v398_v7  ;;  %v1175_v19 = vpop.f32.mrb[6].mxu0  ;;  %v1216_v26 = vpop.f32.mrb[6].mxu1  ;;  %v9573_v32 = vadd.f32 %v1214_v20, %v406_v24  ;;  %v8288_v7 = vld [vmem:[#allocation4 + $0x1ac] ss:$16 sps:$4 sm:$0xff]   ;;  %2971 = vmatprep.subr.bf16.mxu0 %v8285_v6  ;;  %v8292_v16 = vld [vmem:[#allocation4 + $0x1c8] ss:$16 sps:$4 sm:$0xff]  }
 0x264   :  { %v1222_v22 = vadd.f32 %v1221_v13, %v9558_v15  ;;  %v1234_v23 = vmul.f32 %v9558_v15, %v9558_v15  ;;  %v1176_v25 = vpop.f32.mrb[7].mxu0  ;;  %v1217_v28 = vpop.f32.mrb[7].mxu1  ;;  %v1236_v30 = vmul.f32 %v9562_v18, %v9562_v18  ;;  %3135 = vmatprep.subr.bf16.mxu1 %v8288_v7  ;;  %v8294_v12 = vld [vmem:[#allocation4 + $0x1cc] ss:$16 sps:$4 sm:$0xff]   ;;  %2972 = vmatpush1.bf16.msra.mxu0 %v8283_v8  ;;  %v8289_v13 = vld [vmem:[#allocation4 + $0x1c0] ss:$16 sps:$4 sm:$0xff]  }
 0x265   :  { %v1235_v27 = vmul.f32 %v9560_v14, %v9560_v14  ;;  %v1237_v37 = vmul.f32 %v9573_v32, %v9573_v32  ;;  %3136 = vmatpush1.bf16.msra.mxu1 %v8286_v9  ;;  %2973 = vmatprep.subr.bf16.mxu0 %v8291_v10  ;;  %v8297_v17 = vld [vmem:[#allocation4 + $0x1e4] ss:$16 sps:$4 sm:$0xff]   ;;  %v8300_v19 = vld [vmem:[#allocation4 + $0x1ec] ss:$16 sps:$4 sm:$0xff]   ;;  %v8295_v20 = vld [vmem:[#allocation4 + $0x1e0] ss:$16 sps:$4 sm:$0xff]  }
 0x266   :  { %v1241_v29 = vadd.f32 %v1240_v21, %v1234_v23  ;;  %v1223_v31 = vadd.f32 %v1222_v22, %v9560_v14  ;;  %3137 = vmatprep.subr.bf16.mxu1 %v8294_v12  ;;  %v8298_v21 = vld [vmem:[#allocation4 + $0x1e8] ss:$16 sps:$4 sm:$0xff]   ;;  %v8303_v22 = vld [vmem:[#allocation4 + $0x204] ss:$16 sps:$4 sm:$0xff]   ;;  %v8306_v23 = vld [vmem:[#allocation4 + $0x20c] ss:$16 sps:$4 sm:$0xff]  }
 0x268   :  { %v1224_v33 = vadd.f32 %v1223_v31, %v9562_v18  ;;  %v1242_v34 = vadd.f32 %v1241_v29, %v1235_v27  ;;  %2974 = vmatpush1.bf16.msra.mxu0 %v8289_v13 }
 0x269   :  { %3138 = vmatpush1.bf16.msra.mxu1 %v8292_v16  ;;  %2975 = vmatprep.subr.bf16.mxu0 %v8297_v17 }
 0x26a   :  { %v1225_v35 = vadd.f32 %v1224_v33, %v9573_v32  ;;  %v1243_v36 = vadd.f32 %v1242_v34, %v1236_v30  ;;  %3139 = vmatprep.subr.bf16.mxu1 %v8300_v19  ;;  %v7343_v33 = vld [vmem:[%s9971_s29 + $0x1] ss:$4 sm:$0xff]  ;;  %v7344_v34 = vld [vmem:[%s9971_s29 + $0x2] ss:$4 sm:$0xff] }
 0x26b   :  { %v1330_v39 = vrot.slane %v7344_v34, %v9514_v48  ;;  %v1326_v40 = vrot.slane %v7344_v34, %v9512_v47  ;;  %v1295_v41 = vrot.slane %v7343_v33, %v9541_v0  ;;  %v1291_v42 = vrot.slane %v7343_v33, %v9539_v63 }
 0x26c   :  { %1226 = vadd.xlane.f32.xlu0 %v1225_v35  ;;  %v1244_v38 = vadd.f32 %v1243_v36, %v1237_v37  ;;  %2976 = vmatpush1.bf16.msra.mxu0 %v8295_v20  ;;  %v1279_v35 = vrot.slane %v7343_v33, %v9514_v48  ;;  %v1275_v36 = vrot.slane %v7343_v33, %v9512_v47 }
 0x26d   :  { %3140 = vmatpush1.bf16.msra.mxu1 %v8298_v21  ;;  %2986 = vmatprep.subr.bf16.mxu0 %v8303_v22  ;;  %v1287_v37 = vrot.slane %v7343_v33, %v9528_v56  ;;  %v1338_v57 = vrot.slane %v7344_v34, %v9528_v56  ;;  %v1334_v43 = vrot.slane %v7344_v34, %v9521_v52 }
 0x26e   :  { %3150 = vmatprep.subr.bf16.mxu1 %v8306_v23  ;;  %v1346_v44 = vrot.slane %v7344_v34, %v9541_v0  ;;  %v1303_v45 = vrot.slane %v7343_v33, %v9555_v11  ;;  %v1342_v46 = vrot.slane %v7344_v34, %v9539_v63  ;;  %v1354_v49 = vrot.slane %v7344_v34, %v9555_v11 }
 0x26f   :  { %v1299_v50 = vrot.slane %v7343_v33, %v9543_v1  ;;  %v1350_v51 = vrot.slane %v7344_v34, %v9543_v1 }
 0x270   :  { %1245 = vadd.xlane.f32.xlu0 %v1244_v38  ;;  %v1283_v38 = vrot.slane %v7343_v33, %v9521_v52  ;;  %v8304_v33 = vld [vmem:[#allocation4 + $0x208] ss:$16 sps:$4 sm:$0xff]  }
 0x2f9   :  { %v1227_v24 = vpop.xlane.xlu0 %1226 }
 0x2fa   :  { %v1229_v25 = vmul.f32 0.0009765625, %v1227_v24 }
 0x2fc   :  { %v1248_v27 = vmul.f32 %v1229_v25, %v1229_v25  ;;  %v1254_v55 = vsub.f32 %v9525_v54, %v1229_v25  ;;  %v1253_v58 = vsub.f32 %v9523_v53, %v1229_v25  ;;  %v1256_v59 = vsub.f32 %v9547_v4, %v1229_v25 }
 0x2fd   :  { %v1246_v26 = vpop.xlane.xlu0 %1245  ;;  %v1255_v61 = vsub.f32 %v9534_v60, %v1229_v25  ;;  %v1258_v2 = vsub.f32 %v9560_v14, %v1229_v25  ;;  %v1257_v3 = vsub.f32 %v9558_v15, %v1229_v25  ;;  %v1260_v5 = vsub.f32 %v9573_v32, %v1229_v25 }
 0x2fe   :  { %v1247_v28 = vmul.f32 0.0009765625, %v1246_v26  ;;  %v1259_v6 = vsub.f32 %v9562_v18, %v1229_v25 }
 0x300   :  { %v1249_v29 = vsub.f32 %v1247_v28, %v1248_v27 }
 0x302   :  { %v1250_v30 = vmax.f32 %v1249_v29, 0.0 }
 0x304   :  { %v1251_v31 = vadd.f32 1e-05, %v1250_v30 }
 0x306   :  { %8837 = vrsqrt.f32 %v1251_v31  ;;  %v8301_v31 = vld [vmem:[#allocation4 + $0x200] ss:$16 sps:$4 sm:$0xff]  }
 0x310   :  { %v8838_v62 = vpop.eup %8837 }
 0x311   :  { %v1262_v7 = vmul.f32 %v8838_v62, %v1254_v55  ;;  %v1261_v8 = vmul.f32 %v8838_v62, %v1253_v58  ;;  %v1264_v9 = vmul.f32 %v8838_v62, %v1256_v59  ;;  %v1263_v10 = vmul.f32 %v8838_v62, %v1255_v61  ;;  %v8328_v55 = vld [vmem:[#allocation4 + $0x288] ss:$16 sps:$4 sm:$0xff]   ;;  %v8333_v58 = vld [vmem:[#allocation4 + $0x2a4] ss:$16 sps:$4 sm:$0xff]   ;;  %v8336_v59 = vld [vmem:[#allocation4 + $0x2ac] ss:$16 sps:$4 sm:$0xff]  }
 0x312   :  { %v1266_v54 = vmul.f32 %v8838_v62, %v1258_v2  ;;  %v1265_v12 = vmul.f32 %v8838_v62, %v1257_v3  ;;  %v1268_v53 = vmul.f32 %v8838_v62, %v1260_v5  ;;  %v1267_v13 = vmul.f32 %v8838_v62, %v1259_v6  ;;  %v8331_v61 = vld [vmem:[#allocation4 + $0x2a0] ss:$16 sps:$4 sm:$0xff]   ;;  %v8334_v62 = vld [vmem:[#allocation4 + $0x2a8] ss:$16 sps:$4 sm:$0xff]   ;;  %v8339_v2 = vld [vmem:[#allocation4 + $0x2c4] ss:$16 sps:$4 sm:$0xff]  }
 0x313   :  { %v1313_v4 = vmul.f32 %v1279_v35, %v1262_v7  ;;  %v1312_v16 = vmul.f32 %v1275_v36, %v1261_v8  ;;  %v1315_v60 = vmul.f32 %v1287_v37, %v1264_v9  ;;  %v1314_v17 = vmul.f32 %v1283_v38, %v1263_v10  ;;  %v8309_v35 = vld [vmem:[#allocation4 + $0x224] ss:$16 sps:$4 sm:$0xff]   ;;  %v8312_v36 = vld [vmem:[#allocation4 + $0x22c] ss:$16 sps:$4 sm:$0xff]   ;;  %v8307_v38 = vld [vmem:[#allocation4 + $0x220] ss:$16 sps:$4 sm:$0xff]  }
 0x314   :  { %v1317_v19 = vmul.f32 %v1295_v41, %v1266_v54  ;;  %v1316_v14 = vmul.f32 %v1291_v42, %v1265_v12  ;;  %v1319_v20 = vmul.f32 %v1303_v45, %v1268_v53  ;;  %v1318_v15 = vmul.f32 %v1299_v50, %v1267_v13  ;;  %v8318_v41 = vld [vmem:[#allocation4 + $0x24c] ss:$16 sps:$4 sm:$0xff]   ;;  %v8313_v42 = vld [vmem:[#allocation4 + $0x240] ss:$16 sps:$4 sm:$0xff]   ;;  %v8340_v6 = vld [vmem:[#allocation4 + $0x2c8] ss:$16 sps:$4 sm:$0xff]  }
 0x315   :  { %v1364_v21 = vadd.f32 %v1330_v39, %v1313_v4  ;;  %v1363_v32 = vadd.f32 %v1326_v40, %v1312_v16  ;;  %v1366_v22 = vadd.f32 %v1338_v57, %v1315_v60  ;;  %v9609_v18 = vadd.f32 %v1334_v43, %v1314_v17  ;;  %v8310_v39 = vld [vmem:[#allocation4 + $0x228] ss:$16 sps:$4 sm:$0xff]   ;;  %v8315_v40 = vld [vmem:[#allocation4 + $0x244] ss:$16 sps:$4 sm:$0xff]   ;;  %v8319_v45 = vld [vmem:[#allocation4 + $0x260] ss:$16 sps:$4 sm:$0xff]  }
 0x316   :  { %v9611_v23 = vadd.f32 %v1346_v44, %v1317_v19  ;;  %v9613_v24 = vadd.f32 %v1342_v46, %v1316_v14  ;;  %v9615_v25 = vadd.f32 %v1354_v49, %v1319_v20  ;;  %v9617_v26 = vadd.f32 %v1350_v51, %v1318_v15  ;;  %v8316_v57 = vld [vmem:[#allocation4 + $0x248] ss:$16 sps:$4 sm:$0xff]   ;;  %v8321_v43 = vld [vmem:[#allocation4 + $0x264] ss:$16 sps:$4 sm:$0xff]   ;;  %v8324_v44 = vld [vmem:[#allocation4 + $0x26c] ss:$16 sps:$4 sm:$0xff]  }
 0x317   :  { %v1372_v27 = vmax.f32 %v1364_v21, 0.0  ;;  %v1371_v28 = vmax.f32 %v1363_v32, 0.0  ;;  %v1374_v29 = vmax.f32 %v1366_v22, 0.0  ;;  %v8322_v46 = vld [vmem:[#allocation4 + $0x268] ss:$16 sps:$4 sm:$0xff]  }
 0x318   :  { %v8327_v49 = vld [vmem:[#allocation4 + $0x284] ss:$16 sps:$4 sm:$0xff]   ;;  %v8330_v50 = vld [vmem:[#allocation4 + $0x28c] ss:$16 sps:$4 sm:$0xff]   ;;  %v8325_v51 = vld [vmem:[#allocation4 + $0x280] ss:$16 sps:$4 sm:$0xff]  }
 0x319   :  { %v1380_v30 = vpack.c.bf16 %v1372_v27, %v1372_v27  ;;  %v1379_v34 = vpack.c.bf16 %v1371_v28, %v1371_v28  ;;  %v1382_v37 = vpack.c.bf16 %v1374_v29, %v1374_v29  ;;  %v8342_v3 = vld [vmem:[#allocation4 + $0x2cc] ss:$16 sps:$4 sm:$0xff]   ;;  %v8337_v5 = vld [vmem:[#allocation4 + $0x2c0] ss:$16 sps:$4 sm:$0xff]   ;;  %v8345_v7 = vld [vmem:[#allocation4 + $0x2e4] ss:$16 sps:$4 sm:$0xff]  }
 0x31a   :  { %v8348_v8 = vld [vmem:[#allocation4 + $0x2ec] ss:$16 sps:$4 sm:$0xff]   ;;  %v8343_v9 = vld [vmem:[#allocation4 + $0x2e0] ss:$16 sps:$4 sm:$0xff]   ;;  %v8346_v10 = vld [vmem:[#allocation4 + $0x2e8] ss:$16 sps:$4 sm:$0xff]  }
 0x31b   :  { %2977 = vmatprep.mubr.bf16.mxu0 %v1380_v30  ;;  %3141 = vmatprep.mubr.bf16.mxu1 %v1380_v30  ;;  %v8351_v54 = vld [vmem:[#allocation4 + $0x304] ss:$16 sps:$4 sm:$0xff]   ;;  %v8354_v12 = vld [vmem:[#allocation4 + $0x30c] ss:$16 sps:$4 sm:$0xff]   ;;  %v8349_v53 = vld [vmem:[#allocation4 + $0x300] ss:$16 sps:$4 sm:$0xff]  }
 0x31c   :  { %2978 = vmatmul.mubr.bf16.vlgmr.msra.gmra.mrb[8].mxu0 %v1379_v34  ;;  %3142 = vmatmul.mubr.bf16.vlgmr.msra.gmra.mrb[8].mxu1 %v1379_v34  ;;  %v8352_v13 = vld [vmem:[#allocation4 + $0x308] ss:$16 sps:$4 sm:$0xff]   ;;  %v8357_v4 = vld [vmem:[#allocation4 + $0x324] ss:$16 sps:$4 sm:$0xff]   ;;  %v8360_v16 = vld [vmem:[#allocation4 + $0x32c] ss:$16 sps:$4 sm:$0xff]  }
 0x31d   :  { %2987 = vmatpush1.bf16.msra.mxu0 %v8301_v31  ;;  %3151 = vmatpush1.bf16.msra.mxu1 %v8304_v33  ;;  %v8355_v60 = vld [vmem:[#allocation4 + $0x320] ss:$16 sps:$4 sm:$0xff]   ;;  %v8358_v17 = vld [vmem:[#allocation4 + $0x328] ss:$16 sps:$4 sm:$0xff]   ;;  %v8363_v19 = vld [vmem:[#allocation4 + $0x344] ss:$16 sps:$4 sm:$0xff]  }
 0x31e   :  { %3018 = vmatprep.mubr.bf16.mxu0 %v1382_v37  ;;  %3182 = vmatprep.mubr.bf16.mxu1 %v1382_v37  ;;  %v8366_v14 = vld [vmem:[#allocation4 + $0x34c] ss:$16 sps:$4 sm:$0xff]   ;;  %v8361_v20 = vld [vmem:[#allocation4 + $0x340] ss:$16 sps:$4 sm:$0xff]   ;;  %v8364_v15 = vld [vmem:[#allocation4 + $0x348] ss:$16 sps:$4 sm:$0xff]  }
 0x31f   :  { %2988 = vmatprep.subr.bf16.mxu0 %v8309_v35  ;;  %3152 = vmatprep.subr.bf16.mxu1 %v8312_v36  ;;  %v8369_v21 = vld [vmem:[#allocation4 + $0x364] ss:$16 sps:$4 sm:$0xff]   ;;  %v8372_v32 = vld [vmem:[#allocation4 + $0x36c] ss:$16 sps:$4 sm:$0xff]   ;;  %v8367_v22 = vld [vmem:[#allocation4 + $0x360] ss:$16 sps:$4 sm:$0xff]  }
 0x320   :  { %v8370_v27 = vld [vmem:[#allocation4 + $0x368] ss:$16 sps:$4 sm:$0xff]   ;;  %v8375_v28 = vld [vmem:[#allocation4 + $0x384] ss:$16 sps:$4 sm:$0xff]   ;;  %v8378_v29 = vld [vmem:[#allocation4 + $0x38c] ss:$16 sps:$4 sm:$0xff]  }
 0x321   :  { %2989 = vmatpush1.bf16.msra.mxu0 %v8307_v38  ;;  %3153 = vmatpush1.bf16.msra.mxu1 %v8310_v39  ;;  %v8373_v30 = vld [vmem:[#allocation4 + $0x380] ss:$16 sps:$4 sm:$0xff]   ;;  %v8376_v31 = vld [vmem:[#allocation4 + $0x388] ss:$16 sps:$4 sm:$0xff]   ;;  %v8381_v33 = vld [vmem:[#allocation4 + $0x3a4] ss:$16 sps:$4 sm:$0xff]  }
 0x322   :  { %2990 = vmatprep.subr.bf16.mxu0 %v8315_v40  ;;  %3154 = vmatprep.subr.bf16.mxu1 %v8318_v41  ;;  %v8384_v34 = vld [vmem:[#allocation4 + $0x3ac] ss:$16 sps:$4 sm:$0xff]   ;;  %v8379_v35 = vld [vmem:[#allocation4 + $0x3a0] ss:$16 sps:$4 sm:$0xff]   ;;  %v8382_v36 = vld [vmem:[#allocation4 + $0x3a8] ss:$16 sps:$4 sm:$0xff]  }
 0x323   :  { %v8387_v37 = vld [vmem:[#allocation4 + $0x3c4] ss:$16 sps:$4 sm:$0xff]   ;;  %v8390_v38 = vld [vmem:[#allocation4 + $0x3cc] ss:$16 sps:$4 sm:$0xff]   ;;  %v8385_v39 = vld [vmem:[#allocation4 + $0x3c0] ss:$16 sps:$4 sm:$0xff]  }
 0x324   :  { %v8388_v40 = vld [vmem:[#allocation4 + $0x3c8] ss:$16 sps:$4 sm:$0xff]   ;;  %v8393_v41 = vld [vmem:[#allocation4 + $0x3e4] ss:$16 sps:$4 sm:$0xff]  }
 0x325   :  { %2991 = vmatpush1.bf16.msra.mxu0 %v8313_v42  ;;  %3155 = vmatpush1.bf16.msra.mxu1 %v8316_v57  ;;  %v8396_v42 = vld [vmem:[#allocation4 + $0x3ec] ss:$16 sps:$4 sm:$0xff]   ;;  %v8391_v57 = vld [vmem:[#allocation4 + $0x3e0] ss:$16 sps:$4 sm:$0xff]  }
 0x326   :  { %2992 = vmatprep.subr.bf16.mxu0 %v8321_v43  ;;  %3156 = vmatprep.subr.bf16.mxu1 %v8324_v44  ;;  %v8394_v43 = vld [vmem:[#allocation4 + $0x3e8] ss:$16 sps:$4 sm:$0xff]   ;;  %v1373_v44 = vmax.f32 %v9609_v18, 0.0 }
 0x327   :  { %v8406_v18 = vld [vmem:[#allocation4 + $0x428] ss:$16 sps:$4 sm:$0xff]  }
 0x329   :  { %2993 = vmatpush1.bf16.msra.mxu0 %v8319_v45  ;;  %3157 = vmatpush1.bf16.msra.mxu1 %v8322_v46  ;;  %v8399_v45 = vld [vmem:[#allocation4 + $0x404] ss:$16 sps:$4 sm:$0xff]   ;;  %v8402_v46 = vld [vmem:[#allocation4 + $0x40c] ss:$16 sps:$4 sm:$0xff]  }
 0x32a   :  { %2994 = vmatprep.subr.bf16.mxu0 %v8327_v49  ;;  %3158 = vmatprep.subr.bf16.mxu1 %v8330_v50  ;;  %v1376_v49 = vmax.f32 %v9611_v23, 0.0  ;;  %v8397_v50 = vld [vmem:[#allocation4 + $0x400] ss:$16 sps:$4 sm:$0xff]   ;;  %v8414_v23 = vld [vmem:[#allocation4 + $0x44c] ss:$16 sps:$4 sm:$0xff]  }
 0x32d   :  { %2995 = vmatpush1.bf16.msra.mxu0 %v8325_v51  ;;  %3159 = vmatpush1.bf16.msra.mxu1 %v8328_v55  ;;  %v1381_v51 = vpack.c.bf16 %v1373_v44, %v1373_v44  ;;  %v8400_v55 = vld [vmem:[#allocation4 + $0x408] ss:$16 sps:$4 sm:$0xff]   ;;  %v8474_v44 = vld [vmem:[#allocation4 + $0x58c] ss:$16 sps:$4 sm:$0xff]  }
 0x32e   :  { %2996 = vmatprep.subr.bf16.mxu0 %v8333_v58  ;;  %3160 = vmatprep.subr.bf16.mxu1 %v8336_v59  ;;  %v1384_v58 = vpack.c.bf16 %v1376_v49, %v1376_v49  ;;  %v8405_v59 = vld [vmem:[#allocation4 + $0x424] ss:$16 sps:$4 sm:$0xff]  }
 0x32f   :  { %v8477_v49 = vld [vmem:[#allocation4 + $0x5a4] ss:$16 sps:$4 sm:$0xff]  }
 0x331   :  { %2997 = vmatpush1.bf16.msra.mxu0 %v8331_v61  ;;  %3161 = vmatpush1.bf16.msra.mxu1 %v8334_v62  ;;  %v8408_v61 = vld [vmem:[#allocation4 + $0x42c] ss:$16 sps:$4 sm:$0xff]   ;;  %v8403_v62 = vld [vmem:[#allocation4 + $0x420] ss:$16 sps:$4 sm:$0xff]  }
 0x332   :  { %2998 = vmatprep.subr.bf16.mxu0 %v8339_v2  ;;  %3162 = vmatprep.subr.bf16.mxu1 %v8342_v3  ;;  %v8411_v2 = vld [vmem:[#allocation4 + $0x444] ss:$16 sps:$4 sm:$0xff]   ;;  %v8409_v3 = vld [vmem:[#allocation4 + $0x440] ss:$16 sps:$4 sm:$0xff]  }
 0x335   :  { %2999 = vmatpush1.bf16.msra.mxu0 %v8337_v5  ;;  %3163 = vmatpush1.bf16.msra.mxu1 %v8340_v6  ;;  %v8412_v5 = vld [vmem:[#allocation4 + $0x448] ss:$16 sps:$4 sm:$0xff]   ;;  %v8417_v6 = vld [vmem:[#allocation4 + $0x464] ss:$16 sps:$4 sm:$0xff]  }
 0x336   :  { %3000 = vmatprep.subr.bf16.mxu0 %v8345_v7  ;;  %3164 = vmatprep.subr.bf16.mxu1 %v8348_v8  ;;  %v8420_v7 = vld [vmem:[#allocation4 + $0x46c] ss:$16 sps:$4 sm:$0xff]   ;;  %v8415_v8 = vld [vmem:[#allocation4 + $0x460] ss:$16 sps:$4 sm:$0xff]  }
 0x339   :  { %3001 = vmatpush1.bf16.msra.mxu0 %v8343_v9  ;;  %3165 = vmatpush1.bf16.msra.mxu1 %v8346_v10  ;;  %v8418_v9 = vld [vmem:[#allocation4 + $0x468] ss:$16 sps:$4 sm:$0xff]   ;;  %v8423_v10 = vld [vmem:[#allocation4 + $0x484] ss:$16 sps:$4 sm:$0xff]  }
 0x33a   :  { %3002 = vmatprep.subr.bf16.mxu0 %v8351_v54  ;;  %3166 = vmatprep.subr.bf16.mxu1 %v8354_v12  ;;  %v8426_v54 = vld [vmem:[#allocation4 + $0x48c] ss:$16 sps:$4 sm:$0xff]   ;;  %v8421_v12 = vld [vmem:[#allocation4 + $0x480] ss:$16 sps:$4 sm:$0xff]  }
 0x33d   :  { %3003 = vmatpush1.bf16.msra.mxu0 %v8349_v53  ;;  %3167 = vmatpush1.bf16.msra.mxu1 %v8352_v13  ;;  %v8424_v53 = vld [vmem:[#allocation4 + $0x488] ss:$16 sps:$4 sm:$0xff]   ;;  %v8429_v13 = vld [vmem:[#allocation4 + $0x4a4] ss:$16 sps:$4 sm:$0xff]  }
 0x33e   :  { %3004 = vmatprep.subr.bf16.mxu0 %v8357_v4  ;;  %3168 = vmatprep.subr.bf16.mxu1 %v8360_v16  ;;  %v8432_v4 = vld [vmem:[#allocation4 + $0x4ac] ss:$16 sps:$4 sm:$0xff]   ;;  %v8427_v16 = vld [vmem:[#allocation4 + $0x4a0] ss:$16 sps:$4 sm:$0xff]  }
 0x341   :  { %3005 = vmatpush1.bf16.msra.mxu0 %v8355_v60  ;;  %3169 = vmatpush1.bf16.msra.mxu1 %v8358_v17  ;;  %v8430_v60 = vld [vmem:[#allocation4 + $0x4a8] ss:$16 sps:$4 sm:$0xff]   ;;  %v8435_v17 = vld [vmem:[#allocation4 + $0x4c4] ss:$16 sps:$4 sm:$0xff]  }
 0x342   :  { %3006 = vmatprep.subr.bf16.mxu0 %v8363_v19  ;;  %3170 = vmatprep.subr.bf16.mxu1 %v8366_v14  ;;  %v8438_v19 = vld [vmem:[#allocation4 + $0x4cc] ss:$16 sps:$4 sm:$0xff]   ;;  %v8433_v14 = vld [vmem:[#allocation4 + $0x4c0] ss:$16 sps:$4 sm:$0xff]  }
 0x345   :  { %3007 = vmatpush1.bf16.msra.mxu0 %v8361_v20  ;;  %3171 = vmatpush1.bf16.msra.mxu1 %v8364_v15  ;;  %v8436_v20 = vld [vmem:[#allocation4 + $0x4c8] ss:$16 sps:$4 sm:$0xff]   ;;  %v8441_v15 = vld [vmem:[#allocation4 + $0x4e4] ss:$16 sps:$4 sm:$0xff]  }
 0x346   :  { %3008 = vmatprep.subr.bf16.mxu0 %v8369_v21  ;;  %3172 = vmatprep.subr.bf16.mxu1 %v8372_v32  ;;  %v8444_v21 = vld [vmem:[#allocation4 + $0x4ec] ss:$16 sps:$4 sm:$0xff]   ;;  %v8439_v32 = vld [vmem:[#allocation4 + $0x4e0] ss:$16 sps:$4 sm:$0xff]  }
 0x349   :  { %3009 = vmatpush1.bf16.msra.mxu0 %v8367_v22  ;;  %3173 = vmatpush1.bf16.msra.mxu1 %v8370_v27  ;;  %v8442_v22 = vld [vmem:[#allocation4 + $0x4e8] ss:$16 sps:$4 sm:$0xff]   ;;  %v8447_v27 = vld [vmem:[#allocation4 + $0x504] ss:$16 sps:$4 sm:$0xff]  }
 0x34a   :  { %3010 = vmatprep.subr.bf16.mxu0 %v8375_v28  ;;  %3174 = vmatprep.subr.bf16.mxu1 %v8378_v29  ;;  %v8450_v28 = vld [vmem:[#allocation4 + $0x50c] ss:$16 sps:$4 sm:$0xff]   ;;  %v8445_v29 = vld [vmem:[#allocation4 + $0x500] ss:$16 sps:$4 sm:$0xff]  }
 0x34d   :  { %3011 = vmatpush1.bf16.msra.mxu0 %v8373_v30  ;;  %3175 = vmatpush1.bf16.msra.mxu1 %v8376_v31  ;;  %v8448_v30 = vld [vmem:[#allocation4 + $0x508] ss:$16 sps:$4 sm:$0xff]   ;;  %v8453_v31 = vld [vmem:[#allocation4 + $0x524] ss:$16 sps:$4 sm:$0xff]  }
 0x34e   :  { %3012 = vmatprep.subr.bf16.mxu0 %v8381_v33  ;;  %3176 = vmatprep.subr.bf16.mxu1 %v8384_v34  ;;  %v8456_v33 = vld [vmem:[#allocation4 + $0x52c] ss:$16 sps:$4 sm:$0xff]   ;;  %v8451_v34 = vld [vmem:[#allocation4 + $0x520] ss:$16 sps:$4 sm:$0xff]  }
 0x351   :  { %3013 = vmatpush1.bf16.msra.mxu0 %v8379_v35  ;;  %3177 = vmatpush1.bf16.msra.mxu1 %v8382_v36  ;;  %v8454_v35 = vld [vmem:[#allocation4 + $0x528] ss:$16 sps:$4 sm:$0xff]   ;;  %v8459_v36 = vld [vmem:[#allocation4 + $0x544] ss:$16 sps:$4 sm:$0xff]  }
 0x352   :  { %3014 = vmatprep.subr.bf16.mxu0 %v8387_v37  ;;  %3178 = vmatprep.subr.bf16.mxu1 %v8390_v38  ;;  %v8462_v37 = vld [vmem:[#allocation4 + $0x54c] ss:$16 sps:$4 sm:$0xff]   ;;  %v8457_v38 = vld [vmem:[#allocation4 + $0x540] ss:$16 sps:$4 sm:$0xff]  }
 0x355   :  { %3015 = vmatpush1.bf16.msra.mxu0 %v8385_v39  ;;  %3179 = vmatpush1.bf16.msra.mxu1 %v8388_v40  ;;  %v8460_v39 = vld [vmem:[#allocation4 + $0x548] ss:$16 sps:$4 sm:$0xff]   ;;  %v8465_v40 = vld [vmem:[#allocation4 + $0x564] ss:$16 sps:$4 sm:$0xff]  }
 0x356   :  { %3016 = vmatprep.subr.bf16.mxu0 %v8393_v41  ;;  %3180 = vmatprep.subr.bf16.mxu1 %v8396_v42  ;;  %v8468_v41 = vld [vmem:[#allocation4 + $0x56c] ss:$16 sps:$4 sm:$0xff]   ;;  %v8463_v42 = vld [vmem:[#allocation4 + $0x560] ss:$16 sps:$4 sm:$0xff]  }
 0x359   :  { %3017 = vmatpush1.bf16.msra.mxu0 %v8391_v57  ;;  %3181 = vmatpush1.bf16.msra.mxu1 %v8394_v43  ;;  %v8466_v57 = vld [vmem:[#allocation4 + $0x568] ss:$16 sps:$4 sm:$0xff]   ;;  %v8471_v43 = vld [vmem:[#allocation4 + $0x584] ss:$16 sps:$4 sm:$0xff]  }
 0x35a   :  { %3027 = vmatprep.subr.bf16.mxu0 %v8399_v45  ;;  %3191 = vmatprep.subr.bf16.mxu1 %v8402_v46  ;;  %v8469_v45 = vld [vmem:[#allocation4 + $0x580] ss:$16 sps:$4 sm:$0xff]   ;;  %v8472_v46 = vld [vmem:[#allocation4 + $0x588] ss:$16 sps:$4 sm:$0xff]  }
 0x35c   :  { %3019 = vmatmul.mubr.bf16.vlgmr.msra.gmra.mrb[8].mxu0 %v1381_v51  ;;  %3183 = vmatmul.mubr.bf16.vlgmr.msra.gmra.mrb[8].mxu1 %v1381_v51  ;;  %v8475_v51 = vld [vmem:[#allocation4 + $0x5a0] ss:$16 sps:$4 sm:$0xff]  }
 0x35d   :  { %3028 = vmatpush1.bf16.msra.mxu0 %v8397_v50  ;;  %3059 = vmatprep.mubr.bf16.mxu0 %v1384_v58  ;;  %v8480_v50 = vld [vmem:[#allocation4 + $0x5ac] ss:$16 sps:$4 sm:$0xff]  }
 0x35e   :  { %3192 = vmatpush1.bf16.msra.mxu1 %v8400_v55  ;;  %3223 = vmatprep.mubr.bf16.mxu1 %v1384_v58  ;;  %v8478_v55 = vld [vmem:[#allocation4 + $0x5a8] ss:$16 sps:$4 sm:$0xff]   ;;  %v8483_v58 = vld [vmem:[#allocation4 + $0x5c4] ss:$16 sps:$4 sm:$0xff]  }
 0x35f   :  { %3029 = vmatprep.subr.bf16.mxu0 %v8405_v59  ;;  %3193 = vmatprep.subr.bf16.mxu1 %v8408_v61  ;;  %v8486_v59 = vld [vmem:[#allocation4 + $0x5cc] ss:$16 sps:$4 sm:$0xff]   ;;  %v8481_v61 = vld [vmem:[#allocation4 + $0x5c0] ss:$16 sps:$4 sm:$0xff]  }
 0x361   :  { %3030 = vmatpush1.bf16.msra.mxu0 %v8403_v62  ;;  %v8484_v62 = vld [vmem:[#allocation4 + $0x5c8] ss:$16 sps:$4 sm:$0xff]  }
 0x362   :  { %3194 = vmatpush1.bf16.msra.mxu1 %v8406_v18  ;;  %3031 = vmatprep.subr.bf16.mxu0 %v8411_v2  ;;  %v8489_v18 = vld [vmem:[#allocation4 + $0x5e4] ss:$16 sps:$4 sm:$0xff]   ;;  %v8492_v2 = vld [vmem:[#allocation4 + $0x5ec] ss:$16 sps:$4 sm:$0xff]  }
 0x363   :  { %3195 = vmatprep.subr.bf16.mxu1 %v8414_v23  ;;  %v8487_v23 = vld [vmem:[#allocation4 + $0x5e0] ss:$16 sps:$4 sm:$0xff]  }
 0x365   :  { %3032 = vmatpush1.bf16.msra.mxu0 %v8409_v3  ;;  %v8490_v3 = vld [vmem:[#allocation4 + $0x5e8] ss:$16 sps:$4 sm:$0xff]  }
 0x366   :  { %3196 = vmatpush1.bf16.msra.mxu1 %v8412_v5  ;;  %3033 = vmatprep.subr.bf16.mxu0 %v8417_v6  ;;  %v1375_v5 = vmax.f32 %v9613_v24, 0.0  ;;  %v8495_v6 = vld [vmem:[#allocation4 + $0x604] ss:$16 sps:$4 sm:$0xff]   ;;  %v8502_v24 = vld [vmem:[#allocation4 + $0x628] ss:$16 sps:$4 sm:$0xff]  }
 0x367   :  { %3197 = vmatprep.subr.bf16.mxu1 %v8420_v7  ;;  %v8498_v7 = vld [vmem:[#allocation4 + $0x60c] ss:$16 sps:$4 sm:$0xff]  }
 0x369   :  { %3034 = vmatpush1.bf16.msra.mxu0 %v8415_v8  ;;  %v1378_v8 = vmax.f32 %v9615_v25, 0.0  ;;  %v8510_v25 = vld [vmem:[#allocation4 + $0x64c] ss:$16 sps:$4 sm:$0xff]  }
 0x36a   :  { %3198 = vmatpush1.bf16.msra.mxu1 %v8418_v9  ;;  %3035 = vmatprep.subr.bf16.mxu0 %v8423_v10  ;;  %v8493_v9 = vld [vmem:[#allocation4 + $0x600] ss:$16 sps:$4 sm:$0xff]   ;;  %v1383_v10 = vpack.c.bf16 %v1375_v5, %v1375_v5  ;;  %v8568_v5 = vld [vmem:[#allocation4 + $0x788] ss:$16 sps:$4 sm:$0xff]  }
 0x36b   :  { %3199 = vmatprep.subr.bf16.mxu1 %v8426_v54  ;;  %v8496_v54 = vld [vmem:[#allocation4 + $0x608] ss:$16 sps:$4 sm:$0xff]  }
 0x36d   :  { %3036 = vmatpush1.bf16.msra.mxu0 %v8421_v12  ;;  %v8501_v12 = vld [vmem:[#allocation4 + $0x624] ss:$16 sps:$4 sm:$0xff]  }
 0x36e   :  { %3200 = vmatpush1.bf16.msra.mxu1 %v8424_v53  ;;  %3037 = vmatprep.subr.bf16.mxu0 %v8429_v13  ;;  %v1386_v53 = vpack.c.bf16 %v1378_v8, %v1378_v8  ;;  %v8504_v13 = vld [vmem:[#allocation4 + $0x62c] ss:$16 sps:$4 sm:$0xff]   ;;  %v8571_v8 = vld [vmem:[#allocation4 + $0x7a0] ss:$16 sps:$4 sm:$0xff]  }
 0x36f   :  { %3201 = vmatprep.subr.bf16.mxu1 %v8432_v4  ;;  %v8499_v4 = vld [vmem:[#allocation4 + $0x620] ss:$16 sps:$4 sm:$0xff]  }
 0x371   :  { %3038 = vmatpush1.bf16.msra.mxu0 %v8427_v16  ;;  %v8507_v16 = vld [vmem:[#allocation4 + $0x644] ss:$16 sps:$4 sm:$0xff]  }
 0x372   :  { %3202 = vmatpush1.bf16.msra.mxu1 %v8430_v60  ;;  %3039 = vmatprep.subr.bf16.mxu0 %v8435_v17  ;;  %v8505_v60 = vld [vmem:[#allocation4 + $0x640] ss:$16 sps:$4 sm:$0xff]   ;;  %v8508_v17 = vld [vmem:[#allocation4 + $0x648] ss:$16 sps:$4 sm:$0xff]  }
 0x373   :  { %3203 = vmatprep.subr.bf16.mxu1 %v8438_v19  ;;  %v8513_v19 = vld [vmem:[#allocation4 + $0x664] ss:$16 sps:$4 sm:$0xff]  }
 0x375   :  { %3040 = vmatpush1.bf16.msra.mxu0 %v8433_v14  ;;  %v8516_v14 = vld [vmem:[#allocation4 + $0x66c] ss:$16 sps:$4 sm:$0xff]  }
 0x376   :  { %3204 = vmatpush1.bf16.msra.mxu1 %v8436_v20  ;;  %3041 = vmatprep.subr.bf16.mxu0 %v8441_v15  ;;  %v8511_v20 = vld [vmem:[#allocation4 + $0x660] ss:$16 sps:$4 sm:$0xff]   ;;  %v8514_v15 = vld [vmem:[#allocation4 + $0x668] ss:$16 sps:$4 sm:$0xff]  }
 0x377   :  { %3205 = vmatprep.subr.bf16.mxu1 %v8444_v21  ;;  %v8519_v21 = vld [vmem:[#allocation4 + $0x684] ss:$16 sps:$4 sm:$0xff]  }
 0x379   :  { %3042 = vmatpush1.bf16.msra.mxu0 %v8439_v32  ;;  %v8522_v32 = vld [vmem:[#allocation4 + $0x68c] ss:$16 sps:$4 sm:$0xff]  }
 0x37a   :  { %3206 = vmatpush1.bf16.msra.mxu1 %v8442_v22  ;;  %3043 = vmatprep.subr.bf16.mxu0 %v8447_v27  ;;  %v8517_v22 = vld [vmem:[#allocation4 + $0x680] ss:$16 sps:$4 sm:$0xff]   ;;  %v8520_v27 = vld [vmem:[#allocation4 + $0x688] ss:$16 sps:$4 sm:$0xff]  }
 0x37b   :  { %3207 = vmatprep.subr.bf16.mxu1 %v8450_v28  ;;  %v8525_v28 = vld [vmem:[#allocation4 + $0x6a4] ss:$16 sps:$4 sm:$0xff]  }
 0x37d   :  { %3044 = vmatpush1.bf16.msra.mxu0 %v8445_v29  ;;  %v8528_v29 = vld [vmem:[#allocation4 + $0x6ac] ss:$16 sps:$4 sm:$0xff]  }
 0x37e   :  { %3208 = vmatpush1.bf16.msra.mxu1 %v8448_v30  ;;  %3045 = vmatprep.subr.bf16.mxu0 %v8453_v31  ;;  %v8523_v30 = vld [vmem:[#allocation4 + $0x6a0] ss:$16 sps:$4 sm:$0xff]   ;;  %v8526_v31 = vld [vmem:[#allocation4 + $0x6a8] ss:$16 sps:$4 sm:$0xff]  }
 0x37f   :  { %3209 = vmatprep.subr.bf16.mxu1 %v8456_v33  ;;  %v8531_v33 = vld [vmem:[#allocation4 + $0x6c4] ss:$16 sps:$4 sm:$0xff]  }
 0x381   :  { %3046 = vmatpush1.bf16.msra.mxu0 %v8451_v34  ;;  %v8534_v34 = vld [vmem:[#allocation4 + $0x6cc] ss:$16 sps:$4 sm:$0xff]  }
 0x382   :  { %3210 = vmatpush1.bf16.msra.mxu1 %v8454_v35  ;;  %3047 = vmatprep.subr.bf16.mxu0 %v8459_v36  ;;  %v8529_v35 = vld [vmem:[#allocation4 + $0x6c0] ss:$16 sps:$4 sm:$0xff]   ;;  %v8532_v36 = vld [vmem:[#allocation4 + $0x6c8] ss:$16 sps:$4 sm:$0xff]  }
 0x383   :  { %3211 = vmatprep.subr.bf16.mxu1 %v8462_v37  ;;  %v8537_v37 = vld [vmem:[#allocation4 + $0x6e4] ss:$16 sps:$4 sm:$0xff]  }
 0x385   :  { %3048 = vmatpush1.bf16.msra.mxu0 %v8457_v38  ;;  %v8540_v38 = vld [vmem:[#allocation4 + $0x6ec] ss:$16 sps:$4 sm:$0xff]  }
 0x386   :  { %3212 = vmatpush1.bf16.msra.mxu1 %v8460_v39  ;;  %3049 = vmatprep.subr.bf16.mxu0 %v8465_v40  ;;  %v8535_v39 = vld [vmem:[#allocation4 + $0x6e0] ss:$16 sps:$4 sm:$0xff]   ;;  %v8538_v40 = vld [vmem:[#allocation4 + $0x6e8] ss:$16 sps:$4 sm:$0xff]  }
 0x387   :  { %3213 = vmatprep.subr.bf16.mxu1 %v8468_v41  ;;  %v8543_v41 = vld [vmem:[#allocation4 + $0x704] ss:$16 sps:$4 sm:$0xff]  }
 0x389   :  { %3050 = vmatpush1.bf16.msra.mxu0 %v8463_v42  ;;  %v8546_v42 = vld [vmem:[#allocation4 + $0x70c] ss:$16 sps:$4 sm:$0xff]  }
 0x38a   :  { %3214 = vmatpush1.bf16.msra.mxu1 %v8466_v57  ;;  %3051 = vmatprep.subr.bf16.mxu0 %v8471_v43  ;;  %v8541_v57 = vld [vmem:[#allocation4 + $0x700] ss:$16 sps:$4 sm:$0xff]   ;;  %v8544_v43 = vld [vmem:[#allocation4 + $0x708] ss:$16 sps:$4 sm:$0xff]  }
 0x38b   :  { %3215 = vmatprep.subr.bf16.mxu1 %v8474_v44  ;;  %v8549_v44 = vld [vmem:[#allocation4 + $0x724] ss:$16 sps:$4 sm:$0xff]  }
 0x38d   :  { %3052 = vmatpush1.bf16.msra.mxu0 %v8469_v45  ;;  %v8552_v45 = vld [vmem:[#allocation4 + $0x72c] ss:$16 sps:$4 sm:$0xff]  }
 0x38e   :  { %3216 = vmatpush1.bf16.msra.mxu1 %v8472_v46  ;;  %3053 = vmatprep.subr.bf16.mxu0 %v8477_v49  ;;  %v8547_v46 = vld [vmem:[#allocation4 + $0x720] ss:$16 sps:$4 sm:$0xff]   ;;  %v8550_v49 = vld [vmem:[#allocation4 + $0x728] ss:$16 sps:$4 sm:$0xff]  }
 0x38f   :  { %3217 = vmatprep.subr.bf16.mxu1 %v8480_v50  ;;  %v8555_v50 = vld [vmem:[#allocation4 + $0x744] ss:$16 sps:$4 sm:$0xff]  }
 0x391   :  { %3054 = vmatpush1.bf16.msra.mxu0 %v8475_v51  ;;  %v8558_v51 = vld [vmem:[#allocation4 + $0x74c] ss:$16 sps:$4 sm:$0xff]  }
 0x392   :  { %3218 = vmatpush1.bf16.msra.mxu1 %v8478_v55  ;;  %3055 = vmatprep.subr.bf16.mxu0 %v8483_v58  ;;  %v8553_v55 = vld [vmem:[#allocation4 + $0x740] ss:$16 sps:$4 sm:$0xff]   ;;  %v8556_v58 = vld [vmem:[#allocation4 + $0x748] ss:$16 sps:$4 sm:$0xff]  }
 0x393   :  { %3219 = vmatprep.subr.bf16.mxu1 %v8486_v59  ;;  %v8561_v59 = vld [vmem:[#allocation4 + $0x764] ss:$16 sps:$4 sm:$0xff]  }
 0x395   :  { %3056 = vmatpush1.bf16.msra.mxu0 %v8481_v61  ;;  %v8564_v61 = vld [vmem:[#allocation4 + $0x76c] ss:$16 sps:$4 sm:$0xff]  }
 0x396   :  { %3220 = vmatpush1.bf16.msra.mxu1 %v8484_v62  ;;  %3057 = vmatprep.subr.bf16.mxu0 %v8489_v18  ;;  %v8559_v62 = vld [vmem:[#allocation4 + $0x760] ss:$16 sps:$4 sm:$0xff]   ;;  %v8562_v18 = vld [vmem:[#allocation4 + $0x768] ss:$16 sps:$4 sm:$0xff]  }
 0x397   :  { %3221 = vmatprep.subr.bf16.mxu1 %v8492_v2  ;;  %v8567_v2 = vld [vmem:[#allocation4 + $0x784] ss:$16 sps:$4 sm:$0xff]  }
 0x399   :  { %3058 = vmatpush1.bf16.msra.mxu0 %v8487_v23  ;;  %v8570_v23 = vld [vmem:[#allocation4 + $0x78c] ss:$16 sps:$4 sm:$0xff]  }
 0x39a   :  { %3222 = vmatpush1.bf16.msra.mxu1 %v8490_v3  ;;  %3068 = vmatprep.subr.bf16.mxu0 %v8495_v6  ;;  %v8565_v3 = vld [vmem:[#allocation4 + $0x780] ss:$16 sps:$4 sm:$0xff]   ;;  %v8573_v6 = vld [vmem:[#allocation4 + $0x7a4] ss:$16 sps:$4 sm:$0xff]  }
 0x39b   :  { %3232 = vmatprep.subr.bf16.mxu1 %v8498_v7  ;;  %v8576_v7 = vld [vmem:[#allocation4 + $0x7ac] ss:$16 sps:$4 sm:$0xff]  }
 0x39c   :  { %3060 = vmatmul.mubr.bf16.vlgmr.msra.gmra.mrb[8].mxu0 %v1383_v10 }
 0x39d   :  { %3224 = vmatmul.mubr.bf16.vlgmr.msra.gmra.mrb[8].mxu1 %v1383_v10  ;;  %3069 = vmatpush1.bf16.msra.mxu0 %v8493_v9  ;;  %v8574_v9 = vld [vmem:[#allocation4 + $0x7a8] ss:$16 sps:$4 sm:$0xff]   ;;  %v8579_v10 = vld [vmem:[#allocation4 + $0x7c4] ss:$16 sps:$4 sm:$0xff]  }
 0x39e   :  { %3100 = vmatprep.mubr.bf16.mxu0 %v1386_v53  ;;  %3233 = vmatpush1.bf16.msra.mxu1 %v8496_v54  ;;  %v8582_v54 = vld [vmem:[#allocation4 + $0x7cc] ss:$16 sps:$4 sm:$0xff]  }
 0x39f   :  { %3264 = vmatprep.mubr.bf16.mxu1 %v1386_v53  ;;  %3070 = vmatprep.subr.bf16.mxu0 %v8501_v12  ;;  %v8577_v12 = vld [vmem:[#allocation4 + $0x7c0] ss:$16 sps:$4 sm:$0xff]   ;;  %v8580_v53 = vld [vmem:[#allocation4 + $0x7c8] ss:$16 sps:$4 sm:$0xff]  }
 0x3a0   :  { %3234 = vmatprep.subr.bf16.mxu1 %v8504_v13  ;;  %v8585_v13 = vld [vmem:[#allocation4 + $0x7e4] ss:$16 sps:$4 sm:$0xff]  }
 0x3a1   :  { %3071 = vmatpush1.bf16.msra.mxu0 %v8499_v4  ;;  %v8588_v4 = vld [vmem:[#allocation4 + $0x7ec] ss:$16 sps:$4 sm:$0xff]  }
 0x3a2   :  { %3235 = vmatpush1.bf16.msra.mxu1 %v8502_v24  ;;  %3072 = vmatprep.subr.bf16.mxu0 %v8507_v16  ;;  %v8583_v24 = vld [vmem:[#allocation4 + $0x7e0] ss:$16 sps:$4 sm:$0xff]   ;;  %v8586_v16 = vld [vmem:[#allocation4 + $0x7e8] ss:$16 sps:$4 sm:$0xff]  }
 0x3a3   :  { %3236 = vmatprep.subr.bf16.mxu1 %v8510_v25  ;;  %v1377_v25 = vmax.f32 %v9617_v26, 0.0  ;;  %v8598_v26 = vld [vmem:[#allocation7 + $0x30] ss:$8 sps:$4 sm:$0xff]  }
 0x3a5   :  { %3073 = vmatpush1.bf16.msra.mxu0 %v8505_v60  ;;  %v1385_v60 = vpack.c.bf16 %v1377_v25, %v1377_v25  ;;  %v8628_v25 = vld [vmem:[#allocation7 + $0xd0] ss:$8 sps:$4 sm:$0xff]  }
 0x3a6   :  { %3237 = vmatpush1.bf16.msra.mxu1 %v8508_v17  ;;  %3074 = vmatprep.subr.bf16.mxu0 %v8513_v19  ;;  %v8589_v17 = vld [vmem:[#allocation7] ss:$8 sps:$4 sm:$0xff]   ;;  %v8591_v19 = vld [vmem:[#allocation7 + $0x4] ss:$8 sps:$4 sm:$0xff]  }
 0x3a7   :  { %3238 = vmatprep.subr.bf16.mxu1 %v8516_v14  ;;  %v8594_v14 = vld [vmem:[#allocation7 + $0x14] ss:$8 sps:$4 sm:$0xff]  }
 0x3a9   :  { %3075 = vmatpush1.bf16.msra.mxu0 %v8511_v20  ;;  %v8592_v20 = vld [vmem:[#allocation7 + $0x10] ss:$8 sps:$4 sm:$0xff]  }
 0x3aa   :  { %3239 = vmatpush1.bf16.msra.mxu1 %v8514_v15  ;;  %3076 = vmatprep.subr.bf16.mxu0 %v8519_v21  ;;  %v8597_v15 = vld [vmem:[#allocation7 + $0x24] ss:$8 sps:$4 sm:$0xff]   ;;  %v8595_v21 = vld [vmem:[#allocation7 + $0x20] ss:$8 sps:$4 sm:$0xff]  }
 0x3ab   :  { %3240 = vmatprep.subr.bf16.mxu1 %v8522_v32  ;;  %v8600_v32 = vld [vmem:[#allocation7 + $0x34] ss:$8 sps:$4 sm:$0xff]  }
 0x3ad   :  { %3077 = vmatpush1.bf16.msra.mxu0 %v8517_v22  ;;  %v8603_v22 = vld [vmem:[#allocation7 + $0x44] ss:$8 sps:$4 sm:$0xff]  }
 0x3ae   :  { %3241 = vmatpush1.bf16.msra.mxu1 %v8520_v27  ;;  %3078 = vmatprep.subr.bf16.mxu0 %v8525_v28  ;;  %v8601_v27 = vld [vmem:[#allocation7 + $0x40] ss:$8 sps:$4 sm:$0xff]   ;;  %v8606_v28 = vld [vmem:[#allocation7 + $0x54] ss:$8 sps:$4 sm:$0xff]  }
 0x3af   :  { %3242 = vmatprep.subr.bf16.mxu1 %v8528_v29  ;;  %v8604_v29 = vld [vmem:[#allocation7 + $0x50] ss:$8 sps:$4 sm:$0xff]  }
 0x3b1   :  { %3079 = vmatpush1.bf16.msra.mxu0 %v8523_v30  ;;  %v8609_v30 = vld [vmem:[#allocation7 + $0x64] ss:$8 sps:$4 sm:$0xff]  }
 0x3b2   :  { %3243 = vmatpush1.bf16.msra.mxu1 %v8526_v31  ;;  %3080 = vmatprep.subr.bf16.mxu0 %v8531_v33  ;;  %v8607_v31 = vld [vmem:[#allocation7 + $0x60] ss:$8 sps:$4 sm:$0xff]   ;;  %v8612_v33 = vld [vmem:[#allocation7 + $0x74] ss:$8 sps:$4 sm:$0xff]  }
 0x3b3   :  { %3244 = vmatprep.subr.bf16.mxu1 %v8534_v34  ;;  %v8610_v34 = vld [vmem:[#allocation7 + $0x70] ss:$8 sps:$4 sm:$0xff]  }
 0x3b5   :  { %3081 = vmatpush1.bf16.msra.mxu0 %v8529_v35  ;;  %v1643_v35 = vld [vmem:[#allocation6] ss:$4 sm:$0xf] }
 0x3b6   :  { %3245 = vmatpush1.bf16.msra.mxu1 %v8532_v36  ;;  %3082 = vmatprep.subr.bf16.mxu0 %v8537_v37  ;;  %v1648_v36 = vrot.slane %v1643_v35, %v9512_v47  ;;  %v1656_v37 = vrot.slane %v1643_v35, %v9521_v52 }
 0x3b7   :  { %3246 = vmatprep.subr.bf16.mxu1 %v8540_v38  ;;  %v1652_v38 = vrot.slane %v1643_v35, %v9514_v48 }
 0x3b9   :  { %3083 = vmatpush1.bf16.msra.mxu0 %v8535_v39 }
 0x3ba   :  { %3247 = vmatpush1.bf16.msra.mxu1 %v8538_v40  ;;  %3084 = vmatprep.subr.bf16.mxu0 %v8543_v41 }
 0x3bb   :  { %3248 = vmatprep.subr.bf16.mxu1 %v8546_v42 }
 0x3bd   :  { %3085 = vmatpush1.bf16.msra.mxu0 %v8541_v57 }
 0x3be   :  { %3249 = vmatpush1.bf16.msra.mxu1 %v8544_v43  ;;  %3086 = vmatprep.subr.bf16.mxu0 %v8549_v44  ;;  %v1660_v44 = vrot.slane %v1643_v35, %v9528_v56 }
 0x3bf   :  { %3250 = vmatprep.subr.bf16.mxu1 %v8552_v45 }
 0x3c1   :  { %3087 = vmatpush1.bf16.msra.mxu0 %v8547_v46 }
 0x3c2   :  { %3251 = vmatpush1.bf16.msra.mxu1 %v8550_v49  ;;  %3088 = vmatprep.subr.bf16.mxu0 %v8555_v50 }
 0x3c3   :  { %3252 = vmatprep.subr.bf16.mxu1 %v8558_v51 }
 0x3c5   :  { %3089 = vmatpush1.bf16.msra.mxu0 %v8553_v55 }
 0x3c6   :  { %3253 = vmatpush1.bf16.msra.mxu1 %v8556_v58  ;;  %3090 = vmatprep.subr.bf16.mxu0 %v8561_v59 }
 0x3c7   :  { %3254 = vmatprep.subr.bf16.mxu1 %v8564_v61 }
 0x3c9   :  { %3091 = vmatpush1.bf16.msra.mxu0 %v8559_v62 }
 0x3ca   :  { %3255 = vmatpush1.bf16.msra.mxu1 %v8562_v18  ;;  %3092 = vmatprep.subr.bf16.mxu0 %v8567_v2 }
 0x3cb   :  { %3256 = vmatprep.subr.bf16.mxu1 %v8570_v23 }
 0x3cd   :  { %3093 = vmatpush1.bf16.msra.mxu0 %v8565_v3 }
 0x3ce   :  { %3257 = vmatpush1.bf16.msra.mxu1 %v8568_v5  ;;  %3094 = vmatprep.subr.bf16.mxu0 %v8573_v6 }
 0x3cf   :  { %3258 = vmatprep.subr.bf16.mxu1 %v8576_v7  ;;  %v8615_v7 = vld [vmem:[#allocation7 + $0x84] ss:$8 sps:$4 sm:$0xff]  }
 0x3d1   :  { %3095 = vmatpush1.bf16.msra.mxu0 %v8571_v8  ;;  %v8613_v8 = vld [vmem:[#allocation7 + $0x80] ss:$8 sps:$4 sm:$0xff]  }
 0x3d2   :  { %3259 = vmatpush1.bf16.msra.mxu1 %v8574_v9  ;;  %3096 = vmatprep.subr.bf16.mxu0 %v8579_v10  ;;  %v8618_v9 = vld [vmem:[#allocation7 + $0x94] ss:$8 sps:$4 sm:$0xff]   ;;  %v8616_v10 = vld [vmem:[#allocation7 + $0x90] ss:$8 sps:$4 sm:$0xff]  }
 0x3d3   :  { %3260 = vmatprep.subr.bf16.mxu1 %v8582_v54  ;;  %v8621_v54 = vld [vmem:[#allocation7 + $0xa4] ss:$8 sps:$4 sm:$0xff]  }
 0x3d5   :  { %3097 = vmatpush1.bf16.msra.mxu0 %v8577_v12  ;;  %v8619_v12 = vld [vmem:[#allocation7 + $0xa0] ss:$8 sps:$4 sm:$0xff]  }
 0x3d6   :  { %3261 = vmatpush1.bf16.msra.mxu1 %v8580_v53  ;;  %3098 = vmatprep.subr.bf16.mxu0 %v8585_v13  ;;  %v8622_v53 = vld [vmem:[#allocation7 + $0xb0] ss:$8 sps:$4 sm:$0xff]   ;;  %v8624_v13 = vld [vmem:[#allocation7 + $0xb4] ss:$8 sps:$4 sm:$0xff]  }
 0x3d7   :  { %3262 = vmatprep.subr.bf16.mxu1 %v8588_v4  ;;  %v8627_v4 = vld [vmem:[#allocation7 + $0xc4] ss:$8 sps:$4 sm:$0xff]  }
 0x3d9   :  { %3099 = vmatpush1.bf16.msra.mxu0 %v8583_v24  ;;  %v8625_v24 = vld [vmem:[#allocation7 + $0xc0] ss:$8 sps:$4 sm:$0xff]  }
 0x3da   :  { %3263 = vmatpush1.bf16.msra.mxu1 %v8586_v16  ;;  %3761 = vmatprep.subr.bf16.mxu0 %v8591_v19  ;;  %v8630_v16 = vld [vmem:[#allocation7 + $0xd4] ss:$8 sps:$4 sm:$0xff]  }
 0x3db   :  { %v8636_v19 = vld [vmem:[#allocation7 + $0xf4] ss:$8 sps:$4 sm:$0xff]  }
 0x3dc   :  { %3101 = vmatmul.mubr.bf16.vlgmr.msra.gmra.mrb[8].mxu0 %v1385_v60 }
 0x3dd   :  { %3265 = vmatmul.mubr.bf16.vlgmr.msra.gmra.mrb[8].mxu1 %v1385_v60  ;;  %3762 = vmatpush1.bf16.msra.mxu0 %v8589_v17  ;;  %v8633_v60 = vld [vmem:[#allocation7 + $0xe4] ss:$8 sps:$4 sm:$0xff]   ;;  %v8631_v17 = vld [vmem:[#allocation7 + $0xe0] ss:$8 sps:$4 sm:$0xff]  }
 0x3de   :  { %3763 = vmatprep.subr.bf16.mxu0 %v8594_v14  ;;  %v8634_v14 = vld [vmem:[#allocation7 + $0xf0] ss:$8 sps:$4 sm:$0xff]  }
 0x3e1   :  { %3764 = vmatpush1.bf16.msra.mxu0 %v8592_v20  ;;  %v8639_v20 = vld [vmem:[#allocation7 + $0x104] ss:$8 sps:$4 sm:$0xff]  }
 0x3e2   :  { %3765 = vmatprep.subr.bf16.mxu0 %v8597_v15 }
 0x3e5   :  { %3766 = vmatpush1.bf16.msra.mxu0 %v8595_v21 }
 0x3e6   :  { %3767 = vmatprep.subr.bf16.mxu0 %v8600_v32 }
 0x3e9   :  { %3768 = vmatpush1.bf16.msra.mxu0 %v8598_v26 }
 0x3ea   :  { %3769 = vmatprep.subr.bf16.mxu0 %v8603_v22 }
 0x3ed   :  { %3770 = vmatpush1.bf16.msra.mxu0 %v8601_v27 }
 0x3ee   :  { %3771 = vmatprep.subr.bf16.mxu0 %v8606_v28 }
 0x3f1   :  { %3772 = vmatpush1.bf16.msra.mxu0 %v8604_v29 }
 0x3f2   :  { %3773 = vmatprep.subr.bf16.mxu0 %v8609_v30  ;;  %v3304_v30 = vld [vmem:[#allocation6 + $0x1] ss:$4 sm:$0xf] }
 0x3f3   :  { %v3321_v35 = vrot.slane %v3304_v30, %v9528_v56 }
 0x3f5   :  { %3774 = vmatpush1.bf16.msra.mxu0 %v8607_v31  ;;  %v3331_v31 = vld [vmem:[#allocation6 + $0x2] ss:$4 sm:$0xf] }
 0x3f6   :  { %3775 = vmatprep.subr.bf16.mxu0 %v8612_v33  ;;  %v3313_v33 = vrot.slane %v3304_v30, %v9514_v48 }
 0x3f9   :  { %3776 = vmatpush1.bf16.msra.mxu0 %v8610_v34  ;;  %v3309_v34 = vrot.slane %v3304_v30, %v9512_v47 }
 0x3fa   :  { %3777 = vmatprep.subr.bf16.mxu0 %v8615_v7  ;;  %v8637_v7 = vld [vmem:[#allocation7 + $0x100] ss:$8 sps:$4 sm:$0xff]  }
 0x3fd   :  { %3778 = vmatpush1.bf16.msra.mxu0 %v8613_v8 }
 0x3fe   :  { %3779 = vmatprep.subr.bf16.mxu0 %v8618_v9  ;;  %v8642_v9 = vld [vmem:[#allocation7 + $0x114] ss:$8 sps:$4 sm:$0xff]  }
 0x401   :  { %3780 = vmatpush1.bf16.msra.mxu0 %v8616_v10 }
 0x402   :  { %3781 = vmatprep.subr.bf16.mxu0 %v8621_v54  ;;  %v8640_v54 = vld [vmem:[#allocation7 + $0x110] ss:$8 sps:$4 sm:$0xff]  }
 0x405   :  { %3782 = vmatpush1.bf16.msra.mxu0 %v8619_v12  ;;  %v8645_v12 = vld [vmem:[#allocation7 + $0x124] ss:$8 sps:$4 sm:$0xff]  }
 0x406   :  { %3783 = vmatprep.subr.bf16.mxu0 %v8624_v13  ;;  %v8648_v13 = vld [vmem:[#allocation7 + $0x134] ss:$8 sps:$4 sm:$0xff]  }
 0x409   :  { %3784 = vmatpush1.bf16.msra.mxu0 %v8622_v53  ;;  %v8643_v53 = vld [vmem:[#allocation7 + $0x120] ss:$8 sps:$4 sm:$0xff]  }
 0x40a   :  { %3785 = vmatprep.subr.bf16.mxu0 %v8627_v4  ;;  %v8646_v4 = vld [vmem:[#allocation7 + $0x130] ss:$8 sps:$4 sm:$0xff]  }
 0x40d   :  { %3786 = vmatpush1.bf16.msra.mxu0 %v8625_v24  ;;  %v8651_v24 = vld [vmem:[#allocation7 + $0x144] ss:$8 sps:$4 sm:$0xff]  }
 0x40e   :  { %3787 = vmatprep.subr.bf16.mxu0 %v8630_v16  ;;  %v8649_v16 = vld [vmem:[#allocation7 + $0x140] ss:$8 sps:$4 sm:$0xff]  }
 0x411   :  { %3788 = vmatpush1.bf16.msra.mxu0 %v8628_v25  ;;  %v8654_v25 = vld [vmem:[#allocation7 + $0x154] ss:$8 sps:$4 sm:$0xff]  }
 0x412   :  { %3789 = vmatprep.subr.bf16.mxu0 %v8633_v60  ;;  %v8652_v60 = vld [vmem:[#allocation7 + $0x150] ss:$8 sps:$4 sm:$0xff]  }
 0x415   :  { %3790 = vmatpush1.bf16.msra.mxu0 %v8631_v17  ;;  %v8657_v17 = vld [vmem:[#allocation7 + $0x164] ss:$8 sps:$4 sm:$0xff]  }
 0x416   :  { %3791 = vmatprep.subr.bf16.mxu0 %v8636_v19  ;;  %v8655_v19 = vld [vmem:[#allocation7 + $0x160] ss:$8 sps:$4 sm:$0xff]  }
 0x419   :  { %3792 = vmatpush1.bf16.msra.mxu0 %v8634_v14  ;;  %v8660_v14 = vld [vmem:[#allocation7 + $0x174] ss:$8 sps:$4 sm:$0xff]  }
 0x41a   :  { %3802 = vmatprep.subr.bf16.mxu0 %v8639_v20  ;;  %v8658_v20 = vld [vmem:[#allocation7 + $0x170] ss:$8 sps:$4 sm:$0xff]  }
 0x4af   :  { %v3102_v39 = vpop.f32.mrb[8].mxu0 }
 0x4b0   :  { %v9627_v40 = vadd.f32 %v3102_v39, %v1648_v36  ;;  %v3266_v41 = vpop.f32.mrb[8].mxu1  ;;  %v3104_v42 = vpop.f32.mrb[9].mxu0  ;;  %v3317_v36 = vrot.slane %v3304_v30, %v9521_v52  ;;  %v8675_v30 = vld [vmem:[#allocation7 + $0x1c4] ss:$8 sps:$4 sm:$0xff]  }
 0x4b1   :  { %v9629_v57 = vadd.f32 %v3266_v41, %v1656_v37  ;;  %v9631_v43 = vadd.f32 %v3104_v42, %v1652_v38  ;;  %v3268_v45 = vpop.f32.mrb[9].mxu1  ;;  %v3106_v46 = vpop.f32.mrb[10].mxu0 }
 0x4b2   :  { %v3280_v49 = vmul.f32 %v9627_v40, %v9627_v40  ;;  %v3270_v50 = vpop.f32.mrb[10].mxu1  ;;  %v3107_v51 = vpop.f32.mrb[11].mxu0  ;;  %v9642_v62 = vadd.f32 %v3268_v45, %v1660_v44  ;;  %v3340_v44 = vrot.slane %v3331_v31, %v9514_v48  ;;  %v3336_v45 = vrot.slane %v3331_v31, %v9512_v47 }
 0x4b3   :  { %v3281_v55 = vmul.f32 %v9631_v43, %v9631_v43  ;;  %v3271_v58 = vpop.f32.mrb[11].mxu1  ;;  %v3273_v59 = vadd.f32 %v9631_v43, %v9627_v40  ;;  %v3282_v61 = vmul.f32 %v9629_v57, %v9629_v57  ;;  %v3348_v46 = vrot.slane %v3331_v31, %v9528_v56 }
 0x4b4   :  { %v3283_v5 = vmul.f32 %v9642_v62, %v9642_v62 }
 0x4b5   :  { %v3274_v18 = vadd.f32 %v9629_v57, %v3273_v59  ;;  %v3284_v2 = vadd.f32 %v3281_v55, %v3280_v49  ;;  %v3344_v49 = vrot.slane %v3331_v31, %v9521_v52  ;;  %v8673_v31 = vld [vmem:[#allocation7 + $0x1c0] ss:$8 sps:$4 sm:$0xff]  }
 0x4b7   :  { %v3275_v23 = vadd.f32 %v9642_v62, %v3274_v18  ;;  %v3285_v3 = vadd.f32 %v3284_v2, %v3282_v61 }
 0x4b9   :  { %3276 = vadd.xlane.f32.xlu1 %v3275_v23  ;;  %v3286_v6 = vadd.f32 %v3285_v3, %v3283_v5 }
 0x4bd   :  { %3287 = vadd.xlane.f32.xlu1 %v3286_v6 }
 0x546   :  { %v3277_v15 = vpop.xlane.xlu1 %3276 }
 0x547   :  { %v3279_v21 = vmul.f32 0.001953125, %v3277_v15  ;;  %v8663_v15 = vld [vmem:[#allocation7 + $0x184] ss:$8 sps:$4 sm:$0xff]  }
 0x549   :  { %v3290_v26 = vmul.f32 %v3279_v21, %v3279_v21  ;;  %v3295_v37 = vsub.f32 %v9627_v40, %v3279_v21  ;;  %v3297_v38 = vsub.f32 %v9629_v57, %v3279_v21  ;;  %v3296_v39 = vsub.f32 %v9631_v43, %v3279_v21 }
 0x54a   :  { %v3288_v32 = vpop.xlane.xlu1 %3287  ;;  %v3298_v41 = vsub.f32 %v9642_v62, %v3279_v21  ;;  %v8661_v21 = vld [vmem:[#allocation7 + $0x180] ss:$8 sps:$4 sm:$0xff]  }
 0x54b   :  { %v3289_v22 = vmul.f32 0.001953125, %v3288_v32  ;;  %v8666_v32 = vld [vmem:[#allocation7 + $0x194] ss:$8 sps:$4 sm:$0xff]  }
 0x54d   :  { %v3291_v27 = vsub.f32 %v3289_v22, %v3290_v26  ;;  %v8664_v26 = vld [vmem:[#allocation7 + $0x190] ss:$8 sps:$4 sm:$0xff]   ;;  %v8669_v22 = vld [vmem:[#allocation7 + $0x1a4] ss:$8 sps:$4 sm:$0xff]  }
 0x54f   :  { %v3292_v28 = vmax.f32 %v3291_v27, 0.0  ;;  %v8667_v27 = vld [vmem:[#allocation7 + $0x1a0] ss:$8 sps:$4 sm:$0xff]  }
 0x551   :  { %v3293_v29 = vadd.f32 1e-05, %v3292_v28  ;;  %v8672_v28 = vld [vmem:[#allocation7 + $0x1b4] ss:$8 sps:$4 sm:$0xff]  }
 0x553   :  { %8839 = vrsqrt.f32 %v3293_v29  ;;  %v8670_v29 = vld [vmem:[#allocation7 + $0x1b0] ss:$8 sps:$4 sm:$0xff]  }
 0x55d   :  { %v8840_v42 = vpop.eup %8839 }
 0x55e   :  { %v3300_v50 = vmul.f32 %v8840_v42, %v3296_v39  ;;  %v3299_v51 = vmul.f32 %v8840_v42, %v3295_v37  ;;  %v3302_v55 = vmul.f32 %v8840_v42, %v3298_v41  ;;  %v3301_v58 = vmul.f32 %v8840_v42, %v3297_v38  ;;  %v8684_v37 = vld [vmem:[#allocation7 + $0x1f4] ss:$8 sps:$4 sm:$0xff]   ;;  %v8682_v38 = vld [vmem:[#allocation7 + $0x1f0] ss:$8 sps:$4 sm:$0xff]  }
 0x55f   :  { %v3429_v42 = vld [vmem:[#allocation9] ss:$4 sm:$0x3] }
 0x560   :  { %v3327_v40 = vmul.f32 %v3313_v33, %v3300_v50  ;;  %v3326_v59 = vmul.f32 %v3309_v34, %v3299_v51  ;;  %v3329_v57 = vmul.f32 %v3321_v35, %v3302_v55  ;;  %v3328_v61 = vmul.f32 %v3317_v36, %v3301_v58  ;;  %v8678_v33 = vld [vmem:[#allocation7 + $0x1d4] ss:$8 sps:$4 sm:$0xff]   ;;  %v8676_v34 = vld [vmem:[#allocation7 + $0x1d0] ss:$8 sps:$4 sm:$0xff]   ;;  %v8681_v35 = vld [vmem:[#allocation7 + $0x1e4] ss:$8 sps:$4 sm:$0xff]  }
 0x561   :  { %v8679_v36 = vld [vmem:[#allocation7 + $0x1e0] ss:$8 sps:$4 sm:$0xff]  }
 0x562   :  { %v3354_v43 = vadd.f32 %v3340_v44, %v3327_v40  ;;  %v3353_v18 = vadd.f32 %v3336_v45, %v3326_v59  ;;  %v3356_v62 = vadd.f32 %v3348_v46, %v3329_v57  ;;  %v9660_v2 = vadd.f32 %v3344_v49, %v3328_v61 }
 0x563   :  { %v3434_v44 = vrot.slane %v3429_v42, %v9512_v47  ;;  %v3438_v45 = vrot.slane %v3429_v42, %v9514_v48  ;;  %v9199_v42 = vmov 0.0  }
 0x564   :  { %v3358_v23 = vmax.f32 %v3354_v43, 0.0  ;;  %v3357_v3 = vmax.f32 %v3353_v18, 0.0  ;;  %v3360_v5 = vmax.f32 %v3356_v62, 0.0  ;;  %v3359_v39 = vmax.f32 %v9660_v2, 0.0  ;;  %v8685_v43 = vld [vmem:[%s9943_s7 + $0x40] sm:$0xff]   ;;  %v8687_v62 = vld [vmem:[%s9943_s7 + $0x48] sm:$0xff]  }
 0x565   :  { %v8686_v18 = vld [vmem:[%s9943_s7] sm:$0xff]   ;;  %8042 = vmatprep.subr.bf16.mxu1 %v8685_v43  ;;  %v8688_v2 = vld [vmem:[%s9943_s7 + $0x8] sm:$0xff]  }
 0x566   :  { %v3362_v6 = vpack.c.bf16 %v3358_v23, %v3358_v23  ;;  %v3361_v8 = vpack.c.bf16 %v3357_v3, %v3357_v3  ;;  %v3364_v10 = vpack.c.bf16 %v3360_v5, %v3360_v5  ;;  %v3363_v41 = vpack.c.bf16 %v3359_v39, %v3359_v39  ;;  %8043 = vmatpush3.bf16.msra.mxu1 %v8686_v18  ;;  %v8689_v23 = vld [vmem:[%s9943_s7 + $0x50] sm:$0xff]   ;;  %v8691_v5 = vld [vmem:[%s9943_s7 + $0x58] sm:$0xff]   ;;  %v8706_v18 = vld [vmem:[#allocation12 + $0x28] sm:$0xff]  }
 0x567   :  { %8044 = vmatprep.subr.bf16.mxu1 %v8687_v62  ;;  %v8690_v3 = vld [vmem:[%s9943_s7 + $0x10] sm:$0xff]   ;;  %v8705_v43 = vld [vmem:[#allocation12 + $0x20] sm:$0xff]  }
 0x568   :  { %3793 = vmatprep.mubr.bf16.mxu0 %v3362_v6  ;;  %v8692_v6 = vld [vmem:[%s9943_s7 + $0x18] sm:$0xff]   ;;  %v8707_v62 = vld [vmem:[#allocation12 + $0x30] sm:$0xff]  }
 0x569   :  { %3794 = vmatmul.mubr.bf16.vlgmr.msra.gmra.mrb[12].mxu0 %v3361_v8  ;;  %v8694_v8 = vld [vmem:[%s9943_s7 + $0x20] sm:$0xff]  }
 0x56a   :  { %3803 = vmatpush1.bf16.msra.mxu0 %v8637_v7  ;;  %3834 = vmatprep.mubr.bf16.mxu0 %v3364_v10  ;;  %v8693_v7 = vld [vmem:[%s9943_s7 + $0x60] sm:$0xff]   ;;  %v8696_v10 = vld [vmem:[%s9943_s7 + $0x28] sm:$0xff]  }
 0x56b   :  { %3804 = vmatprep.subr.bf16.mxu0 %v8642_v9  ;;  %8045 = vmatpush3.bf16.msra.mxu1 %v8688_v2  ;;  %v8695_v9 = vld [vmem:[%s9943_s7 + $0x68] sm:$0xff]   ;;  %v8708_v2 = vld [vmem:[#allocation12 + $0x38] sm:$0xff]  }
 0x56c   :  { %8046 = vmatprep.subr.bf16.mxu1 %v8689_v23 }
 0x56e   :  { %3805 = vmatpush1.bf16.msra.mxu0 %v8640_v54  ;;  %v8697_v54 = vld [vmem:[%s9943_s7 + $0x70] sm:$0xff]  }
 0x56f   :  { %3806 = vmatprep.subr.bf16.mxu0 %v8645_v12  ;;  %8047 = vmatpush3.bf16.msra.mxu1 %v8690_v3  ;;  %v8698_v12 = vld [vmem:[%s9943_s7 + $0x30] sm:$0xff]  }
 0x570   :  { %8048 = vmatprep.subr.bf16.mxu1 %v8691_v5 }
 0x572   :  { %3807 = vmatpush1.bf16.msra.mxu0 %v8643_v53  ;;  %v8699_v53 = vld [vmem:[%s9943_s7 + $0x78] sm:$0xff]  }
 0x573   :  { %3808 = vmatprep.subr.bf16.mxu0 %v8648_v13  ;;  %8049 = vmatpush3.bf16.msra.mxu1 %v8692_v6  ;;  %v8700_v13 = vld [vmem:[%s9943_s7 + $0x38] sm:$0xff]  }
 0x574   :  { %8050 = vmatprep.subr.bf16.mxu1 %v8693_v7 }
 0x576   :  { %3809 = vmatpush1.bf16.msra.mxu0 %v8646_v4 }
 0x577   :  { %3810 = vmatprep.subr.bf16.mxu0 %v8651_v24  ;;  %8051 = vmatpush3.bf16.msra.mxu1 %v8694_v8 }
 0x578   :  { %8052 = vmatprep.subr.bf16.mxu1 %v8695_v9 }
 0x57a   :  { %3811 = vmatpush1.bf16.msra.mxu0 %v8649_v16 }
 0x57b   :  { %3812 = vmatprep.subr.bf16.mxu0 %v8654_v25  ;;  %8053 = vmatpush3.bf16.msra.mxu1 %v8696_v10 }
 0x57c   :  { %8054 = vmatprep.subr.bf16.mxu1 %v8697_v54 }
 0x57e   :  { %3813 = vmatpush1.bf16.msra.mxu0 %v8652_v60 }
 0x57f   :  { %3814 = vmatprep.subr.bf16.mxu0 %v8657_v17  ;;  %8055 = vmatpush3.bf16.msra.mxu1 %v8698_v12 }
 0x580   :  { %8056 = vmatprep.subr.bf16.mxu1 %v8699_v53  ;;  %v7682_v53 = vld [vmem:[#allocation10 + $0x1] ss:$0 sm:$0xff] }
 0x582   :  { %3815 = vmatpush1.bf16.msra.mxu0 %v8655_v19 }
 0x583   :  { %3816 = vmatprep.subr.bf16.mxu0 %v8660_v14  ;;  %8057 = vmatpush3.bf16.msra.mxu1 %v8700_v13 }
 0x584   :  { %8082 = vmatprep.subr.bf16.mxu1 %v9199_v42 }
 0x586   :  { %3817 = vmatpush1.bf16.msra.mxu0 %v8658_v20  ;;  %v3864_v20 = vld [vmem:[#allocation9 + $0x1] ss:$4 sm:$0x3] }
 0x587   :  { %3818 = vmatprep.subr.bf16.mxu0 %v8663_v15  ;;  %v3879_v15 = vld [vmem:[#allocation9 + $0x2] ss:$4 sm:$0x3] }
 0x58a   :  { %3819 = vmatpush1.bf16.msra.mxu0 %v8661_v21 }
 0x58b   :  { %3820 = vmatprep.subr.bf16.mxu0 %v8666_v32 }
 0x58e   :  { %3821 = vmatpush1.bf16.msra.mxu0 %v8664_v26  ;;  %v3869_v26 = vrot.slane %v3864_v20, %v9512_v47 }
 0x58f   :  { %3822 = vmatprep.subr.bf16.mxu0 %v8669_v22  ;;  %v3873_v22 = vrot.slane %v3864_v20, %v9514_v48  ;;  %v8712_v20 = vld [vmem:[#allocation13 + $0x18] sm:$0xff]  }
 0x592   :  { %3823 = vmatpush1.bf16.msra.mxu0 %v8667_v27 }
 0x593   :  { %3824 = vmatprep.subr.bf16.mxu0 %v8672_v28 }
 0x596   :  { %3825 = vmatpush1.bf16.msra.mxu0 %v8670_v29  ;;  %v3884_v29 = vrot.slane %v3879_v15, %v9512_v47 }
 0x597   :  { %3826 = vmatprep.subr.bf16.mxu0 %v8675_v30  ;;  %v3888_v30 = vrot.slane %v3879_v15, %v9514_v48  ;;  %v8713_v15 = vld [vmem:[#allocation13 + $0x20] sm:$0xff]  }
 0x59a   :  { %3827 = vmatpush1.bf16.msra.mxu0 %v8673_v31 }
 0x59b   :  { %3828 = vmatprep.subr.bf16.mxu0 %v8678_v33 }
 0x59e   :  { %3829 = vmatpush1.bf16.msra.mxu0 %v8676_v34 }
 0x59f   :  { %3830 = vmatprep.subr.bf16.mxu0 %v8681_v35 }
 0x5a2   :  { %3831 = vmatpush1.bf16.msra.mxu0 %v8679_v36 }
 0x5a3   :  { %3832 = vmatprep.subr.bf16.mxu0 %v8684_v37 }
 0x5a6   :  { %3833 = vmatpush1.bf16.msra.mxu0 %v8682_v38 }
 0x5a9   :  { %3835 = vmatmul.mubr.bf16.vlgmr.msra.gmra.mrb[12].mxu0 %v3363_v41 }
 0x67c   :  { %v3836_v46 = vpop.f32.mrb[12].mxu0 }
 0x67d   :  { %v9665_v49 = vadd.f32 %v3836_v46, %v3434_v44  ;;  %v3838_v50 = vpop.f32.mrb[13].mxu0 }
 0x67e   :  { %v8127_v51 = vadd.f32 %v3838_v50, %v3438_v45  ;;  %v3840_v55 = vpop.f32.mrb[14].mxu0  ;;  %v7665_v45 = vld [vmem:[#allocation10] ss:$0 sm:$0xff] }
 0x67f   :  { %v3841_v58 = vpop.f32.mrb[15].mxu0  ;;  %v3848_v40 = vmul.f32 %v9665_v49, %v9665_v49 }
 0x680   :  { %v3843_v59 = vadd.f32 %v8127_v51, %v9665_v49  ;;  %v3849_v57 = vmul.f32 %v8127_v51, %v8127_v51 }
 0x682   :  { %3844 = vadd.xlane.f32.xlu0 %v3843_v59  ;;  %v3850_v61 = vadd.f32 %v3849_v57, %v3848_v40  ;;  %v8701_v40 = vld [vmem:[#allocation12] sm:$0xff]   ;;  %v8702_v59 = vld [vmem:[#allocation12 + $0x8] sm:$0xff]   ;;  %v8703_v57 = vld [vmem:[#allocation12 + $0x10] sm:$0xff]  }
 0x684   :  { %3851 = vadd.xlane.f32.xlu1 %v3850_v61  ;;  %v8704_v61 = vld [vmem:[#allocation12 + $0x18] sm:$0xff]  }
 0x70f   :  { %v3845_v4 = vpop.xlane.xlu0 %3844 }
 0x710   :  { %v3847_v24 = vmul.f32 0.00390625, %v3845_v4  ;;  %v7683_v4 = vld [vmem:[#allocation10 + $0x2] ss:$0 sm:$0xff] }
 0x711   :  { %v3852_v16 = vpop.xlane.xlu1 %3851 }
 0x712   :  { %v3853_v25 = vmul.f32 0.00390625, %v3852_v16  ;;  %v3854_v60 = vmul.f32 %v3847_v24, %v3847_v24  ;;  %v3859_v21 = vsub.f32 %v9665_v49, %v3847_v24  ;;  %v3860_v32 = vsub.f32 %v8127_v51, %v3847_v24 }
 0x714   :  { %v3855_v17 = vsub.f32 %v3853_v25, %v3854_v60  ;;  %v8709_v60 = vld [vmem:[#allocation13] sm:$0xff]  }
 0x716   :  { %v3856_v19 = vmax.f32 %v3855_v17, 0.0 }
 0x718   :  { %v3857_v14 = vadd.f32 1e-05, %v3856_v19  ;;  %v8710_v19 = vld [vmem:[#allocation13 + $0x8] sm:$0xff]  }
 0x71a   :  { %8841 = vrsqrt.f32 %v3857_v14  ;;  %v8711_v14 = vld [vmem:[#allocation13 + $0x10] sm:$0xff]  }
 0x724   :  { %v8842_v27 = vpop.eup %8841 }
 0x725   :  { %v3862_v28 = vmul.f32 %v8842_v27, %v3860_v32  ;;  %v3861_v31 = vmul.f32 %v8842_v27, %v3859_v21  ;;  %v8714_v21 = vld [vmem:[#allocation13 + $0x28] sm:$0xff]   ;;  %v8715_v32 = vld [vmem:[#allocation13 + $0x30] sm:$0xff]  }
 0x727   :  { %v3877_v33 = vmul.f32 %v3873_v22, %v3862_v28  ;;  %v3876_v34 = vmul.f32 %v3869_v26, %v3861_v31  ;;  %v8716_v26 = vld [vmem:[#allocation13 + $0x38] sm:$0xff]   ;;  %v7684_v22 = vld [vmem:[%s9946_s10] ss:$0 sm:$0xff] }
 0x729   :  { %v3892_v35 = vadd.f32 %v3888_v30, %v3877_v33  ;;  %v3891_v36 = vadd.f32 %v3884_v29, %v3876_v34 }
 0x72b   :  { %v3894_v37 = vmax.f32 %v3892_v35, 0.0  ;;  %v3893_v38 = vmax.f32 %v3891_v36, 0.0  ;;  %v8717_v35 = vld [vmem:[#allocation16] ss:$8 sps:$4 sm:$0xff]   ;;  %v8719_v36 = vld [vmem:[#allocation16 + $0x4] ss:$8 sps:$4 sm:$0xff]  }
 0x72d   :  { %v3896_v39 = vpack.c.bf16 %v3894_v37, %v3894_v37  ;;  %v3895_v41 = vpack.c.bf16 %v3893_v38, %v3893_v38  ;;  %v7693_v37 = vld [vmem:[#allocation15] ss:$0 sm:$0xff] }
 0x72f   :  { %4062 = vmatprep.mubr.bf16.mxu1 %v3896_v39 }
 0x730   :  { %4063 = vmatmul.mubr.bf16.vlgmr.msra.gmra.mrb[12].mxu1 %v3895_v41 }
 0x731   :  { %8083 = vmatpush3.bf16.msra.mxu1 %v8701_v40  ;;  %8098 = vmatprep.mubr.msk.bf16.mxu1 %vm9200_vm0, %v9199_v42  ;;  %v8731_v40 = vld [vmem:[#allocation16 + $0x44] ss:$8 sps:$4 sm:$0xff]  }
 0x732   :  { %8084 = vmatprep.subr.bf16.mxu1 %v9199_v42 }
 0x735   :  { %8085 = vmatpush3.bf16.msra.mxu1 %v8702_v59  ;;  %v8729_v59 = vld [vmem:[#allocation16 + $0x40] ss:$8 sps:$4 sm:$0xff]  }
 0x736   :  { %8086 = vmatprep.subr.bf16.mxu1 %v9199_v42 }
 0x739   :  { %8087 = vmatpush3.bf16.msra.mxu1 %v8703_v57  ;;  %v8734_v57 = vld [vmem:[#allocation16 + $0x54] ss:$8 sps:$4 sm:$0xff]  }
 0x73a   :  { %8088 = vmatprep.subr.bf16.mxu1 %v9199_v42 }
 0x73d   :  { %8089 = vmatpush3.bf16.msra.mxu1 %v8704_v61  ;;  %v9201_v61 = vmov 0  }
 0x73e   :  { %8090 = vmatprep.subr.bf16.mxu1 %v9199_v42 }
 0x741   :  { %8091 = vmatpush3.bf16.msra.mxu1 %v8705_v43  ;;  %v8732_v43 = vld [vmem:[#allocation16 + $0x50] ss:$8 sps:$4 sm:$0xff]  }
 0x742   :  { %8092 = vmatprep.subr.bf16.mxu1 %v9199_v42 }
 0x745   :  { %8093 = vmatpush3.bf16.msra.mxu1 %v8706_v18  ;;  %v8737_v18 = vld [vmem:[#allocation16 + $0x64] ss:$8 sps:$4 sm:$0xff]  }
 0x746   :  { %8094 = vmatprep.subr.bf16.mxu1 %v9199_v42 }
 0x749   :  { %8095 = vmatpush3.bf16.msra.mxu1 %v8707_v62  ;;  %v8735_v62 = vld [vmem:[#allocation16 + $0x60] ss:$8 sps:$4 sm:$0xff]  }
 0x74a   :  { %8096 = vmatprep.subr.bf16.mxu1 %v9199_v42 }
 0x74d   :  { %8097 = vmatpush3.bf16.msra.mxu1 %v8708_v2  ;;  %v8740_v2 = vld [vmem:[#allocation16 + $0x74] ss:$8 sps:$4 sm:$0xff]  }
 0x74e   :  { %8102 = vmatprep.subr.bf16.mxu1 %v9199_v42 }
 0x803   :  { %v8058_v44 = vpop.f32.mrb[12].mxu1 }
 0x804   :  { %v8059_v46 = vpop.f32.mrb[13].mxu1 }
 0x805   :  { %v8060_v49 = vadd.f32 %v8059_v46, %v8058_v44  ;;  %v8061_v50 = vpop.f32.mrb[14].mxu1  ;;  %v8722_v46 = vld [vmem:[#allocation16 + $0x14] ss:$8 sps:$4 sm:$0xff]  }
 0x806   :  { %v8062_v51 = vpop.f32.mrb[15].mxu1  ;;  %v8725_v50 = vld [vmem:[#allocation16 + $0x24] ss:$8 sps:$4 sm:$0xff]  }
 0x807   :  { %v4065_v55 = vadd.f32 %v8060_v49, %v7665_v45  ;;  %v8720_v49 = vld [vmem:[#allocation16 + $0x10] ss:$8 sps:$4 sm:$0xff]   ;;  %v8723_v51 = vld [vmem:[#allocation16 + $0x20] ss:$8 sps:$4 sm:$0xff]  }
 0x809   :  { %4070 = vadd.xlane.f32.xlu0 %v4065_v55  ;;  %v4074_v58 = vmul.f32 %v4065_v55, %v4065_v55 }
 0x80b   :  { %4075 = vadd.xlane.f32.xlu1 %v4074_v58  ;;  %v8728_v58 = vld [vmem:[#allocation16 + $0x34] ss:$8 sps:$4 sm:$0xff]  }
 0x896   :  { %v4071_v23 = vpop.xlane.xlu0 %4070 }
 0x897   :  { %v4073_v3 = vmul.f32 0.0078125, %v4071_v23  ;;  %v8738_v23 = vld [vmem:[#allocation16 + $0x70] ss:$8 sps:$4 sm:$0xff]  }
 0x898   :  { %v4076_v5 = vpop.xlane.xlu1 %4075 }
 0x899   :  { %v4078_v6 = vmul.f32 %v4073_v3, %v4073_v3  ;;  %v4077_v7 = vmul.f32 0.0078125, %v4076_v5  ;;  %v4083_v54 = vsub.f32 %v4065_v55, %v4073_v3  ;;  %v8726_v55 = vld [vmem:[#allocation16 + $0x30] ss:$8 sps:$4 sm:$0xff]  }
 0x89b   :  { %v4079_v8 = vsub.f32 %v4077_v7, %v4078_v6 }
 0x89d   :  { %v4080_v9 = vmax.f32 %v4079_v8, 0.0 }
 0x89f   :  { %v4081_v10 = vadd.f32 1e-05, %v4080_v9 }
 0x8a1   :  { %8843 = vrsqrt.f32 %v4081_v10 }
 0x8ab   :  { %v8844_v12 = vpop.eup %8843 }
 0x8ac   :  { %v4084_v13 = vmul.f32 %v8844_v12, %v4083_v54 }
 0x8ae   :  { %v4090_v24 = vmul.f32 %v7682_v53, %v4084_v13  ;;  %v7702_v13 = vld [vmem:[#allocation15 + $0x1] ss:$0 sm:$0xff] }
 0x8b0   :  { %v4096_v16 = vadd.f32 %v7683_v4, %v4090_v24  ;;  %v7703_v24 = vld [vmem:[#allocation15 + $0x2] ss:$0 sm:$0xff] }
 0x8b2   :  { %v4097_v25 = vmax.f32 %v4096_v16, 0.0 }
 0x8b4   :  { %v4098_v17 = vpack.c.bf16 %v4097_v25, %v4097_v25 }
 0x8b6   :  { %8099 = vmatmul.mubr.bf16.vlgmr.msra.gmra.mrb[16].mxu1 %v4098_v17 }
 0x8b7   :  { %8103 = vmatpush3.bf16.msra.mxu1 %v8709_v60  ;;  %8118 = vmatprep.mubr.msk.bf16.mxu1 %vm9200_vm0, %v9199_v42 }
 0x8b8   :  { %8104 = vmatprep.subr.bf16.mxu1 %v9199_v42 }
 0x8bb   :  { %8105 = vmatpush3.bf16.msra.mxu1 %v8710_v19  ;;  %v8741_v19 = vld [vmem:[#allocation19] ss:$16 sps:$4 sm:$0xff]  }
 0x8bc   :  { %8106 = vmatprep.subr.bf16.mxu1 %v9199_v42 }
 0x8bf   :  { %8107 = vmatpush3.bf16.msra.mxu1 %v8711_v14  ;;  %v8743_v14 = vld [vmem:[#allocation19 + $0x4] ss:$16 sps:$4 sm:$0xff]  }
 0x8c0   :  { %8108 = vmatprep.subr.bf16.mxu1 %v9199_v42  ;;  %4957 = vmatprep.subr.bf16.mxu0 %v8743_v14  ;;  %v8807_v14 = vld [vmem:[#allocation19 + $0x160] ss:$16 sps:$4 sm:$0xff]  }
 0x8c1   :  { %4958 = vmatpush1.bf16.msra.mxu0 %v8741_v19  ;;  %v8804_v19 = vld [vmem:[#allocation19 + $0x148] ss:$16 sps:$4 sm:$0xff]  }
 0x8c3   :  { %8109 = vmatpush3.bf16.msra.mxu1 %v8712_v20  ;;  %v8744_v20 = vld [vmem:[#allocation19 + $0x8] ss:$16 sps:$4 sm:$0xff]  }
 0x8c4   :  { %8110 = vmatprep.subr.bf16.mxu1 %v9199_v42 }
 0x8c7   :  { %8111 = vmatpush3.bf16.msra.mxu1 %v8713_v15  ;;  %v8746_v15 = vld [vmem:[#allocation19 + $0xc] ss:$16 sps:$4 sm:$0xff]  }
 0x8c8   :  { %8112 = vmatprep.subr.bf16.mxu1 %v9199_v42 }
 0x8cb   :  { %8113 = vmatpush3.bf16.msra.mxu1 %v8714_v21  ;;  %v8749_v21 = vld [vmem:[#allocation19 + $0x24] ss:$16 sps:$4 sm:$0xff]  }
 0x8cc   :  { %8114 = vmatprep.subr.bf16.mxu1 %v9199_v42  ;;  %4959 = vmatprep.subr.bf16.mxu0 %v8749_v21  ;;  %v8812_v21 = vld [vmem:[#allocation19 + $0x16c] ss:$16 sps:$4 sm:$0xff]  }
 0x8cf   :  { %8115 = vmatpush3.bf16.msra.mxu1 %v8715_v32  ;;  %v8752_v32 = vld [vmem:[#allocation19 + $0x2c] ss:$16 sps:$4 sm:$0xff]  }
 0x8d0   :  { %8116 = vmatprep.subr.bf16.mxu1 %v9199_v42 }
 0x8d3   :  { %8117 = vmatpush3.bf16.msra.mxu1 %v8716_v26  ;;  %v8747_v26 = vld [vmem:[#allocation19 + $0x20] ss:$16 sps:$4 sm:$0xff]  }
 0x8d4   :  { %4457 = vmatprep.subr.bf16.mxu1 %v8719_v36  ;;  %4960 = vmatpush1.bf16.msra.mxu0 %v8747_v26  ;;  %v8767_v36 = vld [vmem:[#allocation19 + $0x84] ss:$16 sps:$4 sm:$0xff]   ;;  %v8818_v26 = vld [vmem:[#allocation19 + $0x18c] ss:$16 sps:$4 sm:$0xff]  }
 0x989   :  { %v4204_v27 = vpop.f32.mrb[16].mxu1 }
 0x98a   :  { %v4205_v28 = vadd.f32 %v7684_v22, %v4204_v27  ;;  %v8100_v29 = vpop.f32.mrb[17].mxu1  ;;  %v8750_v22 = vld [vmem:[#allocation19 + $0x28] ss:$16 sps:$4 sm:$0xff]   ;;  %v8755_v27 = vld [vmem:[#allocation19 + $0x44] ss:$16 sps:$4 sm:$0xff]  }
 0x98b   :  { %v4207_v30 = vpop.f32.mrb[18].mxu1  ;;  %v8753_v29 = vld [vmem:[#allocation19 + $0x40] ss:$16 sps:$4 sm:$0xff]   ;;  %4961 = vmatprep.subr.bf16.mxu0 %v8755_v27  ;;  %v8816_v27 = vld [vmem:[#allocation19 + $0x188] ss:$16 sps:$4 sm:$0xff]  }
 0x98c   :  { %v4210_v31 = vmax.f32 %v4205_v28, 0.0  ;;  %v8101_v33 = vpop.f32.mrb[19].mxu1  ;;  %v8758_v28 = vld [vmem:[#allocation19 + $0x4c] ss:$16 sps:$4 sm:$0xff]   ;;  %v8756_v30 = vld [vmem:[#allocation19 + $0x48] ss:$16 sps:$4 sm:$0xff]   ;;  %4962 = vmatpush1.bf16.msra.mxu0 %v8753_v29 }
 0x98d   :  { %v8764_v33 = vld [vmem:[#allocation19 + $0x6c] ss:$16 sps:$4 sm:$0xff]  }
 0x98e   :  { %v4211_v34 = vpack.c.bf16 %v4210_v31, %v4210_v31  ;;  %v8761_v31 = vld [vmem:[#allocation19 + $0x64] ss:$16 sps:$4 sm:$0xff]   ;;  %v8824_v29 = vld [vmem:[#allocation19 + $0x1ac] ss:$16 sps:$4 sm:$0xff]  }
 0x98f   :  { %4963 = vmatprep.subr.bf16.mxu0 %v8761_v31  ;;  %v8822_v31 = vld [vmem:[#allocation19 + $0x1a8] ss:$16 sps:$4 sm:$0xff]  }
 0x990   :  { %8119 = vmatmul.mubr.bf16.vlgmr.msra.gmra.mrb[20].mxu1 %v4211_v34  ;;  %v8759_v34 = vld [vmem:[#allocation19 + $0x60] ss:$16 sps:$4 sm:$0xff]  }
 0x991   :  { %4458 = vmatpush1.bf16.msra.mxu1 %v8717_v35  ;;  %4489 = vmatprep.mubr.bf16.mxu1 %v9201_v61  ;;  %v8762_v35 = vld [vmem:[#allocation19 + $0x68] ss:$16 sps:$4 sm:$0xff]  }
 0x992   :  { %4459 = vmatprep.subr.bf16.mxu1 %v8722_v46  ;;  %4964 = vmatpush1.bf16.msra.mxu0 %v8759_v34  ;;  %v8779_v46 = vld [vmem:[#allocation19 + $0xc4] ss:$16 sps:$4 sm:$0xff]   ;;  %v8830_v34 = vld [vmem:[#allocation19 + $0x1cc] ss:$16 sps:$4 sm:$0xff]  }
 0x993   :  { %4965 = vmatprep.subr.bf16.mxu0 %v8767_v36  ;;  %v8828_v36 = vld [vmem:[#allocation19 + $0x1c8] ss:$16 sps:$4 sm:$0xff]  }
 0x995   :  { %4460 = vmatpush1.bf16.msra.mxu1 %v8720_v49  ;;  %v8782_v49 = vld [vmem:[#allocation19 + $0xcc] ss:$16 sps:$4 sm:$0xff]  }
 0x996   :  { %4461 = vmatprep.subr.bf16.mxu1 %v8725_v50  ;;  %v8777_v50 = vld [vmem:[#allocation19 + $0xc0] ss:$16 sps:$4 sm:$0xff]  }
 0x999   :  { %4462 = vmatpush1.bf16.msra.mxu1 %v8723_v51  ;;  %v8780_v51 = vld [vmem:[#allocation19 + $0xc8] ss:$16 sps:$4 sm:$0xff]  }
 0x99a   :  { %4463 = vmatprep.subr.bf16.mxu1 %v8728_v58  ;;  %v8788_v58 = vld [vmem:[#allocation19 + $0xec] ss:$16 sps:$4 sm:$0xff]  }
 0x99d   :  { %4464 = vmatpush1.bf16.msra.mxu1 %v8726_v55  ;;  %v8785_v55 = vld [vmem:[#allocation19 + $0xe4] ss:$16 sps:$4 sm:$0xff]  }
 0x99e   :  { %4465 = vmatprep.subr.bf16.mxu1 %v8731_v40  ;;  %v8783_v40 = vld [vmem:[#allocation19 + $0xe0] ss:$16 sps:$4 sm:$0xff]  }
 0x9a1   :  { %4466 = vmatpush1.bf16.msra.mxu1 %v8729_v59  ;;  %v8786_v59 = vld [vmem:[#allocation19 + $0xe8] ss:$16 sps:$4 sm:$0xff]  }
 0x9a2   :  { %4467 = vmatprep.subr.bf16.mxu1 %v8734_v57  ;;  %v4365_v57 = vld [vmem:[#allocation18] ss:$4 sm:$0x3] }
 0x9a3   :  { %v4370_v61 = vrot.slane %v4365_v57, %v9512_v47 }
 0x9a5   :  { %4468 = vmatpush1.bf16.msra.mxu1 %v8732_v43  ;;  %v4374_v43 = vrot.slane %v4365_v57, %v9514_v48 }
 0x9a6   :  { %4469 = vmatprep.subr.bf16.mxu1 %v8737_v18 }
 0x9a9   :  { %4470 = vmatpush1.bf16.msra.mxu1 %v8735_v62 }
 0x9aa   :  { %4471 = vmatprep.subr.bf16.mxu1 %v8740_v2 }
 0x9ad   :  { %4472 = vmatpush1.bf16.msra.mxu1 %v8738_v23 }
 0x9ae   :  { %4998 = vmatprep.subr.bf16.mxu1 %v8746_v15  ;;  %v8810_v15 = vld [vmem:[#allocation19 + $0x168] ss:$16 sps:$4 sm:$0xff]  }
 0xa63   :  { %v4315_v38 = vpop.f32.mrb[20].mxu1 }
 0xa64   :  { %v4316_v39 = vadd.f32 %v7693_v37, %v4315_v38  ;;  %v8120_v41 = vpop.f32.mrb[21].mxu1  ;;  %v8770_v37 = vld [vmem:[#allocation19 + $0x8c] ss:$16 sps:$4 sm:$0xff]   ;;  %v8765_v38 = vld [vmem:[#allocation19 + $0x80] ss:$16 sps:$4 sm:$0xff]  }
 0xa65   :  { %v4318_v42 = vpop.f32.mrb[22].mxu1  ;;  %v8773_v41 = vld [vmem:[#allocation19 + $0xa4] ss:$16 sps:$4 sm:$0xff]   ;;  %4966 = vmatpush1.bf16.msra.mxu0 %v8765_v38  ;;  %v8836_v38 = vld [vmem:[#allocation19 + $0x1ec] ss:$16 sps:$4 sm:$0xff]  }
 0xa66   :  { %4321 = vadd.xlane.f32.xlu0 %v4316_v39  ;;  %v8121_v44 = vpop.f32.mrb[23].mxu1  ;;  %v4324_v45 = vmul.f32 %v4316_v39, %v4316_v39  ;;  %v8776_v42 = vld [vmem:[#allocation19 + $0xac] ss:$16 sps:$4 sm:$0xff]   ;;  %4967 = vmatprep.subr.bf16.mxu0 %v8773_v41  ;;  %v8834_v41 = vld [vmem:[#allocation19 + $0x1e8] ss:$16 sps:$4 sm:$0xff]  }
 0xa67   :  { %v8771_v44 = vld [vmem:[#allocation19 + $0xa0] ss:$16 sps:$4 sm:$0xff]  }
 0xa68   :  { %4325 = vadd.xlane.f32.xlu1 %v4324_v45  ;;  %v8774_v45 = vld [vmem:[#allocation19 + $0xa8] ss:$16 sps:$4 sm:$0xff]  }
 0xa69   :  { %4968 = vmatpush1.bf16.msra.mxu0 %v8771_v44 }
 0xa6a   :  { %4969 = vmatprep.subr.bf16.mxu0 %v8779_v46 }
 0xa6d   :  { %4970 = vmatpush1.bf16.msra.mxu0 %v8777_v50 }
 0xa6e   :  { %4971 = vmatprep.subr.bf16.mxu0 %v8785_v55 }
 0xa71   :  { %4972 = vmatpush1.bf16.msra.mxu0 %v8783_v40  ;;  %v4533_v40 = vld [vmem:[#allocation18 + $0x2] ss:$4 sm:$0x3] }
 0xaf3   :  { %v4322_v3 = vpop.xlane.xlu0 %4321 }
 0xaf4   :  { %v4323_v5 = vmul.f32 0.0078125, %v4322_v3 }
 0xaf5   :  { %v4326_v6 = vpop.xlane.xlu1 %4325 }
 0xaf6   :  { %v4328_v7 = vmul.f32 %v4323_v5, %v4323_v5  ;;  %v4327_v8 = vmul.f32 0.0078125, %v4326_v6  ;;  %v4333_v12 = vsub.f32 %v4316_v39, %v4323_v5  ;;  %v8768_v39 = vld [vmem:[#allocation19 + $0x88] ss:$16 sps:$4 sm:$0xff]  }
 0xaf8   :  { %v4329_v9 = vsub.f32 %v4327_v8, %v4328_v7 }
 0xafa   :  { %v4330_v10 = vmax.f32 %v4329_v9, 0.0 }
 0xafc   :  { %v4331_v54 = vadd.f32 1e-05, %v4330_v10  ;;  %v8791_v10 = vld [vmem:[#allocation19 + $0x104] ss:$16 sps:$4 sm:$0xff]  }
 0xafd   :  { %4973 = vmatprep.subr.bf16.mxu0 %v8791_v10 }
 0xafe   :  { %8845 = vrsqrt.f32 %v4331_v54  ;;  %v8794_v54 = vld [vmem:[#allocation19 + $0x10c] ss:$16 sps:$4 sm:$0xff]  }
 0xb08   :  { %v8846_v53 = vpop.eup %8845 }
 0xb09   :  { %v4334_v4 = vmul.f32 %v8846_v53, %v4333_v12  ;;  %v8789_v12 = vld [vmem:[#allocation19 + $0x100] ss:$16 sps:$4 sm:$0xff]   ;;  %v8792_v53 = vld [vmem:[#allocation19 + $0x108] ss:$16 sps:$4 sm:$0xff]  }
 0xb0a   :  { %4974 = vmatpush1.bf16.msra.mxu0 %v8789_v12 }
 0xb0b   :  { %v4340_v16 = vmul.f32 %v7702_v13, %v4334_v4  ;;  %v8797_v13 = vld [vmem:[#allocation19 + $0x124] ss:$16 sps:$4 sm:$0xff]   ;;  %v8800_v4 = vld [vmem:[#allocation19 + $0x12c] ss:$16 sps:$4 sm:$0xff]  }
 0xb0c   :  { %4975 = vmatprep.subr.bf16.mxu0 %v8797_v13  ;;  %v5134_v13 = vld [vmem:[#allocation22 + $0x20] sm:$0xff] }
 0xb0d   :  { %v4346_v25 = vadd.f32 %v7703_v24, %v4340_v16  ;;  %v8795_v24 = vld [vmem:[#allocation19 + $0x120] ss:$16 sps:$4 sm:$0xff]   ;;  %v8798_v16 = vld [vmem:[#allocation19 + $0x128] ss:$16 sps:$4 sm:$0xff]  }
 0xb0e   :  { %4976 = vmatpush1.bf16.msra.mxu0 %v8795_v24 }
 0xb0f   :  { %v4347_v60 = vmax.f32 %v4346_v25, 0.0  ;;  %v8803_v25 = vld [vmem:[#allocation19 + $0x144] ss:$16 sps:$4 sm:$0xff]  }
 0xb10   :  { %4977 = vmatprep.subr.bf16.mxu0 %v8803_v25  ;;  %v5135_v25 = vld [vmem:[#allocation22 + $0x28] sm:$0xff] }
 0xb11   :  { %v4348_v17 = vpack.c.bf16 %v4347_v60, %v4347_v60  ;;  %v8806_v60 = vld [vmem:[#allocation19 + $0x14c] ss:$16 sps:$4 sm:$0xff]  }
 0xb13   :  { %4490 = vmatmul.mubr.bf16.vlgmr.msra.gmra.mrb[24].mxu1 %v4348_v17  ;;  %v8801_v17 = vld [vmem:[#allocation19 + $0x140] ss:$16 sps:$4 sm:$0xff]  }
 0xb14   :  { %4999 = vmatpush1.bf16.msra.mxu1 %v8744_v20  ;;  %4978 = vmatpush1.bf16.msra.mxu0 %v8801_v17  ;;  %v8809_v20 = vld [vmem:[#allocation19 + $0x164] ss:$16 sps:$4 sm:$0xff]  }
 0xb15   :  { %5000 = vmatprep.subr.bf16.mxu1 %v8752_v32  ;;  %v8815_v32 = vld [vmem:[#allocation19 + $0x184] ss:$16 sps:$4 sm:$0xff]   ;;  %4979 = vmatprep.subr.bf16.mxu0 %v8809_v20 }
 0xb16   :  { %v5142_v17 = vld [vmem:[#allocation22 + $0x60] sm:$0xff] }
 0xb18   :  { %5001 = vmatpush1.bf16.msra.mxu1 %v8750_v22  ;;  %4980 = vmatpush1.bf16.msra.mxu0 %v8807_v14  ;;  %v8813_v22 = vld [vmem:[#allocation19 + $0x180] ss:$16 sps:$4 sm:$0xff]  }
 0xb19   :  { %5002 = vmatprep.subr.bf16.mxu1 %v8758_v28  ;;  %4981 = vmatprep.subr.bf16.mxu0 %v8815_v32  ;;  %v8821_v28 = vld [vmem:[#allocation19 + $0x1a4] ss:$16 sps:$4 sm:$0xff]  }
 0xb1a   :  { %v5146_v32 = vld [vmem:[#allocation22 + $0x80] sm:$0xff] }
 0xb1c   :  { %5003 = vmatpush1.bf16.msra.mxu1 %v8756_v30  ;;  %4982 = vmatpush1.bf16.msra.mxu0 %v8813_v22  ;;  %v8819_v30 = vld [vmem:[#allocation19 + $0x1a0] ss:$16 sps:$4 sm:$0xff]  }
 0xb1d   :  { %5004 = vmatprep.subr.bf16.mxu1 %v8764_v33  ;;  %4983 = vmatprep.subr.bf16.mxu0 %v8821_v28  ;;  %v8827_v33 = vld [vmem:[#allocation19 + $0x1c4] ss:$16 sps:$4 sm:$0xff]   ;;  %v5151_v28 = vld [vmem:[#allocation22 + $0xa8] sm:$0xff] }
 0xb1e   :  { %v5150_v22 = vld [vmem:[#allocation22 + $0xa0] sm:$0xff] }
 0xb20   :  { %5005 = vmatpush1.bf16.msra.mxu1 %v8762_v35  ;;  %4984 = vmatpush1.bf16.msra.mxu0 %v8819_v30  ;;  %v8825_v35 = vld [vmem:[#allocation19 + $0x1c0] ss:$16 sps:$4 sm:$0xff]  }
 0xb21   :  { %5006 = vmatprep.subr.bf16.mxu1 %v8770_v37  ;;  %4985 = vmatprep.subr.bf16.mxu0 %v8827_v33  ;;  %v8833_v37 = vld [vmem:[#allocation19 + $0x1e4] ss:$16 sps:$4 sm:$0xff]  }
 0xb24   :  { %5007 = vmatpush1.bf16.msra.mxu1 %v8768_v39  ;;  %4986 = vmatpush1.bf16.msra.mxu0 %v8825_v35  ;;  %v8831_v39 = vld [vmem:[#allocation19 + $0x1e0] ss:$16 sps:$4 sm:$0xff]  }
 0xb25   :  { %5008 = vmatprep.subr.bf16.mxu1 %v8776_v42  ;;  %4987 = vmatprep.subr.bf16.mxu0 %v8833_v37  ;;  %v5158_v35 = vld [vmem:[#allocation22 + $0xe0] sm:$0xff]  ;;  %v5159_v37 = vld [vmem:[#allocation22 + $0xe8] sm:$0xff] }
 0xb28   :  { %5009 = vmatpush1.bf16.msra.mxu1 %v8774_v45  ;;  %4988 = vmatpush1.bf16.msra.mxu0 %v8831_v39 }
 0xb29   :  { %5010 = vmatprep.subr.bf16.mxu1 %v8782_v49 }
 0xb2c   :  { %5011 = vmatpush1.bf16.msra.mxu1 %v8780_v51 }
 0xb2d   :  { %5012 = vmatprep.subr.bf16.mxu1 %v8788_v58  ;;  %v4518_v58 = vld [vmem:[#allocation18 + $0x1] ss:$4 sm:$0x3] }
 0xb30   :  { %5013 = vmatpush1.bf16.msra.mxu1 %v8786_v59 }
 0xb31   :  { %5014 = vmatprep.subr.bf16.mxu1 %v8794_v54 }
 0xb34   :  { %5015 = vmatpush1.bf16.msra.mxu1 %v8792_v53 }
 0xb35   :  { %5016 = vmatprep.subr.bf16.mxu1 %v8800_v4  ;;  %v5131_v4 = vld [vmem:[#allocation22 + $0x8] sm:$0xff] }
 0xb36   :  { %v7787_v14 = vcombine.high %v5131_v4, %v5135_v25 }
 0xb38   :  { %5017 = vmatpush1.bf16.msra.mxu1 %v8798_v16 }
 0xb39   :  { %5018 = vmatprep.subr.bf16.mxu1 %v8806_v60  ;;  %v5138_v60 = vld [vmem:[#allocation22 + $0x40] sm:$0xff] }
 0xb3a   :  { %v7793_v20 = vcombine.high %v5138_v60, %v5142_v17 }
 0xb3c   :  { %5019 = vmatpush1.bf16.msra.mxu1 %v8804_v19  ;;  %v7786_v19 = vcombine.low %v5131_v4, %v5135_v25 }
 0xb3d   :  { %5020 = vmatprep.subr.bf16.mxu1 %v8812_v21  ;;  %v5143_v21 = vld [vmem:[#allocation22 + $0x68] sm:$0xff] }
 0xb40   :  { %5021 = vmatpush1.bf16.msra.mxu1 %v8810_v15  ;;  %v5139_v15 = vld [vmem:[#allocation22 + $0x48] sm:$0xff] }
 0xb41   :  { %5022 = vmatprep.subr.bf16.mxu1 %v8818_v26  ;;  %v7795_v26 = vcombine.high %v5139_v15, %v5143_v21  ;;  %v7794_v30 = vcombine.low %v5139_v15, %v5143_v21 }
 0xb44   :  { %5023 = vmatpush1.bf16.msra.mxu1 %v8816_v27  ;;  %v5147_v27 = vld [vmem:[#allocation22 + $0x88] sm:$0xff] }
 0xb45   :  { %5024 = vmatprep.subr.bf16.mxu1 %v8824_v29  ;;  %v7792_v29 = vcombine.low %v5138_v60, %v5142_v17  ;;  %v7803_v33 = vcombine.high %v5147_v27, %v5151_v28  ;;  %v7802_v39 = vcombine.low %v5147_v27, %v5151_v28  ;;  %v5194_v60 = vld [vmem:[#allocation22 + $0x200] sm:$0xff]  ;;  %v4615_v27 = vld [vmem:[#allocation21] ss:$4 sm:$0xf] }
 0xb46   :  { %v5198_v17 = vld [vmem:[#allocation22 + $0x220] sm:$0xff]  ;;  %v4620_v28 = vrot.slane %v4615_v27, %v9512_v47 }
 0xb47   :  { %v7849_v21 = vcombine.high %v5194_v60, %v5198_v17 }
 0xb48   :  { %5025 = vmatpush1.bf16.msra.mxu1 %v8822_v31  ;;  %v7801_v31 = vcombine.high %v5146_v32, %v5150_v22 }
 0xb49   :  { %5026 = vmatprep.subr.bf16.mxu1 %v8830_v34  ;;  %v5154_v34 = vld [vmem:[#allocation22 + $0xc0] sm:$0xff] }
 0xb4c   :  { %5027 = vmatpush1.bf16.msra.mxu1 %v8828_v36  ;;  %v5155_v36 = vld [vmem:[#allocation22 + $0xc8] sm:$0xff] }
 0xb4d   :  { %5028 = vmatprep.subr.bf16.mxu1 %v8836_v38  ;;  %v7800_v38 = vcombine.low %v5146_v32, %v5150_v22 }
 0xb50   :  { %5029 = vmatpush1.bf16.msra.mxu1 %v8834_v41  ;;  %v7809_v41 = vcombine.high %v5154_v34, %v5158_v35 }
 0xb51   :  { %6790 = vmatprep.subr.bf16.mxu1 %v7787_v14  ;;  %v5199_v14 = vld [vmem:[#allocation22 + $0x228] sm:$0xff] }
 0xbe6   :  { %v4491_v18 = vpop.f32.mrb[24].mxu1 }
 0xbe7   :  { %v9748_v62 = vadd.f32 %v4491_v18, %v4370_v61  ;;  %v4493_v2 = vpop.f32.mrb[25].mxu1  ;;  %v4523_v61 = vrot.slane %v4518_v58, %v9512_v47 }
 0xbe8   :  { %v9750_v23 = vadd.f32 %v4493_v2, %v4374_v43  ;;  %v4495_v3 = vpop.f32.mrb[26].mxu1  ;;  %v4527_v43 = vrot.slane %v4518_v58, %v9514_v48 }
 0xbe9   :  { %v4496_v5 = vpop.f32.mrb[27].mxu1  ;;  %v4502_v6 = vmul.f32 %v9748_v62, %v9748_v62  ;;  %v4538_v3 = vrot.slane %v4533_v40, %v9512_v47 }
 0xbea   :  { %v4498_v7 = vadd.f32 %v9750_v23, %v9748_v62  ;;  %v4503_v8 = vmul.f32 %v9750_v23, %v9750_v23  ;;  %v4542_v5 = vrot.slane %v4533_v40, %v9514_v48  ;;  %v5170_v40 = vld [vmem:[#allocation22 + $0x140] sm:$0xff] }
 0xbec   :  { %4499 = vadd.xlane.f32.xlu0 %v4498_v7  ;;  %v4504_v9 = vadd.f32 %v4503_v8, %v4502_v6 }
 0xbee   :  { %4505 = vadd.xlane.f32.xlu1 %v4504_v9 }
 0xc79   :  { %v4500_v42 = vpop.xlane.xlu0 %4499 }
 0xc7a   :  { %v4501_v44 = vmul.f32 0.00390625, %v4500_v42  ;;  %v7811_v42 = vcombine.high %v5155_v36, %v5159_v37 }
 0xc7b   :  { %v4506_v45 = vpop.xlane.xlu1 %4505 }
 0xc7c   :  { %v4507_v46 = vmul.f32 0.00390625, %v4506_v45  ;;  %v4508_v49 = vmul.f32 %v4501_v44, %v4501_v44  ;;  %v4513_v59 = vsub.f32 %v9748_v62, %v4501_v44  ;;  %v4514_v57 = vsub.f32 %v9750_v23, %v4501_v44  ;;  %v5130_v23 = vld [vmem:[#allocation22] sm:$0xff] }
 0xc7d   :  { %v7784_v24 = vcombine.low %v5130_v23, %v5134_v13  ;;  %v7785_v16 = vcombine.high %v5130_v23, %v5134_v13  ;;  %v5162_v44 = vld [vmem:[#allocation22 + $0x100] sm:$0xff]  ;;  %v5187_v23 = vld [vmem:[#allocation22 + $0x1c8] sm:$0xff] }
 0xc7e   :  { %v4509_v50 = vsub.f32 %v4507_v46, %v4508_v49  ;;  %v5166_v45 = vld [vmem:[#allocation22 + $0x120] sm:$0xff]  ;;  %v5163_v46 = vld [vmem:[#allocation22 + $0x108] sm:$0xff] }
 0xc7f   :  { %6708 = vmatprep.subr.bf16.mxu0 %v7785_v16  ;;  %v5167_v49 = vld [vmem:[#allocation22 + $0x128] sm:$0xff] }
 0xc80   :  { %v4510_v51 = vmax.f32 %v4509_v50, 0.0  ;;  %v7808_v50 = vcombine.low %v5154_v34, %v5158_v35  ;;  %v7819_v58 = vcombine.high %v5163_v46, %v5167_v49  ;;  %v5191_v13 = vld [vmem:[#allocation22 + $0x1e8] sm:$0xff]  ;;  %v4632_v34 = vrot.slane %v4615_v27, %v9528_v56 }
 0xc81   :  { %v7843_v25 = vcombine.high %v5187_v23, %v5191_v13  ;;  %v7842_v15 = vcombine.low %v5187_v23, %v5191_v13 }
 0xc82   :  { %v4511_v55 = vadd.f32 1e-05, %v4510_v51  ;;  %v7810_v51 = vcombine.low %v5155_v36, %v5159_v37 }
 0xc84   :  { %8847 = vrsqrt.f32 %v4511_v55  ;;  %v7817_v55 = vcombine.high %v5162_v44, %v5166_v45 }
 0xc8e   :  { %v8848_v18 = vpop.eup %8847 }
 0xc8f   :  { %v4516_v2 = vmul.f32 %v8848_v18, %v4514_v57  ;;  %v4515_v6 = vmul.f32 %v8848_v18, %v4513_v59  ;;  %v5174_v59 = vld [vmem:[#allocation22 + $0x160] sm:$0xff]  ;;  %v5171_v57 = vld [vmem:[#allocation22 + $0x148] sm:$0xff]  ;;  %v7818_v18 = vcombine.low %v5163_v46, %v5167_v49 }
 0xc91   :  { %v4531_v7 = vmul.f32 %v4527_v43, %v4516_v2  ;;  %v4530_v8 = vmul.f32 %v4523_v61, %v4515_v6  ;;  %v5175_v61 = vld [vmem:[#allocation22 + $0x168] sm:$0xff]  ;;  %v7816_v43 = vcombine.low %v5162_v44, %v5166_v45  ;;  %v7825_v2 = vcombine.high %v5170_v40, %v5174_v59  ;;  %v5182_v6 = vld [vmem:[#allocation22 + $0x1a0] sm:$0xff] }
 0xc93   :  { %v4546_v9 = vadd.f32 %v4542_v5, %v4531_v7  ;;  %v4545_v10 = vadd.f32 %v4538_v3, %v4530_v8  ;;  %v7827_v3 = vcombine.high %v5171_v57, %v5175_v61  ;;  %v5178_v5 = vld [vmem:[#allocation22 + $0x180] sm:$0xff]  ;;  %v5179_v7 = vld [vmem:[#allocation22 + $0x188] sm:$0xff] }
 0xc94   :  { %v5183_v8 = vld [vmem:[#allocation22 + $0x1a8] sm:$0xff]  ;;  %v7832_v4 = vcombine.low %v5178_v5, %v5182_v6 }
 0xc95   :  { %v4548_v54 = vmax.f32 %v4546_v9, 0.0  ;;  %v4547_v12 = vmax.f32 %v4545_v10, 0.0  ;;  %v7824_v9 = vcombine.low %v5170_v40, %v5174_v59  ;;  %v7826_v10 = vcombine.low %v5171_v57, %v5175_v61 }
 0xc97   :  { %v4550_v62 = vpack.c.bf16 %v4548_v54, %v4548_v54  ;;  %v4549_v53 = vpack.c.bf16 %v4547_v12, %v4547_v12  ;;  %v7833_v54 = vcombine.high %v5178_v5, %v5182_v6  ;;  %v7835_v12 = vcombine.high %v5179_v7, %v5183_v8  ;;  %v5207_v6 = vld [vmem:[#allocation22 + $0x268] sm:$0xff] }
 0xc99   :  { %4989 = vmatprep.mubr.bf16.mxu0 %v4550_v62  ;;  %5030 = vmatprep.mubr.bf16.mxu1 %v4550_v62  ;;  %v5186_v62 = vld [vmem:[#allocation22 + $0x1c0] sm:$0xff] }
 0xc9a   :  { %4990 = vmatmul.mubr.bf16.vlgmr.msra.gmra.mrb[16].mxu0 %v4549_v53  ;;  %5031 = vmatmul.mubr.bf16.vlgmr.msra.gmra.mrb[28].mxu1 %v4549_v53  ;;  %v5190_v53 = vld [vmem:[#allocation22 + $0x1e0] sm:$0xff] }
 0xc9b   :  { %6709 = vmatpush1.bf16.msra.mxu0 %v7784_v24  ;;  %6791 = vmatpush1.bf16.msra.mxu1 %v7786_v19  ;;  %v7834_v24 = vcombine.low %v5179_v7, %v5183_v8  ;;  %v7841_v16 = vcombine.high %v5186_v62, %v5190_v53  ;;  %v5195_v19 = vld [vmem:[#allocation22 + $0x208] sm:$0xff] }
 0xc9c   :  { %6710 = vmatprep.subr.bf16.mxu0 %v7793_v20  ;;  %6792 = vmatprep.subr.bf16.mxu1 %v7795_v26  ;;  %v7840_v20 = vcombine.low %v5186_v62, %v5190_v53  ;;  %v7851_v32 = vcombine.high %v5195_v19, %v5199_v14  ;;  %v7848_v26 = vcombine.low %v5194_v60, %v5198_v17  ;;  %v5215_v53 = vld [vmem:[#allocation22 + $0x2a8] sm:$0xff] }
 0xc9d   :  { %v7850_v22 = vcombine.low %v5195_v19, %v5199_v14  ;;  %v5223_v17 = vld [vmem:[#allocation22 + $0x2e8] sm:$0xff] }
 0xc9f   :  { %6711 = vmatpush1.bf16.msra.mxu0 %v7792_v29  ;;  %6793 = vmatpush1.bf16.msra.mxu1 %v7794_v30  ;;  %v4628_v29 = vrot.slane %v4615_v27, %v9521_v52  ;;  %v4624_v30 = vrot.slane %v4615_v27, %v9514_v48  ;;  %v5234_v27 = vld [vmem:[#allocation22 + $0x340] sm:$0xff] }
 0xca0   :  { %6712 = vmatprep.subr.bf16.mxu0 %v7801_v31  ;;  %6794 = vmatprep.subr.bf16.mxu1 %v7803_v33 }
 0xca3   :  { %6713 = vmatpush1.bf16.msra.mxu0 %v7800_v38  ;;  %6795 = vmatpush1.bf16.msra.mxu1 %v7802_v39 }
 0xca4   :  { %6714 = vmatprep.subr.bf16.mxu0 %v7809_v41  ;;  %6796 = vmatprep.subr.bf16.mxu1 %v7811_v42 }
 0xca7   :  { %6715 = vmatpush1.bf16.msra.mxu0 %v7808_v50  ;;  %6797 = vmatpush1.bf16.msra.mxu1 %v7810_v51 }
 0xca8   :  { %6716 = vmatprep.subr.bf16.mxu0 %v7817_v55  ;;  %6798 = vmatprep.subr.bf16.mxu1 %v7819_v58 }
 0xcab   :  { %6717 = vmatpush1.bf16.msra.mxu0 %v7816_v43  ;;  %6799 = vmatpush1.bf16.msra.mxu1 %v7818_v18  ;;  %v5202_v18 = vld [vmem:[#allocation22 + $0x240] sm:$0xff] }
 0xcac   :  { %6718 = vmatprep.subr.bf16.mxu0 %v7825_v2  ;;  %6800 = vmatprep.subr.bf16.mxu1 %v7827_v3  ;;  %v5206_v2 = vld [vmem:[#allocation22 + $0x260] sm:$0xff]  ;;  %v5203_v3 = vld [vmem:[#allocation22 + $0x248] sm:$0xff] }
 0xcad   :  { %v7857_v5 = vcombine.high %v5202_v18, %v5206_v2  ;;  %v7856_v7 = vcombine.low %v5202_v18, %v5206_v2  ;;  %v7858_v8 = vcombine.low %v5203_v3, %v5207_v6 }
 0xcaf   :  { %6719 = vmatpush1.bf16.msra.mxu0 %v7824_v9  ;;  %6801 = vmatpush1.bf16.msra.mxu1 %v7826_v10  ;;  %v7859_v9 = vcombine.high %v5203_v3, %v5207_v6  ;;  %v5210_v10 = vld [vmem:[#allocation22 + $0x280] sm:$0xff] }
 0xcb0   :  { %6720 = vmatprep.subr.bf16.mxu0 %v7833_v54  ;;  %6802 = vmatprep.subr.bf16.mxu1 %v7835_v12  ;;  %v5214_v54 = vld [vmem:[#allocation22 + $0x2a0] sm:$0xff]  ;;  %v5211_v12 = vld [vmem:[#allocation22 + $0x288] sm:$0xff] }
 0xcb1   :  { %v7865_v62 = vcombine.high %v5210_v10, %v5214_v54  ;;  %v7864_v23 = vcombine.low %v5210_v10, %v5214_v54  ;;  %v7866_v13 = vcombine.low %v5211_v12, %v5215_v53  ;;  %v9788_v6 = vld [vmem:[#allocation22 + $0x400] sm:$0xff]  ;;  %v9796_v10 = vld [vmem:[#allocation22 + $0x428] sm:$0xff] }
 0xcb3   :  { %6721 = vmatpush1.bf16.msra.mxu0 %v7832_v4  ;;  %6803 = vmatpush1.bf16.msra.mxu1 %v7834_v24  ;;  %v7867_v4 = vcombine.high %v5211_v12, %v5215_v53  ;;  %v5218_v24 = vld [vmem:[#allocation22 + $0x2c0] sm:$0xff] }
 0xcb4   :  { %6722 = vmatprep.subr.bf16.mxu0 %v7841_v16  ;;  %6804 = vmatprep.subr.bf16.mxu1 %v7843_v25  ;;  %v5222_v16 = vld [vmem:[#allocation22 + $0x2e0] sm:$0xff]  ;;  %v5219_v25 = vld [vmem:[#allocation22 + $0x2c8] sm:$0xff] }
 0xcb5   :  { %v7873_v60 = vcombine.high %v5218_v24, %v5222_v16  ;;  %v7872_v19 = vcombine.low %v5218_v24, %v5222_v16  ;;  %v7874_v14 = vcombine.low %v5219_v25, %v5223_v17 }
 0xcb7   :  { %6723 = vmatpush1.bf16.msra.mxu0 %v7840_v20  ;;  %6805 = vmatpush1.bf16.msra.mxu1 %v7842_v15  ;;  %v7875_v20 = vcombine.high %v5219_v25, %v5223_v17  ;;  %v5226_v15 = vld [vmem:[#allocation22 + $0x300] sm:$0xff]  ;;  %v5069_v17 = vld [vmem:[#allocation21 + $0x1] ss:$4 sm:$0xf] }
 0xcb8   :  { %6724 = vmatprep.subr.bf16.mxu0 %v7849_v21  ;;  %6806 = vmatprep.subr.bf16.mxu1 %v7851_v32  ;;  %v5230_v21 = vld [vmem:[#allocation22 + $0x320] sm:$0xff]  ;;  %v5227_v32 = vld [vmem:[#allocation22 + $0x308] sm:$0xff] }
 0xcbb   :  { %6725 = vmatpush1.bf16.msra.mxu0 %v7848_v26  ;;  %6807 = vmatpush1.bf16.msra.mxu1 %v7850_v22  ;;  %v7881_v26 = vcombine.high %v5226_v15, %v5230_v21  ;;  %v5231_v22 = vld [vmem:[#allocation22 + $0x328] sm:$0xff] }
 0xcbc   :  { %6726 = vmatprep.subr.bf16.mxu0 %v7857_v5  ;;  %6808 = vmatprep.subr.bf16.mxu1 %v7859_v9 }
 0xcbf   :  { %6727 = vmatpush1.bf16.msra.mxu0 %v7856_v7  ;;  %6809 = vmatpush1.bf16.msra.mxu1 %v7858_v8  ;;  %v9790_v7 = vld [vmem:[#allocation22 + $0x420] sm:$0xff]  ;;  %v9792_v8 = vld [vmem:[#allocation22 + $0x408] sm:$0xff] }
 0xcc0   :  { %6728 = vmatprep.subr.bf16.mxu0 %v7865_v62  ;;  %6810 = vmatprep.subr.bf16.mxu1 %v7867_v4  ;;  %v7913_v9 = vcombine.high %v9788_v6, %v9790_v7  ;;  %v7912_v54 = vcombine.low %v9788_v6, %v9790_v7  ;;  %v7914_v12 = vcombine.low %v9792_v8, %v9796_v10  ;;  %v5275_v6 = vld [vmem:[#allocation22 + $0x488] sm:$0xff] }
 0xcc1   :  { %v7915_v62 = vcombine.high %v9792_v8, %v9796_v10  ;;  %v5279_v7 = vld [vmem:[#allocation22 + $0x4a8] sm:$0xff] }
 0xcc3   :  { %6729 = vmatpush1.bf16.msra.mxu0 %v7864_v23  ;;  %6811 = vmatpush1.bf16.msra.mxu1 %v7866_v13 }
 0xcc4   :  { %6730 = vmatprep.subr.bf16.mxu0 %v7873_v60  ;;  %6812 = vmatprep.subr.bf16.mxu1 %v7875_v20  ;;  %v5074_v20 = vrot.slane %v5069_v17, %v9512_v47 }
 0xcc7   :  { %6731 = vmatpush1.bf16.msra.mxu0 %v7872_v19  ;;  %6813 = vmatpush1.bf16.msra.mxu1 %v7874_v14  ;;  %v5096_v19 = vld [vmem:[#allocation21 + $0x2] ss:$4 sm:$0xf]  ;;  %v5078_v14 = vrot.slane %v5069_v17, %v9514_v48 }
 0xcc8   :  { %6732 = vmatprep.subr.bf16.mxu0 %v7881_v26 }
 0xd6d   :  { %v4991_v31 = vpop.f32.mrb[16].mxu0  ;;  %v5032_v33 = vpop.f32.mrb[28].mxu1 }
 0xd6e   :  { %v9768_v35 = vadd.f32 %v4991_v31, %v4620_v28  ;;  %v4993_v36 = vpop.f32.mrb[17].mxu0  ;;  %v5034_v37 = vpop.f32.mrb[29].mxu1  ;;  %v9770_v38 = vadd.f32 %v5032_v33, %v4628_v29  ;;  %v5238_v28 = vld [vmem:[#allocation22 + $0x360] sm:$0xff]  ;;  %v7880_v29 = vcombine.low %v5226_v15, %v5230_v21  ;;  %v5235_v31 = vld [vmem:[#allocation22 + $0x348] sm:$0xff]  ;;  %v5086_v15 = vrot.slane %v5069_v17, %v9528_v56 }
 0xd6f   :  { %v9772_v39 = vadd.f32 %v4993_v36, %v4624_v30  ;;  %v4995_v41 = vpop.f32.mrb[18].mxu0  ;;  %v5036_v42 = vpop.f32.mrb[30].mxu1  ;;  %v9780_v51 = vadd.f32 %v5034_v37, %v4632_v34  ;;  %v7883_v30 = vcombine.high %v5227_v32, %v5231_v22  ;;  %v5239_v33 = vld [vmem:[#allocation22 + $0x368] sm:$0xff]  ;;  %v7882_v34 = vcombine.low %v5227_v32, %v5231_v22 }
 0xd70   :  { %v5045_v44 = vmul.f32 %v9768_v35, %v9768_v35  ;;  %v4996_v45 = vpop.f32.mrb[19].mxu0  ;;  %v5037_v46 = vpop.f32.mrb[31].mxu1  ;;  %v5047_v55 = vmul.f32 %v9770_v38, %v9770_v38  ;;  %v7889_v36 = vcombine.high %v5234_v27, %v5238_v28  ;;  %v7891_v37 = vcombine.high %v5235_v31, %v5239_v33  ;;  %v5242_v41 = vld [vmem:[#allocation22 + $0x380] sm:$0xff]  ;;  %6733 = vmatpush1.bf16.msra.mxu0 %v7880_v29 }
 0xd71   :  { %v5039_v49 = vadd.f32 %v9772_v39, %v9768_v35  ;;  %v5046_v50 = vmul.f32 %v9772_v39, %v9772_v39  ;;  %v5048_v57 = vmul.f32 %v9780_v51, %v9780_v51  ;;  %6814 = vmatprep.subr.bf16.mxu1 %v7883_v30  ;;  %v5246_v42 = vld [vmem:[#allocation22 + $0x3a0] sm:$0xff]  ;;  %v5247_v45 = vld [vmem:[#allocation22 + $0x3a8] sm:$0xff]  ;;  %v7888_v46 = vcombine.low %v5234_v27, %v5238_v28 }
 0xd72   :  { %6815 = vmatpush1.bf16.msra.mxu1 %v7882_v34  ;;  %6734 = vmatprep.subr.bf16.mxu0 %v7889_v36  ;;  %v5082_v21 = vrot.slane %v5069_v17, %v9521_v52  ;;  %v5105_v29 = vrot.slane %v5096_v19, %v9514_v48  ;;  %v5101_v30 = vrot.slane %v5096_v19, %v9512_v47  ;;  %v5294_v17 = vld [vmem:[#allocation22 + $0x520] sm:$0xff] }
 0xd73   :  { %v5040_v58 = vadd.f32 %v5039_v49, %v9770_v38  ;;  %v5049_v40 = vadd.f32 %v5046_v50, %v5045_v44  ;;  %v5243_v44 = vld [vmem:[#allocation22 + $0x388] sm:$0xff]  ;;  %v7890_v49 = vcombine.low %v5235_v31, %v5239_v33  ;;  %v7897_v50 = vcombine.high %v5242_v41, %v5246_v42  ;;  %6816 = vmatprep.subr.bf16.mxu1 %v7891_v37 }
 0xd74   :  { %6735 = vmatpush1.bf16.msra.mxu0 %v7888_v46  ;;  %v5113_v31 = vrot.slane %v5096_v19, %v9528_v56  ;;  %v5109_v33 = vrot.slane %v5096_v19, %v9521_v52  ;;  %v5291_v19 = vld [vmem:[#allocation22 + $0x508] sm:$0xff] }
 0xd75   :  { %v5041_v59 = vadd.f32 %v5040_v58, %v9780_v51  ;;  %v5050_v61 = vadd.f32 %v5049_v40, %v5047_v55  ;;  %v7899_v55 = vcombine.high %v5243_v44, %v5247_v45  ;;  %v5250_v58 = vld [vmem:[#allocation22 + $0x3c0] sm:$0xff]  ;;  %6736 = vmatprep.subr.bf16.mxu0 %v7897_v50 }
 0xd76   :  { %v5254_v40 = vld [vmem:[#allocation22 + $0x3e0] sm:$0xff]  ;;  %6817 = vmatpush1.bf16.msra.mxu1 %v7890_v49 }
 0xd77   :  { %5042 = vadd.xlane.f32.xlu0 %v5041_v59  ;;  %v5051_v43 = vadd.f32 %v5050_v61, %v5048_v57  ;;  %v5251_v59 = vld [vmem:[#allocation22 + $0x3c8] sm:$0xff]  ;;  %v7896_v61 = vcombine.low %v5242_v41, %v5246_v42  ;;  %v7905_v18 = vcombine.high %v5250_v58, %v5254_v40  ;;  %6818 = vmatprep.subr.bf16.mxu1 %v7899_v55  ;;  %v5266_v55 = vld [vmem:[#allocation22 + $0x440] sm:$0xff] }
 0xd78   :  { %v5255_v57 = vld [vmem:[#allocation22 + $0x3e8] sm:$0xff]  ;;  %v7904_v3 = vcombine.low %v5250_v58, %v5254_v40  ;;  %v5270_v40 = vld [vmem:[#allocation22 + $0x460] sm:$0xff] }
 0xd79   :  { %5052 = vadd.xlane.f32.xlu1 %v5051_v43  ;;  %v7898_v43 = vcombine.low %v5243_v44, %v5247_v45  ;;  %v7907_v2 = vcombine.high %v5251_v59, %v5255_v57  ;;  %6737 = vmatpush1.bf16.msra.mxu0 %v7896_v61  ;;  %v7906_v5 = vcombine.low %v5251_v59, %v5255_v57  ;;  %v5267_v59 = vld [vmem:[#allocation22 + $0x448] sm:$0xff] }
 0xd7a   :  { %6738 = vmatprep.subr.bf16.mxu0 %v7905_v18  ;;  %v5271_v57 = vld [vmem:[#allocation22 + $0x468] sm:$0xff]  ;;  %v5274_v18 = vld [vmem:[#allocation22 + $0x480] sm:$0xff] }
 0xd7b   :  { %6819 = vmatpush1.bf16.msra.mxu1 %v7898_v43  ;;  %v7922_v10 = vcombine.low %v5267_v59, %v5271_v57 }
 0xd7c   :  { %6820 = vmatprep.subr.bf16.mxu1 %v7907_v2  ;;  %v7921_v2 = vcombine.high %v5266_v55, %v5270_v40 }
 0xd7d   :  { %6739 = vmatpush1.bf16.msra.mxu0 %v7904_v3  ;;  %v7923_v3 = vcombine.high %v5267_v59, %v5271_v57  ;;  %v5322_v59 = vld [vmem:[#allocation22 + $0x600] sm:$0xff] }
 0xd7e   :  { %6749 = vmatprep.subr.bf16.mxu0 %v7913_v9  ;;  %v7920_v9 = vcombine.low %v5266_v55, %v5270_v40  ;;  %v5326_v57 = vld [vmem:[#allocation22 + $0x620] sm:$0xff] }
 0xd7f   :  { %6821 = vmatpush1.bf16.msra.mxu1 %v7906_v5  ;;  %v5278_v5 = vld [vmem:[#allocation22 + $0x4a0] sm:$0xff] }
 0xd80   :  { %6831 = vmatprep.subr.bf16.mxu1 %v7915_v62  ;;  %v7929_v62 = vcombine.high %v5274_v18, %v5278_v5 }
 0xe04   :  { %v5043_v53 = vpop.xlane.xlu0 %5042 }
 0xe05   :  { %v5044_v23 = vmul.f32 0.001953125, %v5043_v53  ;;  %v7931_v53 = vcombine.high %v5275_v6, %v5279_v7 }
 0xe06   :  { %v5053_v13 = vpop.xlane.xlu1 %5052 }
 0xe07   :  { %v5054_v4 = vmul.f32 0.001953125, %v5053_v13  ;;  %v5055_v24 = vmul.f32 %v5044_v23, %v5044_v23  ;;  %v5060_v32 = vsub.f32 %v9768_v35, %v5044_v23  ;;  %v5061_v26 = vsub.f32 %v9772_v39, %v5044_v23  ;;  %v5286_v13 = vld [vmem:[#allocation22 + $0x4e0] sm:$0xff] }
 0xe08   :  { %v5062_v22 = vsub.f32 %v9770_v38, %v5044_v23  ;;  %v5063_v27 = vsub.f32 %v9780_v51, %v5044_v23  ;;  %v5282_v23 = vld [vmem:[#allocation22 + $0x4c0] sm:$0xff] }
 0xe09   :  { %v5056_v16 = vsub.f32 %v5054_v4, %v5055_v24  ;;  %v5283_v4 = vld [vmem:[#allocation22 + $0x4c8] sm:$0xff] }
 0xe0a   :  { %v5287_v24 = vld [vmem:[#allocation22 + $0x4e8] sm:$0xff] }
 0xe0b   :  { %v5057_v25 = vmax.f32 %v5056_v16, 0.0  ;;  %v7928_v16 = vcombine.low %v5274_v18, %v5278_v5  ;;  %v5323_v18 = vld [vmem:[#allocation22 + $0x608] sm:$0xff] }
 0xe0d   :  { %v5058_v60 = vadd.f32 1e-05, %v5057_v25  ;;  %v7930_v25 = vcombine.low %v5275_v6, %v5279_v7  ;;  %v7977_v6 = vcombine.high %v5322_v59, %v5326_v57 }
 0xe0f   :  { %8849 = vrsqrt.f32 %v5058_v60  ;;  %v5290_v60 = vld [vmem:[#allocation22 + $0x500] sm:$0xff] }
 0xe19   :  { %v8850_v28 = vpop.eup %8849 }
 0xe1a   :  { %v5065_v34 = vmul.f32 %v8850_v28, %v5061_v26  ;;  %v5064_v36 = vmul.f32 %v8850_v28, %v5060_v32  ;;  %v5067_v37 = vmul.f32 %v8850_v28, %v5063_v27  ;;  %v5066_v41 = vmul.f32 %v8850_v28, %v5062_v22  ;;  %v5298_v26 = vld [vmem:[#allocation22 + $0x540] sm:$0xff]  ;;  %v5299_v27 = vld [vmem:[#allocation22 + $0x548] sm:$0xff] }
 0xe1b   :  { %v5302_v22 = vld [vmem:[#allocation22 + $0x560] sm:$0xff]  ;;  %v5303_v28 = vld [vmem:[#allocation22 + $0x568] sm:$0xff] }
 0xe1c   :  { %v5092_v35 = vmul.f32 %v5078_v14, %v5065_v34  ;;  %v5091_v42 = vmul.f32 %v5074_v20, %v5064_v36  ;;  %v5094_v39 = vmul.f32 %v5086_v15, %v5067_v37  ;;  %v5093_v44 = vmul.f32 %v5082_v21, %v5066_v41  ;;  %v5295_v14 = vld [vmem:[#allocation22 + $0x528] sm:$0xff]  ;;  %v5306_v34 = vld [vmem:[#allocation22 + $0x580] sm:$0xff] }
 0xe1d   :  { %v7936_v20 = vcombine.low %v5282_v23, %v5286_v13  ;;  %v7938_v15 = vcombine.low %v5283_v4, %v5287_v24  ;;  %v7945_v21 = vcombine.high %v5290_v60, %v5294_v17  ;;  %v7947_v32 = vcombine.high %v5291_v19, %v5295_v14  ;;  %v5310_v36 = vld [vmem:[#allocation22 + $0x5a0] sm:$0xff]  ;;  %v5307_v37 = vld [vmem:[#allocation22 + $0x588] sm:$0xff] }
 0xe1e   :  { %v5119_v38 = vadd.f32 %v5105_v29, %v5092_v35  ;;  %v5118_v45 = vadd.f32 %v5101_v30, %v5091_v42  ;;  %v5121_v51 = vadd.f32 %v5113_v31, %v5094_v39  ;;  %v9816_v46 = vadd.f32 %v5109_v33, %v5093_v44  ;;  %v5311_v41 = vld [vmem:[#allocation22 + $0x5a8] sm:$0xff] }
 0xe1f   :  { %v7944_v29 = vcombine.low %v5290_v60, %v5294_v17  ;;  %v7946_v30 = vcombine.low %v5291_v19, %v5295_v14  ;;  %v7953_v31 = vcombine.high %v5298_v26, %v5302_v22  ;;  %v7955_v33 = vcombine.high %v5299_v27, %v5303_v28 }
 0xe20   :  { %v5123_v49 = vmax.f32 %v5119_v38, 0.0  ;;  %v5122_v50 = vmax.f32 %v5118_v45, 0.0  ;;  %v5125_v58 = vmax.f32 %v5121_v51, 0.0  ;;  %v7952_v35 = vcombine.low %v5298_v26, %v5302_v22  ;;  %v5314_v38 = vld [vmem:[#allocation22 + $0x5c0] sm:$0xff]  ;;  %v5315_v51 = vld [vmem:[#allocation22 + $0x5c8] sm:$0xff] }
 0xe21   :  { %v7954_v42 = vcombine.low %v5299_v27, %v5303_v28  ;;  %v7961_v39 = vcombine.high %v5306_v34, %v5310_v36  ;;  %v7963_v44 = vcombine.high %v5307_v37, %v5311_v41  ;;  %v5318_v45 = vld [vmem:[#allocation22 + $0x5e0] sm:$0xff]  ;;  %v7962_v55 = vcombine.low %v5307_v37, %v5311_v41 }
 0xe22   :  { %v9818_v61 = vpack.c.bf16 %v5123_v49, %v5123_v49  ;;  %v9820_v43 = vpack.c.bf16 %v5122_v50, %v5122_v50  ;;  %v9826_v8 = vpack.c.bf16 %v5125_v58, %v5125_v58  ;;  %v5319_v49 = vld [vmem:[#allocation22 + $0x5e8] sm:$0xff]  ;;  %v7960_v50 = vcombine.low %v5306_v34, %v5310_v36 }
 0xe23   :  { %v7969_v58 = vcombine.high %v5314_v38, %v5318_v45  ;;  %v7971_v40 = vcombine.high %v5315_v51, %v5319_v49  ;;  %v7970_v5 = vcombine.low %v5315_v51, %v5319_v49 }
 0xe24   :  { %6740 = vmatprep.mubr.bf16.mxu0 %v9818_v61  ;;  %6822 = vmatprep.mubr.bf16.mxu1 %v9818_v61 }
 0xe25   :  { %6741 = vmatmul.mubr.bf16.vlgmr.msra.gmra.mrb[20].mxu0 %v9820_v43  ;;  %6823 = vmatmul.mubr.bf16.vlgmr.msra.gmra.mrb[32].mxu1 %v9820_v43 }
 0xe26   :  { %6750 = vmatpush1.bf16.msra.mxu0 %v7912_v54  ;;  %6832 = vmatpush1.bf16.msra.mxu1 %v7914_v12  ;;  %v7937_v54 = vcombine.high %v5282_v23, %v5286_v13  ;;  %v7939_v12 = vcombine.high %v5283_v4, %v5287_v24  ;;  %v7976_v23 = vcombine.low %v5322_v59, %v5326_v57 }
 0xe27   :  { %6781 = vmatprep.mubr.bf16.mxu0 %v9826_v8  ;;  %6863 = vmatprep.mubr.bf16.mxu1 %v9826_v8 }
 0xe28   :  { %6751 = vmatprep.subr.bf16.mxu0 %v7921_v2  ;;  %6833 = vmatprep.subr.bf16.mxu1 %v7923_v3  ;;  %v5327_v2 = vld [vmem:[#allocation22 + $0x628] sm:$0xff]  ;;  %v7968_v3 = vcombine.low %v5314_v38, %v5318_v45 }
 0xe29   :  { %v7979_v7 = vcombine.high %v5323_v18, %v5327_v2  ;;  %v7978_v13 = vcombine.low %v5323_v18, %v5327_v2 }
 0xe2a   :  { %6752 = vmatpush1.bf16.msra.mxu0 %v7920_v9  ;;  %6834 = vmatpush1.bf16.msra.mxu1 %v7922_v10  ;;  %v5330_v9 = vld [vmem:[#allocation22 + $0x640] sm:$0xff] }
 0xe2b   :  { %6753 = vmatprep.subr.bf16.mxu0 %v7929_v62  ;;  %6835 = vmatprep.subr.bf16.mxu1 %v7931_v53  ;;  %v5334_v10 = vld [vmem:[#allocation22 + $0x660] sm:$0xff]  ;;  %v5331_v62 = vld [vmem:[#allocation22 + $0x648] sm:$0xff] }
 0xe2c   :  { %v5335_v53 = vld [vmem:[#allocation22 + $0x668] sm:$0xff]  ;;  %v7985_v4 = vcombine.high %v5330_v9, %v5334_v10  ;;  %v7984_v60 = vcombine.low %v5330_v9, %v5334_v10 }
 0xe2d   :  { %v7987_v24 = vcombine.high %v5331_v62, %v5335_v53  ;;  %v7986_v17 = vcombine.low %v5331_v62, %v5335_v53 }
 0xe2e   :  { %6754 = vmatpush1.bf16.msra.mxu0 %v7928_v16  ;;  %6836 = vmatpush1.bf16.msra.mxu1 %v7930_v25  ;;  %v5338_v16 = vld [vmem:[#allocation22 + $0x680] sm:$0xff] }
 0xe2f   :  { %6755 = vmatprep.subr.bf16.mxu0 %v7937_v54  ;;  %6837 = vmatprep.subr.bf16.mxu1 %v7939_v12  ;;  %v5342_v25 = vld [vmem:[#allocation22 + $0x6a0] sm:$0xff]  ;;  %v5339_v54 = vld [vmem:[#allocation22 + $0x688] sm:$0xff] }
 0xe30   :  { %v5343_v12 = vld [vmem:[#allocation22 + $0x6a8] sm:$0xff]  ;;  %v7993_v19 = vcombine.high %v5338_v16, %v5342_v25  ;;  %v7992_v26 = vcombine.low %v5338_v16, %v5342_v25 }
 0xe31   :  { %v7995_v14 = vcombine.high %v5339_v54, %v5343_v12  ;;  %v7994_v22 = vcombine.low %v5339_v54, %v5343_v12  ;;  %v5124_v54 = vmax.f32 %v9816_v46, 0.0  ;;  %v5149_v46 = vld [vmem:[#allocation22 + $0x98] sm:$0xff] }
 0xe32   :  { %6756 = vmatpush1.bf16.msra.mxu0 %v7936_v20  ;;  %6838 = vmatpush1.bf16.msra.mxu1 %v7938_v15  ;;  %v5346_v20 = vld [vmem:[#allocation22 + $0x6c0] sm:$0xff] }
 0xe33   :  { %6757 = vmatprep.subr.bf16.mxu0 %v7945_v21  ;;  %6839 = vmatprep.subr.bf16.mxu1 %v7947_v32  ;;  %v5350_v15 = vld [vmem:[#allocation22 + $0x6e0] sm:$0xff]  ;;  %v5347_v21 = vld [vmem:[#allocation22 + $0x6c8] sm:$0xff] }
 0xe34   :  { %v5351_v32 = vld [vmem:[#allocation22 + $0x6e8] sm:$0xff]  ;;  %v8001_v27 = vcombine.high %v5346_v20, %v5350_v15  ;;  %v8000_v34 = vcombine.low %v5346_v20, %v5350_v15  ;;  %v5145_v20 = vld [vmem:[#allocation22 + $0x78] sm:$0xff] }
 0xe35   :  { %v8003_v28 = vcombine.high %v5347_v21, %v5351_v32  ;;  %v8002_v36 = vcombine.low %v5347_v21, %v5351_v32  ;;  %v9831_v21 = vpack.c.bf16 %v5124_v54, %v5124_v54  ;;  %v5189_v54 = vld [vmem:[#allocation22 + $0x1d8] sm:$0xff] }
 0xe36   :  { %6758 = vmatpush1.bf16.msra.mxu0 %v7944_v29  ;;  %6840 = vmatpush1.bf16.msra.mxu1 %v7946_v30  ;;  %v5354_v29 = vld [vmem:[#allocation22 + $0x700] sm:$0xff] }
 0xe37   :  { %6759 = vmatprep.subr.bf16.mxu0 %v7953_v31  ;;  %6841 = vmatprep.subr.bf16.mxu1 %v7955_v33  ;;  %v5358_v30 = vld [vmem:[#allocation22 + $0x720] sm:$0xff]  ;;  %v5355_v31 = vld [vmem:[#allocation22 + $0x708] sm:$0xff] }
 0xe38   :  { %v5359_v33 = vld [vmem:[#allocation22 + $0x728] sm:$0xff]  ;;  %v8009_v37 = vcombine.high %v5354_v29, %v5358_v30  ;;  %v8008_v38 = vcombine.low %v5354_v29, %v5358_v30  ;;  %v5153_v29 = vld [vmem:[#allocation22 + $0xb8] sm:$0xff] }
 0xe39   :  { %v8011_v41 = vcombine.high %v5355_v31, %v5359_v33  ;;  %v8010_v45 = vcombine.low %v5355_v31, %v5359_v33 }
 0xe3a   :  { %6760 = vmatpush1.bf16.msra.mxu0 %v7952_v35  ;;  %6842 = vmatpush1.bf16.msra.mxu1 %v7954_v42  ;;  %v5362_v35 = vld [vmem:[#allocation22 + $0x740] sm:$0xff] }
 0xe3b   :  { %6761 = vmatprep.subr.bf16.mxu0 %v7961_v39  ;;  %6843 = vmatprep.subr.bf16.mxu1 %v7963_v44  ;;  %v5366_v42 = vld [vmem:[#allocation22 + $0x760] sm:$0xff]  ;;  %v5363_v39 = vld [vmem:[#allocation22 + $0x748] sm:$0xff] }
 0xe3c   :  { %v5367_v44 = vld [vmem:[#allocation22 + $0x768] sm:$0xff]  ;;  %v8017_v51 = vcombine.high %v5362_v35, %v5366_v42  ;;  %v8016_v59 = vcombine.low %v5362_v35, %v5366_v42  ;;  %v5161_v35 = vld [vmem:[#allocation22 + $0xf8] sm:$0xff] }
 0xe3d   :  { %v8019_v49 = vcombine.high %v5363_v39, %v5367_v44  ;;  %v8018_v57 = vcombine.low %v5363_v39, %v5367_v44  ;;  %v7806_v39 = vcombine.low %v5149_v46, %v5153_v29 }
 0xe3e   :  { %6762 = vmatpush1.bf16.msra.mxu0 %v7960_v50  ;;  %6844 = vmatpush1.bf16.msra.mxu1 %v7962_v55  ;;  %v5370_v50 = vld [vmem:[#allocation22 + $0x780] sm:$0xff] }
 0xe3f   :  { %6763 = vmatprep.subr.bf16.mxu0 %v7969_v58  ;;  %6845 = vmatprep.subr.bf16.mxu1 %v7971_v40  ;;  %v5374_v55 = vld [vmem:[#allocation22 + $0x7a0] sm:$0xff]  ;;  %v5371_v58 = vld [vmem:[#allocation22 + $0x788] sm:$0xff] }
 0xe40   :  { %v5375_v40 = vld [vmem:[#allocation22 + $0x7a8] sm:$0xff]  ;;  %v8025_v18 = vcombine.high %v5370_v50, %v5374_v55  ;;  %v8024_v9 = vcombine.low %v5370_v50, %v5374_v55 }
 0xe41   :  { %v8027_v2 = vcombine.high %v5371_v58, %v5375_v40  ;;  %v8026_v10 = vcombine.low %v5371_v58, %v5375_v40 }
 0xe42   :  { %6764 = vmatpush1.bf16.msra.mxu0 %v7968_v3  ;;  %6846 = vmatpush1.bf16.msra.mxu1 %v7970_v5  ;;  %v5378_v3 = vld [vmem:[#allocation22 + $0x7c0] sm:$0xff] }
 0xe43   :  { %6765 = vmatprep.subr.bf16.mxu0 %v7977_v6  ;;  %6847 = vmatprep.subr.bf16.mxu1 %v7979_v7  ;;  %v5382_v5 = vld [vmem:[#allocation22 + $0x7e0] sm:$0xff]  ;;  %v5379_v6 = vld [vmem:[#allocation22 + $0x7c8] sm:$0xff] }
 0xe44   :  { %v5383_v7 = vld [vmem:[#allocation22 + $0x7e8] sm:$0xff]  ;;  %v8033_v62 = vcombine.high %v5378_v3, %v5382_v5  ;;  %v8032_v16 = vcombine.low %v5378_v3, %v5382_v5 }
 0xe45   :  { %v8035_v53 = vcombine.high %v5379_v6, %v5383_v7  ;;  %v8034_v25 = vcombine.low %v5379_v6, %v5383_v7 }
 0xe46   :  { %6766 = vmatpush1.bf16.msra.mxu0 %v7976_v23  ;;  %6848 = vmatpush1.bf16.msra.mxu1 %v7978_v13  ;;  %v5132_v23 = vld [vmem:[#allocation22 + $0x10] sm:$0xff] }
 0xe47   :  { %6767 = vmatprep.subr.bf16.mxu0 %v7985_v4  ;;  %6849 = vmatprep.subr.bf16.mxu1 %v7987_v24  ;;  %v5136_v13 = vld [vmem:[#allocation22 + $0x30] sm:$0xff]  ;;  %v5133_v4 = vld [vmem:[#allocation22 + $0x18] sm:$0xff] }
 0xe48   :  { %v5137_v24 = vld [vmem:[#allocation22 + $0x38] sm:$0xff]  ;;  %v7789_v12 = vcombine.high %v5132_v23, %v5136_v13  ;;  %v7788_v15 = vcombine.low %v5132_v23, %v5136_v13 }
 0xe49   :  { %v7790_v32 = vcombine.low %v5133_v4, %v5137_v24 }
 0xe4a   :  { %6768 = vmatpush1.bf16.msra.mxu0 %v7984_v60  ;;  %6850 = vmatpush1.bf16.msra.mxu1 %v7986_v17  ;;  %v7791_v60 = vcombine.high %v5133_v4, %v5137_v24  ;;  %v5140_v17 = vld [vmem:[#allocation22 + $0x50] sm:$0xff] }
 0xe4b   :  { %6769 = vmatprep.subr.bf16.mxu0 %v7993_v19  ;;  %6851 = vmatprep.subr.bf16.mxu1 %v7995_v14  ;;  %v5144_v19 = vld [vmem:[#allocation22 + $0x70] sm:$0xff]  ;;  %v5141_v14 = vld [vmem:[#allocation22 + $0x58] sm:$0xff] }
 0xe4c   :  { %v7796_v30 = vcombine.low %v5140_v17, %v5144_v19  ;;  %v7798_v31 = vcombine.low %v5141_v14, %v5145_v20 }
 0xe4e   :  { %6770 = vmatpush1.bf16.msra.mxu0 %v7992_v26  ;;  %6852 = vmatpush1.bf16.msra.mxu1 %v7994_v22  ;;  %v7797_v26 = vcombine.high %v5140_v17, %v5144_v19  ;;  %v7799_v22 = vcombine.high %v5141_v14, %v5145_v20  ;;  %v5196_v20 = vld [vmem:[#allocation22 + $0x210] sm:$0xff] }
 0xe4f   :  { %6771 = vmatprep.subr.bf16.mxu0 %v8001_v27  ;;  %6853 = vmatprep.subr.bf16.mxu1 %v8003_v28  ;;  %v5148_v27 = vld [vmem:[#allocation22 + $0x90] sm:$0xff] }
 0xe50   :  { %v5152_v28 = vld [vmem:[#allocation22 + $0xb0] sm:$0xff] }
 0xe51   :  { %v7805_v33 = vcombine.high %v5148_v27, %v5152_v28  ;;  %v7804_v42 = vcombine.low %v5148_v27, %v5152_v28 }
 0xe52   :  { %6772 = vmatpush1.bf16.msra.mxu0 %v8000_v34  ;;  %6854 = vmatpush1.bf16.msra.mxu1 %v8002_v36  ;;  %v7807_v34 = vcombine.high %v5149_v46, %v5153_v29  ;;  %v5156_v36 = vld [vmem:[#allocation22 + $0xd0] sm:$0xff] }
 0xe53   :  { %6773 = vmatprep.subr.bf16.mxu0 %v8009_v37  ;;  %6855 = vmatprep.subr.bf16.mxu1 %v8011_v41  ;;  %v5160_v37 = vld [vmem:[#allocation22 + $0xf0] sm:$0xff]  ;;  %v5157_v41 = vld [vmem:[#allocation22 + $0xd8] sm:$0xff] }
 0xe54   :  { %v7813_v44 = vcombine.high %v5156_v36, %v5160_v37  ;;  %v7812_v50 = vcombine.low %v5156_v36, %v5160_v37  ;;  %v7814_v55 = vcombine.low %v5157_v41, %v5161_v35  ;;  %v5204_v29 = vld [vmem:[#allocation22 + $0x250] sm:$0xff] }
 0xe56   :  { %6774 = vmatpush1.bf16.msra.mxu0 %v8008_v38  ;;  %6856 = vmatpush1.bf16.msra.mxu1 %v8010_v45  ;;  %v7815_v38 = vcombine.high %v5157_v41, %v5161_v35  ;;  %v5164_v45 = vld [vmem:[#allocation22 + $0x110] sm:$0xff] }
 0xe57   :  { %6775 = vmatprep.subr.bf16.mxu0 %v8017_v51  ;;  %6857 = vmatprep.subr.bf16.mxu1 %v8019_v49  ;;  %v5168_v51 = vld [vmem:[#allocation22 + $0x130] sm:$0xff]  ;;  %v5169_v49 = vld [vmem:[#allocation22 + $0x138] sm:$0xff] }
 0xe58   :  { %v7821_v58 = vcombine.high %v5164_v45, %v5168_v51  ;;  %v7820_v3 = vcombine.low %v5164_v45, %v5168_v51  ;;  %v5212_v35 = vld [vmem:[#allocation22 + $0x290] sm:$0xff] }
 0xe5a   :  { %6776 = vmatpush1.bf16.msra.mxu0 %v8016_v59  ;;  %6858 = vmatpush1.bf16.msra.mxu1 %v8018_v57  ;;  %v5172_v59 = vld [vmem:[#allocation22 + $0x150] sm:$0xff] }
 0xe5b   :  { %6777 = vmatprep.subr.bf16.mxu0 %v8025_v18  ;;  %6859 = vmatprep.subr.bf16.mxu1 %v8027_v2  ;;  %v5176_v57 = vld [vmem:[#allocation22 + $0x170] sm:$0xff]  ;;  %v5173_v18 = vld [vmem:[#allocation22 + $0x158] sm:$0xff] }
 0xe5c   :  { %v5177_v2 = vld [vmem:[#allocation22 + $0x178] sm:$0xff]  ;;  %v7829_v6 = vcombine.high %v5172_v59, %v5176_v57  ;;  %v7828_v23 = vcombine.low %v5172_v59, %v5176_v57 }
 0xe5d   :  { %v7831_v7 = vcombine.high %v5173_v18, %v5177_v2  ;;  %v7830_v13 = vcombine.low %v5173_v18, %v5177_v2  ;;  %v5228_v2 = vld [vmem:[#allocation22 + $0x310] sm:$0xff] }
 0xe5e   :  { %6778 = vmatpush1.bf16.msra.mxu0 %v8024_v9  ;;  %6860 = vmatpush1.bf16.msra.mxu1 %v8026_v10  ;;  %v5180_v9 = vld [vmem:[#allocation22 + $0x190] sm:$0xff] }
 0xe5f   :  { %6779 = vmatprep.subr.bf16.mxu0 %v8033_v62  ;;  %6861 = vmatprep.subr.bf16.mxu1 %v8035_v53  ;;  %v5184_v10 = vld [vmem:[#allocation22 + $0x1b0] sm:$0xff]  ;;  %v5181_v62 = vld [vmem:[#allocation22 + $0x198] sm:$0xff] }
 0xe60   :  { %v5185_v53 = vld [vmem:[#allocation22 + $0x1b8] sm:$0xff]  ;;  %v7837_v4 = vcombine.high %v5180_v9, %v5184_v10 }
 0xe61   :  { %v7839_v24 = vcombine.high %v5181_v62, %v5185_v53  ;;  %v7838_v17 = vcombine.low %v5181_v62, %v5185_v53  ;;  %v5236_v53 = vld [vmem:[#allocation22 + $0x350] sm:$0xff] }
 0xe62   :  { %6780 = vmatpush1.bf16.msra.mxu0 %v8032_v16  ;;  %6862 = vmatpush1.bf16.msra.mxu1 %v8034_v25  ;;  %v5188_v16 = vld [vmem:[#allocation22 + $0x1d0] sm:$0xff] }
 0xe63   :  { %6872 = vmatprep.subr.bf16.mxu0 %v7789_v12  ;;  %6954 = vmatprep.subr.bf16.mxu1 %v7791_v60  ;;  %v5192_v25 = vld [vmem:[#allocation22 + $0x1f0] sm:$0xff]  ;;  %v5193_v12 = vld [vmem:[#allocation22 + $0x1f8] sm:$0xff]  ;;  %v7836_v60 = vcombine.low %v5180_v9, %v5184_v10 }
 0xe64   :  { %v7845_v19 = vcombine.high %v5188_v16, %v5192_v25  ;;  %v7847_v14 = vcombine.high %v5189_v54, %v5193_v12  ;;  %v7846_v27 = vcombine.low %v5189_v54, %v5193_v12  ;;  %v5244_v12 = vld [vmem:[#allocation22 + $0x390] sm:$0xff] }
 0xe65   :  { %6782 = vmatmul.mubr.bf16.vlgmr.msra.gmra.mrb[20].mxu0 %v9831_v21  ;;  %6864 = vmatmul.mubr.bf16.vlgmr.msra.gmra.mrb[32].mxu1 %v9831_v21 }
 0xe66   :  { %6873 = vmatpush1.bf16.msra.mxu0 %v7788_v15  ;;  %6904 = vmatprep.mubr.bf16.mxu0 %v9818_v61  ;;  %v5200_v15 = vld [vmem:[#allocation22 + $0x230] sm:$0xff] }
 0xe67   :  { %6955 = vmatpush1.bf16.msra.mxu1 %v7790_v32  ;;  %6986 = vmatprep.mubr.bf16.mxu1 %v9818_v61  ;;  %v5165_v61 = vld [vmem:[#allocation22 + $0x118] sm:$0xff]  ;;  %v7853_v28 = vcombine.high %v5196_v20, %v5200_v15 }
 0xe68   :  { %6874 = vmatprep.subr.bf16.mxu0 %v7797_v26  ;;  %6956 = vmatprep.subr.bf16.mxu1 %v7799_v22  ;;  %v7823_v40 = vcombine.high %v5165_v61, %v5169_v49  ;;  %v7822_v5 = vcombine.low %v5165_v61, %v5169_v49  ;;  %v5197_v32 = vld [vmem:[#allocation22 + $0x218] sm:$0xff]  ;;  %v7844_v22 = vcombine.low %v5188_v16, %v5192_v25  ;;  %v5220_v49 = vld [vmem:[#allocation22 + $0x2d0] sm:$0xff] }
 0xe69   :  { %v5201_v26 = vld [vmem:[#allocation22 + $0x238] sm:$0xff] }
 0xe6a   :  { %6875 = vmatpush1.bf16.msra.mxu0 %v7796_v30  ;;  %v7855_v46 = vcombine.high %v5197_v32, %v5201_v26  ;;  %v5208_v30 = vld [vmem:[#allocation22 + $0x270] sm:$0xff]  ;;  %v7854_v36 = vcombine.low %v5197_v32, %v5201_v26 }
 0xe6b   :  { %6957 = vmatpush1.bf16.msra.mxu1 %v7798_v31  ;;  %6876 = vmatprep.subr.bf16.mxu0 %v7805_v33  ;;  %v5205_v31 = vld [vmem:[#allocation22 + $0x258] sm:$0xff]  ;;  %v7861_v37 = vcombine.high %v5204_v29, %v5208_v30  ;;  %v5252_v26 = vld [vmem:[#allocation22 + $0x3d0] sm:$0xff] }
 0xe6c   :  { %6958 = vmatprep.subr.bf16.mxu1 %v7807_v34  ;;  %v5209_v33 = vld [vmem:[#allocation22 + $0x278] sm:$0xff]  ;;  %v7852_v34 = vcombine.low %v5196_v20, %v5200_v15 }
 0xe6d   :  { %v7863_v41 = vcombine.high %v5205_v31, %v5209_v33  ;;  %v7862_v45 = vcombine.low %v5205_v31, %v5209_v33  ;;  %v5260_v33 = vld [vmem:[#allocation22 + $0x410] sm:$0xff] }
 0xe6e   :  { %6877 = vmatpush1.bf16.msra.mxu0 %v7804_v42  ;;  %v5216_v42 = vld [vmem:[#allocation22 + $0x2b0] sm:$0xff] }
 0xe6f   :  { %6959 = vmatpush1.bf16.msra.mxu1 %v7806_v39  ;;  %6878 = vmatprep.subr.bf16.mxu0 %v7813_v44  ;;  %v5213_v39 = vld [vmem:[#allocation22 + $0x298] sm:$0xff]  ;;  %v7869_v51 = vcombine.high %v5212_v35, %v5216_v42 }
 0xe70   :  { %6960 = vmatprep.subr.bf16.mxu1 %v7815_v38  ;;  %v5217_v44 = vld [vmem:[#allocation22 + $0x2b8] sm:$0xff]  ;;  %v7860_v38 = vcombine.low %v5204_v29, %v5208_v30 }
 0xe71   :  { %v7871_v61 = vcombine.high %v5213_v39, %v5217_v44  ;;  %v7870_v59 = vcombine.low %v5213_v39, %v5217_v44  ;;  %v5268_v44 = vld [vmem:[#allocation22 + $0x450] sm:$0xff] }
 0xe72   :  { %6879 = vmatpush1.bf16.msra.mxu0 %v7812_v50  ;;  %v5224_v50 = vld [vmem:[#allocation22 + $0x2f0] sm:$0xff] }
 0xe73   :  { %6961 = vmatpush1.bf16.msra.mxu1 %v7814_v55  ;;  %6880 = vmatprep.subr.bf16.mxu0 %v7821_v58  ;;  %v5221_v55 = vld [vmem:[#allocation22 + $0x2d8] sm:$0xff]  ;;  %v7877_v57 = vcombine.high %v5220_v49, %v5224_v50 }
 0xe74   :  { %6962 = vmatprep.subr.bf16.mxu1 %v7823_v40  ;;  %v5225_v58 = vld [vmem:[#allocation22 + $0x2f8] sm:$0xff]  ;;  %v7868_v40 = vcombine.low %v5212_v35, %v5216_v42 }
 0xe75   :  { %v7879_v18 = vcombine.high %v5221_v55, %v5225_v58  ;;  %v7878_v9 = vcombine.low %v5221_v55, %v5225_v58  ;;  %v5276_v55 = vld [vmem:[#allocation22 + $0x490] sm:$0xff] }
 0xe76   :  { %6881 = vmatpush1.bf16.msra.mxu0 %v7820_v3  ;;  %v5232_v3 = vld [vmem:[#allocation22 + $0x330] sm:$0xff] }
 0xe77   :  { %6963 = vmatpush1.bf16.msra.mxu1 %v7822_v5  ;;  %6882 = vmatprep.subr.bf16.mxu0 %v7829_v6  ;;  %v5229_v5 = vld [vmem:[#allocation22 + $0x318] sm:$0xff]  ;;  %v7885_v10 = vcombine.high %v5228_v2, %v5232_v3  ;;  %v5280_v58 = vld [vmem:[#allocation22 + $0x4b0] sm:$0xff] }
 0xe78   :  { %6964 = vmatprep.subr.bf16.mxu1 %v7831_v7  ;;  %v5233_v6 = vld [vmem:[#allocation22 + $0x338] sm:$0xff]  ;;  %v7876_v7 = vcombine.low %v5220_v49, %v5224_v50 }
 0xe79   :  { %v7887_v62 = vcombine.high %v5229_v5, %v5233_v6  ;;  %v7886_v16 = vcombine.low %v5229_v5, %v5233_v6  ;;  %v5284_v6 = vld [vmem:[#allocation22 + $0x4d0] sm:$0xff] }
 0xe7a   :  { %6883 = vmatpush1.bf16.msra.mxu0 %v7828_v23  ;;  %v5240_v23 = vld [vmem:[#allocation22 + $0x370] sm:$0xff] }
 0xe7b   :  { %6965 = vmatpush1.bf16.msra.mxu1 %v7830_v13  ;;  %6884 = vmatprep.subr.bf16.mxu0 %v7837_v4  ;;  %v5237_v13 = vld [vmem:[#allocation22 + $0x358] sm:$0xff]  ;;  %v7893_v25 = vcombine.high %v5236_v53, %v5240_v23 }
 0xe7c   :  { %6966 = vmatprep.subr.bf16.mxu1 %v7839_v24  ;;  %v5241_v4 = vld [vmem:[#allocation22 + $0x378] sm:$0xff]  ;;  %v7884_v24 = vcombine.low %v5228_v2, %v5232_v3  ;;  %v7933_v3 = vcombine.high %v5276_v55, %v5280_v58 }
 0xe7d   :  { %v7895_v54 = vcombine.high %v5237_v13, %v5241_v4  ;;  %v7894_v20 = vcombine.low %v5237_v13, %v5241_v4  ;;  %v5292_v13 = vld [vmem:[#allocation22 + $0x510] sm:$0xff] }
 0xe7e   :  { %6885 = vmatpush1.bf16.msra.mxu0 %v7836_v60  ;;  %v5248_v60 = vld [vmem:[#allocation22 + $0x3b0] sm:$0xff] }
 0xe7f   :  { %6967 = vmatpush1.bf16.msra.mxu1 %v7838_v17  ;;  %6886 = vmatprep.subr.bf16.mxu0 %v7845_v19  ;;  %v5245_v17 = vld [vmem:[#allocation22 + $0x398] sm:$0xff]  ;;  %v7901_v15 = vcombine.high %v5244_v12, %v5248_v60  ;;  %v5296_v4 = vld [vmem:[#allocation22 + $0x530] sm:$0xff] }
 0xe80   :  { %6968 = vmatprep.subr.bf16.mxu1 %v7847_v14  ;;  %v5249_v19 = vld [vmem:[#allocation22 + $0x3b8] sm:$0xff]  ;;  %v7892_v14 = vcombine.low %v5236_v53, %v5240_v23 }
 0xe81   :  { %v7903_v32 = vcombine.high %v5245_v17, %v5249_v19  ;;  %v7902_v29 = vcombine.low %v5245_v17, %v5249_v19  ;;  %v5304_v17 = vld [vmem:[#allocation22 + $0x570] sm:$0xff]  ;;  %v5301_v19 = vld [vmem:[#allocation22 + $0x558] sm:$0xff] }
 0xe82   :  { %6887 = vmatpush1.bf16.msra.mxu0 %v7844_v22  ;;  %v5256_v22 = vld [vmem:[#allocation22 + $0x3f0] sm:$0xff] }
 0xe83   :  { %6969 = vmatpush1.bf16.msra.mxu1 %v7846_v27  ;;  %6888 = vmatprep.subr.bf16.mxu0 %v7853_v28  ;;  %v5253_v27 = vld [vmem:[#allocation22 + $0x3d8] sm:$0xff]  ;;  %v7909_v30 = vcombine.high %v5252_v26, %v5256_v22 }
 0xe84   :  { %6970 = vmatprep.subr.bf16.mxu1 %v7855_v46  ;;  %v5257_v28 = vld [vmem:[#allocation22 + $0x3f8] sm:$0xff]  ;;  %v7900_v46 = vcombine.low %v5244_v12, %v5248_v60  ;;  %v5300_v60 = vld [vmem:[#allocation22 + $0x550] sm:$0xff] }
 0xe85   :  { %v7911_v31 = vcombine.high %v5253_v27, %v5257_v28  ;;  %v7910_v35 = vcombine.low %v5253_v27, %v5257_v28  ;;  %v5312_v27 = vld [vmem:[#allocation22 + $0x5b0] sm:$0xff]  ;;  %v5309_v28 = vld [vmem:[#allocation22 + $0x598] sm:$0xff] }
 0xe86   :  { %6889 = vmatpush1.bf16.msra.mxu0 %v7852_v34  ;;  %v5264_v34 = vld [vmem:[#allocation22 + $0x430] sm:$0xff] }
 0xe87   :  { %6971 = vmatpush1.bf16.msra.mxu1 %v7854_v36  ;;  %6890 = vmatprep.subr.bf16.mxu0 %v7861_v37  ;;  %v5261_v36 = vld [vmem:[#allocation22 + $0x418] sm:$0xff]  ;;  %v7917_v42 = vcombine.high %v5260_v33, %v5264_v34 }
 0xe88   :  { %6972 = vmatprep.subr.bf16.mxu1 %v7863_v41  ;;  %v5265_v37 = vld [vmem:[#allocation22 + $0x438] sm:$0xff]  ;;  %v7908_v41 = vcombine.low %v5252_v26, %v5256_v22  ;;  %v5308_v22 = vld [vmem:[#allocation22 + $0x590] sm:$0xff] }
 0xe89   :  { %v7919_v39 = vcombine.high %v5261_v36, %v5265_v37  ;;  %v7918_v49 = vcombine.low %v5261_v36, %v5265_v37  ;;  %v5320_v36 = vld [vmem:[#allocation22 + $0x5f0] sm:$0xff]  ;;  %v5317_v37 = vld [vmem:[#allocation22 + $0x5d8] sm:$0xff] }
 0xe8a   :  { %6891 = vmatpush1.bf16.msra.mxu0 %v7860_v38  ;;  %v5272_v38 = vld [vmem:[#allocation22 + $0x470] sm:$0xff] }
 0xe8b   :  { %6973 = vmatpush1.bf16.msra.mxu1 %v7862_v45  ;;  %6892 = vmatprep.subr.bf16.mxu0 %v7869_v51  ;;  %v7916_v45 = vcombine.low %v5260_v33, %v5264_v34  ;;  %v5269_v51 = vld [vmem:[#allocation22 + $0x458] sm:$0xff]  ;;  %v7925_v50 = vcombine.high %v5268_v44, %v5272_v38  ;;  %v5316_v34 = vld [vmem:[#allocation22 + $0x5d0] sm:$0xff] }
 0xe8c   :  { %6974 = vmatprep.subr.bf16.mxu1 %v7871_v61  ;;  %v5273_v61 = vld [vmem:[#allocation22 + $0x478] sm:$0xff] }
 0xe8d   :  { %v7926_v2 = vcombine.low %v5269_v51, %v5273_v61 }
 0xe8e   :  { %6893 = vmatpush1.bf16.msra.mxu0 %v7868_v40  ;;  %v7927_v40 = vcombine.high %v5269_v51, %v5273_v61  ;;  %v5325_v51 = vld [vmem:[#allocation22 + $0x618] sm:$0xff] }
 0xe8f   :  { %6975 = vmatpush1.bf16.msra.mxu1 %v7870_v59  ;;  %6894 = vmatprep.subr.bf16.mxu0 %v7877_v57  ;;  %v5277_v59 = vld [vmem:[#allocation22 + $0x498] sm:$0xff] }
 0xe90   :  { %6976 = vmatprep.subr.bf16.mxu1 %v7879_v18  ;;  %v5281_v57 = vld [vmem:[#allocation22 + $0x4b8] sm:$0xff]  ;;  %v7924_v18 = vcombine.low %v5268_v44, %v5272_v38  ;;  %v5324_v38 = vld [vmem:[#allocation22 + $0x610] sm:$0xff] }
 0xe91   :  { %v7935_v5 = vcombine.high %v5277_v59, %v5281_v57  ;;  %v5329_v61 = vld [vmem:[#allocation22 + $0x638] sm:$0xff] }
 0xe92   :  { %6895 = vmatpush1.bf16.msra.mxu0 %v7876_v7  ;;  %v5288_v7 = vld [vmem:[#allocation22 + $0x4f0] sm:$0xff] }
 0xe93   :  { %6977 = vmatpush1.bf16.msra.mxu1 %v7878_v9  ;;  %6896 = vmatprep.subr.bf16.mxu0 %v7885_v10  ;;  %v5285_v9 = vld [vmem:[#allocation22 + $0x4d8] sm:$0xff]  ;;  %v7941_v53 = vcombine.high %v5284_v6, %v5288_v7 }
 0xe94   :  { %6978 = vmatprep.subr.bf16.mxu1 %v7887_v62  ;;  %v5289_v10 = vld [vmem:[#allocation22 + $0x4f8] sm:$0xff]  ;;  %v7932_v62 = vcombine.low %v5276_v55, %v5280_v58  ;;  %v7983_v58 = vcombine.high %v5325_v51, %v5329_v61 }
 0xe95   :  { %v7943_v23 = vcombine.high %v5285_v9, %v5289_v10 }
 0xe96   :  { %6897 = vmatpush1.bf16.msra.mxu0 %v7884_v24  ;;  %v5293_v24 = vld [vmem:[#allocation22 + $0x518] sm:$0xff] }
 0xe97   :  { %6979 = vmatpush1.bf16.msra.mxu1 %v7886_v16  ;;  %6898 = vmatprep.subr.bf16.mxu0 %v7893_v25  ;;  %v5297_v16 = vld [vmem:[#allocation22 + $0x538] sm:$0xff]  ;;  %v7942_v25 = vcombine.low %v5285_v9, %v5289_v10  ;;  %v5344_v9 = vld [vmem:[#allocation22 + $0x6b0] sm:$0xff] }
 0xe98   :  { %6980 = vmatprep.subr.bf16.mxu1 %v7895_v54  ;;  %v7949_v54 = vcombine.high %v5292_v13, %v5296_v4  ;;  %v7951_v12 = vcombine.high %v5293_v24, %v5297_v16  ;;  %v5341_v10 = vld [vmem:[#allocation22 + $0x698] sm:$0xff] }
 0xe9a   :  { %6899 = vmatpush1.bf16.msra.mxu0 %v7892_v14  ;;  %v5305_v14 = vld [vmem:[#allocation22 + $0x578] sm:$0xff] }
 0xe9b   :  { %6981 = vmatpush1.bf16.msra.mxu1 %v7894_v20  ;;  %6900 = vmatprep.subr.bf16.mxu0 %v7901_v15  ;;  %v7948_v20 = vcombine.low %v5292_v13, %v5296_v4  ;;  %v7950_v15 = vcombine.low %v5293_v24, %v5297_v16  ;;  %v7959_v26 = vcombine.high %v5301_v19, %v5305_v14  ;;  %v5348_v4 = vld [vmem:[#allocation22 + $0x6d0] sm:$0xff]  ;;  %v5349_v16 = vld [vmem:[#allocation22 + $0x6d8] sm:$0xff] }
 0xe9c   :  { %6982 = vmatprep.subr.bf16.mxu1 %v7903_v32  ;;  %v7957_v32 = vcombine.high %v5300_v60, %v5304_v17  ;;  %v5352_v24 = vld [vmem:[#allocation22 + $0x6f0] sm:$0xff] }
 0xe9e   :  { %6901 = vmatpush1.bf16.msra.mxu0 %v7900_v46  ;;  %v5313_v46 = vld [vmem:[#allocation22 + $0x5b8] sm:$0xff] }
 0xe9f   :  { %6983 = vmatpush1.bf16.msra.mxu1 %v7902_v29  ;;  %6902 = vmatprep.subr.bf16.mxu0 %v7909_v30  ;;  %v7956_v29 = vcombine.low %v5300_v60, %v5304_v17  ;;  %v7958_v30 = vcombine.low %v5301_v19, %v5305_v14  ;;  %v7967_v33 = vcombine.high %v5309_v28, %v5313_v46  ;;  %v5356_v17 = vld [vmem:[#allocation22 + $0x710] sm:$0xff]  ;;  %v5357_v14 = vld [vmem:[#allocation22 + $0x718] sm:$0xff] }
 0xea0   :  { %6984 = vmatprep.subr.bf16.mxu1 %v7911_v31  ;;  %v7965_v31 = vcombine.high %v5308_v22, %v5312_v27  ;;  %v5360_v19 = vld [vmem:[#allocation22 + $0x730] sm:$0xff] }
 0xea2   :  { %6903 = vmatpush1.bf16.msra.mxu0 %v7908_v41  ;;  %v5321_v41 = vld [vmem:[#allocation22 + $0x5f8] sm:$0xff] }
 0xea3   :  { %6985 = vmatpush1.bf16.msra.mxu1 %v7910_v35  ;;  %6913 = vmatprep.subr.bf16.mxu0 %v7917_v42  ;;  %v7964_v35 = vcombine.low %v5308_v22, %v5312_v27  ;;  %v7966_v42 = vcombine.low %v5309_v28, %v5313_v46  ;;  %v7975_v44 = vcombine.high %v5317_v37, %v5321_v41  ;;  %v5364_v27 = vld [vmem:[#allocation22 + $0x750] sm:$0xff]  ;;  %v5365_v46 = vld [vmem:[#allocation22 + $0x758] sm:$0xff] }
 0xea4   :  { %6995 = vmatprep.subr.bf16.mxu1 %v7919_v39  ;;  %v7973_v39 = vcombine.high %v5316_v34, %v5320_v36  ;;  %v5368_v28 = vld [vmem:[#allocation22 + $0x770] sm:$0xff] }
 0xea5   :  { %6905 = vmatmul.mubr.bf16.vlgmr.msra.gmra.mrb[24].mxu0 %v9820_v43 }
 0xea6   :  { %6987 = vmatmul.mubr.bf16.vlgmr.msra.gmra.mrb[36].mxu1 %v9820_v43  ;;  %6914 = vmatpush1.bf16.msra.mxu0 %v7916_v45  ;;  %v7934_v43 = vcombine.low %v5277_v59, %v5281_v57  ;;  %v5328_v45 = vld [vmem:[#allocation22 + $0x630] sm:$0xff]  ;;  %v5333_v57 = vld [vmem:[#allocation22 + $0x658] sm:$0xff] }
 0xea7   :  { %6945 = vmatprep.mubr.bf16.mxu0 %v9826_v8  ;;  %6996 = vmatpush1.bf16.msra.mxu1 %v7918_v49  ;;  %v7972_v49 = vcombine.low %v5316_v34, %v5320_v36  ;;  %v7981_v55 = vcombine.high %v5324_v38, %v5328_v45  ;;  %v5336_v59 = vld [vmem:[#allocation22 + $0x670] sm:$0xff] }
 0xea8   :  { %7027 = vmatprep.mubr.bf16.mxu1 %v9826_v8  ;;  %6915 = vmatprep.subr.bf16.mxu0 %v7925_v50  ;;  %v7940_v8 = vcombine.low %v5284_v6, %v5288_v7  ;;  %v7974_v50 = vcombine.low %v5317_v37, %v5321_v41  ;;  %v5340_v7 = vld [vmem:[#allocation22 + $0x690] sm:$0xff]  ;;  %v5373_v41 = vld [vmem:[#allocation22 + $0x798] sm:$0xff] }
 0xea9   :  { %6997 = vmatprep.subr.bf16.mxu1 %v7927_v40  ;;  %v5332_v40 = vld [vmem:[#allocation22 + $0x650] sm:$0xff] }
 0xeaa   :  { %6916 = vmatpush1.bf16.msra.mxu0 %v7924_v18  ;;  %v5337_v18 = vld [vmem:[#allocation22 + $0x678] sm:$0xff]  ;;  %v5372_v36 = vld [vmem:[#allocation22 + $0x790] sm:$0xff] }
 0xeab   :  { %6998 = vmatpush1.bf16.msra.mxu1 %v7926_v2  ;;  %6917 = vmatprep.subr.bf16.mxu0 %v7933_v3  ;;  %v7980_v2 = vcombine.low %v5324_v38, %v5328_v45  ;;  %v7982_v3 = vcombine.low %v5325_v51, %v5329_v61  ;;  %v7991_v6 = vcombine.high %v5333_v57, %v5337_v18  ;;  %v5376_v37 = vld [vmem:[#allocation22 + $0x7b0] sm:$0xff]  ;;  %v5381_v61 = vld [vmem:[#allocation22 + $0x7d8] sm:$0xff] }
 0xeac   :  { %6999 = vmatprep.subr.bf16.mxu1 %v7935_v5  ;;  %v7989_v5 = vcombine.high %v5332_v40, %v5336_v59  ;;  %v5380_v45 = vld [vmem:[#allocation22 + $0x7d0] sm:$0xff] }
 0xead   :  { %v5384_v51 = vld [vmem:[#allocation22 + $0x7f0] sm:$0xff] }
 0xeae   :  { %6918 = vmatpush1.bf16.msra.mxu0 %v7932_v62  ;;  %v5345_v62 = vld [vmem:[#allocation22 + $0x6b8] sm:$0xff] }
 0xeaf   :  { %7000 = vmatpush1.bf16.msra.mxu1 %v7934_v43  ;;  %6919 = vmatprep.subr.bf16.mxu0 %v7941_v53  ;;  %v7988_v43 = vcombine.low %v5332_v40, %v5336_v59  ;;  %v7990_v53 = vcombine.low %v5333_v57, %v5337_v18  ;;  %v7999_v13 = vcombine.high %v5341_v10, %v5345_v62 }
 0xeb0   :  { %7001 = vmatprep.subr.bf16.mxu1 %v7943_v23  ;;  %v7997_v23 = vcombine.high %v5340_v7, %v5344_v9  ;;  %v8036_v59 = vcombine.low %v5380_v45, %v5384_v51 }
 0xeb2   :  { %6920 = vmatpush1.bf16.msra.mxu0 %v7940_v8  ;;  %v5353_v8 = vld [vmem:[#allocation22 + $0x6f8] sm:$0xff] }
 0xeb3   :  { %7002 = vmatpush1.bf16.msra.mxu1 %v7942_v25  ;;  %6921 = vmatprep.subr.bf16.mxu0 %v7949_v54  ;;  %v7996_v25 = vcombine.low %v5340_v7, %v5344_v9  ;;  %v7998_v54 = vcombine.low %v5341_v10, %v5345_v62  ;;  %v8007_v60 = vcombine.high %v5349_v16, %v5353_v8  ;;  %v5386_v62 = vld [vmem:[%s9954_s18] ss:$4 sm:$0xff] }
 0xeb4   :  { %7003 = vmatprep.subr.bf16.mxu1 %v7951_v12  ;;  %v8005_v12 = vcombine.high %v5348_v4, %v5352_v24 }
 0xeb6   :  { %6922 = vmatpush1.bf16.msra.mxu0 %v7948_v20  ;;  %v5361_v20 = vld [vmem:[#allocation22 + $0x738] sm:$0xff] }
 0xeb7   :  { %7004 = vmatpush1.bf16.msra.mxu1 %v7950_v15  ;;  %6923 = vmatprep.subr.bf16.mxu0 %v7957_v32  ;;  %v8004_v15 = vcombine.low %v5348_v4, %v5352_v24  ;;  %v8006_v32 = vcombine.low %v5349_v16, %v5353_v8  ;;  %v8015_v22 = vcombine.high %v5357_v14, %v5361_v20 }
 0xeb8   :  { %7005 = vmatprep.subr.bf16.mxu1 %v7959_v26  ;;  %v8013_v26 = vcombine.high %v5356_v17, %v5360_v19 }
 0xeba   :  { %6924 = vmatpush1.bf16.msra.mxu0 %v7956_v29  ;;  %v5369_v29 = vld [vmem:[#allocation22 + $0x778] sm:$0xff] }
 0xebb   :  { %7006 = vmatpush1.bf16.msra.mxu1 %v7958_v30  ;;  %6925 = vmatprep.subr.bf16.mxu0 %v7965_v31  ;;  %v8012_v30 = vcombine.low %v5356_v17, %v5360_v19  ;;  %v8014_v31 = vcombine.low %v5357_v14, %v5361_v20  ;;  %v8023_v34 = vcombine.high %v5365_v46, %v5369_v29 }
 0xebc   :  { %7007 = vmatprep.subr.bf16.mxu1 %v7967_v33  ;;  %v8021_v33 = vcombine.high %v5364_v27, %v5368_v28  ;;  %v5407_v19 = vrot.slane %v5386_v62, %v9539_v63  ;;  %v5411_v14 = vrot.slane %v5386_v62, %v9541_v0 }
 0xebe   :  { %6926 = vmatpush1.bf16.msra.mxu0 %v7964_v35  ;;  %v5377_v35 = vld [vmem:[#allocation22 + $0x7b8] sm:$0xff] }
 0xebf   :  { %7008 = vmatpush1.bf16.msra.mxu1 %v7966_v42  ;;  %6927 = vmatprep.subr.bf16.mxu0 %v7973_v39  ;;  %v8020_v42 = vcombine.low %v5364_v27, %v5368_v28  ;;  %v8022_v39 = vcombine.low %v5365_v46, %v5369_v29  ;;  %v8031_v38 = vcombine.high %v5373_v41, %v5377_v35 }
 0xec0   :  { %7009 = vmatprep.subr.bf16.mxu1 %v7975_v44  ;;  %v8029_v44 = vcombine.high %v5372_v36, %v5376_v37  ;;  %v5419_v29 = vrot.slane %v5386_v62, %v9555_v11 }
 0xec2   :  { %6928 = vmatpush1.bf16.msra.mxu0 %v7972_v49  ;;  %v5385_v49 = vld [vmem:[#allocation22 + $0x7f8] sm:$0xff] }
 0xec3   :  { %7010 = vmatpush1.bf16.msra.mxu1 %v7974_v50  ;;  %6929 = vmatprep.subr.bf16.mxu0 %v7981_v55  ;;  %v8028_v50 = vcombine.low %v5372_v36, %v5376_v37  ;;  %v8030_v55 = vcombine.low %v5373_v41, %v5377_v35  ;;  %v8039_v40 = vcombine.high %v5381_v61, %v5385_v49 }
 0xec4   :  { %7011 = vmatprep.subr.bf16.mxu1 %v7983_v58  ;;  %v8037_v58 = vcombine.high %v5380_v45, %v5384_v51  ;;  %v8038_v57 = vcombine.low %v5381_v61, %v5385_v49 }
 0xec6   :  { %6930 = vmatpush1.bf16.msra.mxu0 %v7980_v2 }
 0xec7   :  { %7012 = vmatpush1.bf16.msra.mxu1 %v7982_v3  ;;  %6931 = vmatprep.subr.bf16.mxu0 %v7989_v5 }
 0xec8   :  { %7013 = vmatprep.subr.bf16.mxu1 %v7991_v6 }
 0xeca   :  { %6932 = vmatpush1.bf16.msra.mxu0 %v7988_v43  ;;  %v5391_v43 = vrot.slane %v5386_v62, %v9512_v47 }
 0xecb   :  { %7014 = vmatpush1.bf16.msra.mxu1 %v7990_v53  ;;  %6933 = vmatprep.subr.bf16.mxu0 %v7997_v23  ;;  %v5395_v53 = vrot.slane %v5386_v62, %v9514_v48 }
 0xecc   :  { %7015 = vmatprep.subr.bf16.mxu1 %v7999_v13 }
 0xece   :  { %6934 = vmatpush1.bf16.msra.mxu0 %v7996_v25  ;;  %v5403_v25 = vrot.slane %v5386_v62, %v9528_v56 }
 0xecf   :  { %7016 = vmatpush1.bf16.msra.mxu1 %v7998_v54  ;;  %6935 = vmatprep.subr.bf16.mxu0 %v8005_v12 }
 0xed0   :  { %7017 = vmatprep.subr.bf16.mxu1 %v8007_v60 }
 0xed2   :  { %6936 = vmatpush1.bf16.msra.mxu0 %v8004_v15  ;;  %v5415_v15 = vrot.slane %v5386_v62, %v9543_v1 }
 0xed3   :  { %7018 = vmatpush1.bf16.msra.mxu1 %v8006_v32  ;;  %6937 = vmatprep.subr.bf16.mxu0 %v8013_v26 }
 0xed4   :  { %7019 = vmatprep.subr.bf16.mxu1 %v8015_v22 }
 0xed6   :  { %6938 = vmatpush1.bf16.msra.mxu0 %v8012_v30 }
 0xed7   :  { %7020 = vmatpush1.bf16.msra.mxu1 %v8014_v31  ;;  %6939 = vmatprep.subr.bf16.mxu0 %v8021_v33 }
 0xed8   :  { %7021 = vmatprep.subr.bf16.mxu1 %v8023_v34 }
 0xeda   :  { %6940 = vmatpush1.bf16.msra.mxu0 %v8020_v42 }
 0xedb   :  { %7022 = vmatpush1.bf16.msra.mxu1 %v8022_v39  ;;  %6941 = vmatprep.subr.bf16.mxu0 %v8029_v44 }
 0xedc   :  { %7023 = vmatprep.subr.bf16.mxu1 %v8031_v38 }
 0xede   :  { %6942 = vmatpush1.bf16.msra.mxu0 %v8028_v50 }
 0xedf   :  { %7024 = vmatpush1.bf16.msra.mxu1 %v8030_v55  ;;  %6943 = vmatprep.subr.bf16.mxu0 %v8037_v58 }
 0xee0   :  { %7025 = vmatprep.subr.bf16.mxu1 %v8039_v40 }
 0xee2   :  { %6944 = vmatpush1.bf16.msra.mxu0 %v8036_v59 }
 0xee3   :  { %7026 = vmatpush1.bf16.msra.mxu1 %v8038_v57 }
 0xee5   :  { %6946 = vmatmul.mubr.bf16.vlgmr.msra.gmra.mrb[24].mxu0 %v9831_v21 }
 0xee6   :  { %7028 = vmatmul.mubr.bf16.vlgmr.msra.gmra.mrb[36].mxu1 %v9831_v21  ;;  %v5399_v21 = vrot.slane %v5386_v62, %v9521_v52  ;;  %v8041_v62 = vld [vmem:[%s9954_s18 + $0x2] ss:$4 sm:$0xff] }
 0xf38   :  { %v6783_v18 = vpop.f32.mrb[20].mxu0  ;;  %v6865_v2 = vpop.f32.mrb[32].mxu1 }
 0xf39   :  { %v6785_v3 = vpop.f32.mrb[21].mxu0  ;;  %v6867_v5 = vpop.f32.mrb[33].mxu1  ;;  %v9848_v23 = vadd.f32 %v6783_v18, %v5391_v43  ;;  %v9857_v16 = vadd.f32 %v6865_v2, %v5399_v21 }
 0xf3a   :  { %v6787_v6 = vpop.f32.mrb[22].mxu0  ;;  %v6869_v7 = vpop.f32.mrb[34].mxu1  ;;  %v9850_v13 = vadd.f32 %v6785_v3, %v5395_v53  ;;  %v9864_v60 = vadd.f32 %v6867_v5, %v5403_v25  ;;  %v7146_v25 = vrot.slane %v8041_v62, %v9514_v48 }
 0xf3b   :  { %v6788_v9 = vpop.f32.mrb[23].mxu0  ;;  %v6870_v10 = vpop.f32.mrb[35].mxu1  ;;  %v7046_v4 = vmul.f32 %v9848_v23, %v9848_v23  ;;  %v7048_v12 = vmul.f32 %v9857_v16, %v9857_v16 }
 0xf3c   :  { %v7047_v24 = vmul.f32 %v9850_v13, %v9850_v13  ;;  %v7036_v8 = vadd.f32 %v9850_v13, %v9848_v23  ;;  %v7049_v22 = vmul.f32 %v9864_v60, %v9864_v60  ;;  %v8040_v10 = vld [vmem:[%s9954_s18 + $0x1] ss:$4 sm:$0xff] }
 0xf3d   :  { %v7091_v43 = vrot.slane %v8040_v10, %v9512_v47  ;;  %v7095_v53 = vrot.slane %v8040_v10, %v9514_v48  ;;  %v7099_v21 = vrot.slane %v8040_v10, %v9521_v52 }
 0xf3e   :  { %v7054_v54 = vadd.f32 %v7047_v24, %v7046_v4  ;;  %v7037_v17 = vadd.f32 %v9857_v16, %v7036_v8  ;;  %v7103_v4 = vrot.slane %v8040_v10, %v9528_v56  ;;  %v7107_v24 = vrot.slane %v8040_v10, %v9539_v63 }
 0xf3f   :  { %v7142_v8 = vrot.slane %v8041_v62, %v9512_v47  ;;  %v7170_v47 = vrot.slane %v8041_v62, %v9555_v11 }
 0xf40   :  { %v7055_v20 = vadd.f32 %v7054_v54, %v7048_v12  ;;  %v7038_v26 = vadd.f32 %v9864_v60, %v7037_v17  ;;  %v7150_v54 = vrot.slane %v8041_v62, %v9521_v52  ;;  %v7154_v12 = vrot.slane %v8041_v62, %v9528_v56 }
 0xf41   :  { %v7158_v17 = vrot.slane %v8041_v62, %v9539_v63 }
 0xf42   :  { %v7056_v34 = vadd.f32 %v7055_v20, %v7049_v22  ;;  %v7115_v20 = vrot.slane %v8040_v10, %v9543_v1 }
 0xfb8   :  { %v6947_v32 = vpop.f32.mrb[24].mxu0 }
 0xfb9   :  { %v9873_v27 = vadd.f32 %v6947_v32, %v5407_v19  ;;  %v7029_v28 = vpop.f32.mrb[36].mxu1  ;;  %v6949_v46 = vpop.f32.mrb[25].mxu0  ;;  %v7111_v19 = vrot.slane %v8040_v10, %v9541_v0  ;;  %v7119_v32 = vrot.slane %v8040_v10, %v9555_v11 }
 0xfba   :  { %v9876_v30 = vadd.f32 %v6949_v46, %v5411_v14  ;;  %v7031_v31 = vpop.f32.mrb[37].mxu1  ;;  %v6951_v33 = vpop.f32.mrb[26].mxu0  ;;  %v8134_v41 = vadd.f32 %v7029_v28, %v5415_v15  ;;  %v7162_v14 = vrot.slane %v8041_v62, %v9541_v0  ;;  %v7166_v15 = vrot.slane %v8041_v62, %v9543_v1 }
 0xfbb   :  { %v7039_v36 = vadd.f32 %v9873_v27, %v7038_v26  ;;  %v7050_v37 = vmul.f32 %v9873_v27, %v9873_v27  ;;  %v7033_v35 = vpop.f32.mrb[38].mxu1  ;;  %v6952_v42 = vpop.f32.mrb[27].mxu0  ;;  %v8135_v51 = vadd.f32 %v7031_v31, %v5419_v29 }
 0xfbc   :  { %v7051_v39 = vmul.f32 %v9876_v30, %v9876_v30  ;;  %v7034_v44 = vpop.f32.mrb[39].mxu1  ;;  %v7052_v61 = vmul.f32 %v8134_v41, %v8134_v41 }
 0xfbd   :  { %v7057_v38 = vadd.f32 %v7056_v34, %v7050_v37  ;;  %v7040_v45 = vadd.f32 %v9876_v30, %v7039_v36  ;;  %v7053_v58 = vmul.f32 %v8135_v51, %v8135_v51 }
 0xfbf   :  { %v7041_v49 = vadd.f32 %v8134_v41, %v7040_v45  ;;  %v7058_v50 = vadd.f32 %v7057_v38, %v7051_v39 }
 0xfc1   :  { %v7042_v55 = vadd.f32 %v8135_v51, %v7041_v49  ;;  %v7059_v40 = vadd.f32 %v7058_v50, %v7052_v61 }
 0xfc3   :  { %7043 = vadd.xlane.f32.xlu0 %v7042_v55  ;;  %v7060_v59 = vadd.f32 %v7059_v40, %v7053_v58 }
 0xfc5   :  { %7061 = vadd.xlane.f32.xlu1 %v7060_v59 }
0x1050   :  { %v7044_v57 = vpop.xlane.xlu0 %7043 }
0x1051   :  { %v7045_v18 = vmul.f32 0.0009765625, %v7044_v57 }
0x1052   :  { %v7062_v2 = vpop.xlane.xlu1 %7061 }
0x1053   :  { %v7063_v3 = vmul.f32 0.0009765625, %v7062_v2  ;;  %v7064_v5 = vmul.f32 %v7045_v18, %v7045_v18  ;;  %v7069_v48 = vsub.f32 %v9848_v23, %v7045_v18  ;;  %v7070_v52 = vsub.f32 %v9850_v13, %v7045_v18 }
0x1054   :  { %v7071_v56 = vsub.f32 %v9857_v16, %v7045_v18  ;;  %v7072_v63 = vsub.f32 %v9864_v60, %v7045_v18  ;;  %v7073_v22 = vsub.f32 %v9873_v27, %v7045_v18  ;;  %v7074_v0 = vsub.f32 %v9876_v30, %v7045_v18 }
0x1055   :  { %v7065_v6 = vsub.f32 %v7063_v3, %v7064_v5  ;;  %v7075_v28 = vsub.f32 %v8134_v41, %v7045_v18  ;;  %v7076_v46 = vsub.f32 %v8135_v51, %v7045_v18 }
0x1057   :  { %v7066_v7 = vmax.f32 %v7065_v6, 0.0 }
0x1059   :  { %v7067_v9 = vadd.f32 1e-05, %v7066_v7 }
0x105b   :  { %8851 = vrsqrt.f32 %v7067_v9 }
0x1065   :  { %v8852_v26 = vpop.eup %8851 }
0x1066   :  { %v7077_v1 = vmul.f32 %v8852_v26, %v7069_v48  ;;  %v7078_v29 = vmul.f32 %v8852_v26, %v7070_v52  ;;  %v7079_v31 = vmul.f32 %v8852_v26, %v7071_v56  ;;  %v7080_v33 = vmul.f32 %v8852_v26, %v7072_v63 }
0x1067   :  { %v7081_v11 = vmul.f32 %v8852_v26, %v7073_v22  ;;  %v7082_v34 = vmul.f32 %v8852_v26, %v7074_v0  ;;  %v7083_v23 = vmul.f32 %v8852_v26, %v7075_v28  ;;  %v7084_v36 = vmul.f32 %v8852_v26, %v7076_v46 }
0x1068   :  { %v7128_v13 = vmul.f32 %v7091_v43, %v7077_v1  ;;  %v7129_v37 = vmul.f32 %v7095_v53, %v7078_v29  ;;  %v7130_v16 = vmul.f32 %v7099_v21, %v7079_v31  ;;  %v7131_v35 = vmul.f32 %v7103_v4, %v7080_v33 }
0x1069   :  { %v7132_v60 = vmul.f32 %v7107_v24, %v7081_v11  ;;  %v7133_v42 = vmul.f32 %v7111_v19, %v7082_v34  ;;  %v7134_v39 = vmul.f32 %v7115_v20, %v7083_v23  ;;  %v7135_v27 = vmul.f32 %v7119_v32, %v7084_v36 }
0x106a   :  { %v7179_v44 = vadd.f32 %v7142_v8, %v7128_v13  ;;  %v7180_v30 = vadd.f32 %v7146_v25, %v7129_v37  ;;  %v7181_v41 = vadd.f32 %v7150_v54, %v7130_v16  ;;  %v7182_v38 = vadd.f32 %v7154_v12, %v7131_v35 }
0x106b   :  { %v7183_v45 = vadd.f32 %v7158_v17, %v7132_v60  ;;  %v7184_v51 = vadd.f32 %v7162_v14, %v7133_v42  ;;  %v7185_v61 = vadd.f32 %v7166_v15, %v7134_v39  ;;  %v7186_v49 = vadd.f32 %v7170_v47, %v7135_v27 }
0x106c   :  { %v7187_v50 = vmax.f32 %v7179_v44, 0.0  ;;  %v7188_v55 = vmax.f32 %v7180_v30, 0.0  ;;  %v7189_v58 = vmax.f32 %v7181_v41, 0.0  ;;  %v7190_v40 = vmax.f32 %v7182_v38, 0.0 }
0x106d   :  { %v7191_v59 = vmax.f32 %v7183_v45, 0.0  ;;  %v7192_v57 = vmax.f32 %v7184_v51, 0.0  ;;  %v7193_v18 = vmax.f32 %v7185_v61, 0.0  ;;  %v7194_v2 = vmax.f32 %v7186_v49, 0.0 }
0x106e   :  { %7195 = vst [vmem:[%s9972_s6] sm:$0xff] %v7187_v50  ;;  %7196 = vst [vmem:[%s9972_s6 + $0x8] sm:$0xff] %v7188_v55 }
0x106f   :  { %7197 = vst [vmem:[%s9972_s6 + $0x10] sm:$0xff] %v7189_v58  ;;  %7198 = vst [vmem:[%s9972_s6 + $0x18] sm:$0xff] %v7190_v40 }
0x1070   :  { %7199 = vst [vmem:[%s9972_s6 + $0x20] sm:$0xff] %v7191_v59  ;;  %7200 = vst [vmem:[%s9972_s6 + $0x28] sm:$0xff] %v7192_v57 }
0x1071   :  { %7201 = vst [vmem:[%s9972_s6 + $0x30] sm:$0xff] %v7193_v18  ;;  %7202 = vst [vmem:[%s9972_s6 + $0x38] sm:$0xff] %v7194_v2 }
0x1072   :  { %7207 = vsyncpa [#allocation3], 1 }
0x1073   :  { %7208 = vsyncpa [#allocation5], 1 }
0x1074   :  { %7209 = vsyncpa [#allocation8], 1 }
0x1075   :  { %7210 = vsyncpa [#allocation11], 1 }
0x1076   :  { %7211 = vsyncpa [#allocation14], 1 }
0x1077   :  { %7212 = vsyncpa [#allocation17], 1 }
0x1078   :  { %7213 = vsyncpa [#allocation20], 1 }
0x1079   :  { %7214 = vsyncpa [#allocation23], 1 }

</bundles_post_ra>
